<compile_context>
chip_gen: v7x
topology: tpu7x:2x2x1
jax: 0.10.0
libtpu: 0.0.40
codegen_flags: <defaults>
</compile_context>

<pallas_src>
import numpy as np
import jax
import jax.numpy as jnp
from jax.experimental import pallas as pl
from jax.experimental.pallas import tpu as pltpu

CORE = 32     # core_size
CONN = 32     # conn_size (must equal core_size, see module semantics)
NCONN = 4     # conn_num
OUT = 16      # output_size
BLOCK_M = 128  # batch rows per grid step (MXU height; fits any generation)

assert CORE == CONN, "OutCell is only shape-consistent when core_size == conn_size"

# ---- packed parameter layout ---------------------------------------------
# w_pro : (CONN, 2*CONN)        = [x_to_core_W | combine_Wx]      (fused prologue)
# w_main: (NW, CONN, CONN) with NW = 2 + 3*NCONN
NW = 2 + 3 * NCONN
W_CO, W_CMB_WY = 0, 1
W_C1 = 2
W_C2 = 2 + NCONN
W_OC_CONN = 2 + 2 * NCONN     # out_combine conn weights, lane-padded OUT -> CONN
# b     : (NB, CONN)
NB = 5 + 2 * NCONN
B_CORE, B_X2C, B_CO, B_CMB = 0, 1, 2, 3
B_C1 = 4
B_C2 = 4 + NCONN
B_OC = 4 + 2 * NCONN          # (core @ oc_W_core + oc_b), lane-padded OUT -> CONN


def outcell_kernel(x_ref, wpro_ref, w_ref, b_ref, conns_ref, misc_ref):
    # x_ref: (NCONN, BM, CONN); weights/biases grid-invariant.
    bm = x_ref.shape[1]

    # --- fused prologue: x @ [W_x2c | W_cmb_x] over all NCONN*BM rows -------
    x2 = x_ref[...].reshape(NCONN * bm, CONN)
    pro = jnp.dot(x2, wpro_ref[...], preferred_element_type=jnp.float32)
    t = jnp.tanh(pro[:, 0:CORE] + b_ref[B_X2C:B_X2C + 1, :])   # (NCONN*bm, CORE)
    xw = pro[:, CORE:CORE + CONN]                              # (NCONN*bm, CONN)

    # --- core update: depth-2 multiply tree ---------------------------------
    core = b_ref[B_CORE:B_CORE + 1, :]                         # original core param
    terms = [t[i * bm:(i + 1) * bm, :] for i in range(NCONN)]
    while len(terms) > 1:
        nxt = [terms[i] * terms[i + 1] for i in range(0, len(terms) - 1, 2)]
        if len(terms) % 2:
            nxt.append(terms[-1])
        terms = nxt
    core_new = terms[0] * core                                 # (bm, CORE)

    # --- y = relu(core_out(core_new)) ----------------------------------------
    y = jax.nn.relu(
        jnp.dot(core_new, w_ref[W_CO], preferred_element_type=jnp.float32)
        + b_ref[B_CO:B_CO + 1, :])                             # (bm, CONN)

    # --- out_combine accumulator: core term + bias folded at pack time ------
    acc = b_ref[B_OC:B_OC + 1, :]                              # (1, CONN), lanes OUT.. are 0

    # --- serial combine chain; comb_out + out_combine folded in -------------
    ys = []
    for idx in range(NCONN):
        y = jax.nn.relu(
            jnp.dot(y, w_ref[W_CMB_WY], preferred_element_type=jnp.float32)
            + xw[idx * bm:(idx + 1) * bm, :] + b_ref[B_CMB:B_CMB + 1, :])
        y = jax.nn.relu(
            jnp.dot(y, w_ref[W_C1 + idx], preferred_element_type=jnp.float32)
            + b_ref[B_C1 + idx:B_C1 + idx + 1, :])
        y = jax.nn.relu(
            jnp.dot(y, w_ref[W_C2 + idx], preferred_element_type=jnp.float32)
            + b_ref[B_C2 + idx:B_C2 + idx + 1, :])
        ys.append(y)
        acc = acc + jnp.dot(y, w_ref[W_OC_CONN + idx],
                            preferred_element_type=jnp.float32)

    # --- two lane-dense (bm, 128) blocks, single unmasked stores -------------
    conns_ref[...] = jnp.concatenate(ys, axis=1)               # (bm, NCONN*CONN)
    misc_ref[...] = jnp.concatenate(
        [core_new, acc, jnp.zeros((bm, 2 * CONN), jnp.float32)], axis=1)


def pack_params(p):
    """Pack weights/biases into three lane-dense slabs.  Call ONCE (not per step)."""
    padw = CONN - OUT
    wpro = jnp.concatenate([p["x2c_w"], p["cmb_wx"]], axis=1)            # (CONN, 2*CONN)
    wmain = jnp.concatenate([
        p["co_w"][None], p["cmb_wy"][None],
        p["c1_w"], p["c2_w"],
        jnp.pad(p["oc_wconn"], ((0, 0), (0, 0), (0, padw))),
    ], axis=0)                                                           # (NW, CONN, CONN)
    oc_const = p["core"] @ p["oc_wcore"] + p["oc_b"]                     # (1, OUT), param-only
    bias = jnp.concatenate([
        p["core"], p["x2c_b"], p["co_b"], p["cmb_b"],
        p["c1_b"], p["c2_b"],
        jnp.pad(oc_const, ((0, 0), (0, padw))),
    ], axis=0)                                                           # (NB, CONN)
    return (wpro.astype(jnp.float32), wmain.astype(jnp.float32),
            bias.astype(jnp.float32))


@jax.jit
def outcell_forward(x, wpro, wmain, bias):
    """x: (NCONN, B, CONN) -> (yconns (B,NCONN,CONN), core_new (B,CORE), y_out (B,OUT))."""
    nconn, batch, conn = x.shape
    assert nconn == NCONN and conn == CONN
    bm = min(BLOCK_M, batch)
    assert batch % bm == 0 and bm % 8 == 0
    grid = (batch // bm,)

    flops_per_row = (2 * CONN * (2 * CONN)            # fused prologue
                     + 2 * CORE * CONN                # core_out
                     + NCONN * 4 * 2 * CONN * CONN)   # combine, c1, c2, out_combine
    cost = pl.CostEstimate(
        flops=flops_per_row * batch,
        transcendentals=NCONN * CORE * batch,
        bytes_accessed=(x.size + wpro.size + wmain.size + bias.size
                        + 2 * batch * 4 * CONN) * 4)

    conns, misc = pl.pallas_call(
        outcell_kernel,
        out_shape=(jax.ShapeDtypeStruct((batch, NCONN * CONN), jnp.float32),
                   jax.ShapeDtypeStruct((batch, 4 * CONN), jnp.float32)),
        grid_spec=pltpu.PrefetchScalarGridSpec(
            num_scalar_prefetch=0,
            grid=grid,
            in_specs=[
                pl.BlockSpec((NCONN, bm, CONN), lambda m: (0, m, 0)),
                pl.BlockSpec((CONN, 2 * CONN), lambda m: (0, 0)),
                pl.BlockSpec((NW, CONN, CONN), lambda m: (0, 0, 0)),
                pl.BlockSpec((NB, CONN), lambda m: (0, 0)),
            ],
            out_specs=[
                pl.BlockSpec((bm, NCONN * CONN), lambda m: (m, 0)),
                pl.BlockSpec((bm, 4 * CONN), lambda m: (m, 0)),
            ]),
        compiler_params=pltpu.CompilerParams(
            dimension_semantics=("parallel",)),
        cost_estimate=cost,
    )(x, wpro, wmain, bias)

    yconns = conns.reshape(batch, NCONN, CONN)
    core_new = misc[:, 0:CORE]
    y_out = misc[:, CORE:CORE + OUT]
    return yconns, core_new, y_out


def ref_forward(x, p):
    """Pure-JAX reference (torch semantics with out=True), batched over axis 1 of x."""
    batch = x.shape[1]
    core_new = p["core"]
    for i in range(x.shape[0]):
        core_new = core_new * jnp.tanh(x[i] @ p["x2c_w"] + p["x2c_b"])
    y = jax.nn.relu(core_new @ p["co_w"] + p["co_b"])
    ys = []
    for idx in range(x.shape[0]):
        y = jax.nn.relu(y @ p["cmb_wy"] + x[idx] @ p["cmb_wx"] + p["cmb_b"])
        y = jax.nn.relu(y @ p["c1_w"][idx] + p["c1_b"][idx:idx + 1])
        y = jax.nn.relu(y @ p["c2_w"][idx] + p["c2_b"][idx:idx + 1])
        ys.append(y)
    yconns = jnp.stack(ys, axis=1)                                   # (B, NCONN, CONN)
    flat = jnp.concatenate(ys, axis=1)                               # (B, NCONN*CONN)
    cat = jnp.concatenate([flat, jnp.broadcast_to(p["core"], (batch, CORE))], axis=1)
    oc_w = jnp.concatenate(
        [p["oc_wconn"].reshape(NCONN * CONN, OUT), p["oc_wcore"]], axis=0)
    y_out = cat @ oc_w + p["oc_b"]
    return yconns, core_new, y_out


def make_params(key):
    def u(k, shape):
        return jax.random.uniform(k, shape, jnp.float32, -0.1, 0.1)
    ks = jax.random.split(key, 16)
    return {
        "core": jnp.ones((1, CORE), jnp.float32),        # nn.init.ones_
        "x2c_w": u(ks[0], (CONN, CORE)),
        "x2c_b": u(ks[1], (1, CORE)),
        "co_w": u(ks[2], (CORE, CONN)),
        "co_b": u(ks[3], (1, CONN)),
        "cmb_wy": u(ks[4], (CONN, CONN)),                # combine weight, y part
        "cmb_wx": u(ks[5], (CONN, CONN)),                # combine weight, x part
        "cmb_b": u(ks[6], (1, CONN)),
        "c1_w": u(ks[7], (NCONN, CONN, CONN)),
        "c1_b": u(ks[8], (NCONN, CONN)),
        "c2_w": u(ks[9], (NCONN, CONN, CONN)),
        "c2_b": u(ks[10], (NCONN, CONN)),
        "oc_wconn": u(ks[11], (NCONN, CONN, OUT)),       # out_combine, conn part
        "oc_wcore": u(ks[12], (CORE, OUT)),              # out_combine, core part
        "oc_b": u(ks[13], (1, OUT)),
    }


if __name__ == "__main__":
    key = jax.random.PRNGKey(0)
    kx, kp = jax.random.split(key)
    B = 256                                             # batch of independent cells
    x = jax.random.normal(kx, (NCONN, B, CONN), jnp.float32)
    params = make_params(kp)

    # Pack parameter slabs ONCE (outside the jitted per-call path).
    wpro, wmain, bias = pack_params(params)
    wpro, wmain, bias = jax.block_until_ready((wpro, wmain, bias))

    yconns, core_new, y_out = jax.block_until_ready(
        outcell_forward(x, wpro, wmain, bias))
    ref_yconns, ref_core, ref_yout = ref_forward(x, params)

    np.testing.assert_allclose(np.asarray(yconns), np.asarray(ref_yconns),
                               rtol=1e-5, atol=1e-5)
    np.testing.assert_allclose(np.asarray(core_new), np.asarray(ref_core),
                               rtol=1e-5, atol=1e-5)
    np.testing.assert_allclose(np.asarray(y_out), np.asarray(ref_yout),
                               rtol=1e-5, atol=1e-5)
    print("KERNEL_OK")
</pallas_src>

<mosaic_0001>
module attributes {stable_mosaic.version = 11 : i64} {
  func.func @outcell_kernel(%arg0: i32, %arg1: memref<4x128x32xf32, #tpu.memory_space<vmem>>, %arg2: memref<32x64xf32, #tpu.memory_space<vmem>>, %arg3: memref<14x32x32xf32, #tpu.memory_space<vmem>>, %arg4: memref<13x32xf32, #tpu.memory_space<vmem>>, %arg5: memref<128x128xf32, #tpu.memory_space<vmem>>, %arg6: memref<128x128xf32, #tpu.memory_space<vmem>>) attributes {dimension_semantics = [#tpu.dimension_semantics<parallel>], iteration_bounds = array<i64: 2>, scalar_prefetch = 0 : i64, scratch_operands = 0 : i64, tpu.core_type = #tpu.core_type<tc>, window_params = [{transform_indices = @transform_0, window_bounds = array<i64: 4, 128, 32>}, {pipeline_mode = #tpu.pipeline_mode<synchronous>, transform_indices = @transform_1, window_bounds = array<i64: 32, 64>}, {pipeline_mode = #tpu.pipeline_mode<synchronous>, transform_indices = @transform_2, window_bounds = array<i64: 14, 32, 32>}, {pipeline_mode = #tpu.pipeline_mode<synchronous>, transform_indices = @transform_3, window_bounds = array<i64: 13, 32>}, {transform_indices = @transform_4, window_bounds = array<i64: 128, 128>}, {transform_indices = @transform_5, window_bounds = array<i64: 128, 128>}]} {
    %c0 = arith.constant 0 : index
    %c0_0 = arith.constant 0 : index
    %c0_1 = arith.constant 0 : index
    %0 = vector.load %arg1[%c0, %c0_0, %c0_1] : memref<4x128x32xf32, #tpu.memory_space<vmem>>, vector<4x128x32xf32>
    %1 = vector.shape_cast %0 : vector<4x128x32xf32> to vector<512x32xf32>
    %c0_2 = arith.constant 0 : index
    %c0_3 = arith.constant 0 : index
    %2 = vector.load %arg2[%c0_2, %c0_3] : memref<32x64xf32, #tpu.memory_space<vmem>>, vector<32x64xf32>
    %cst = arith.constant dense<0.000000e+00> : vector<512x64xf32>
    %3 = tpu.matmul %1, %2, %cst {dimension_numbers = #tpu.dot_dimension_numbers<[1], [0], [0], [1], [0, 0, 1, 1], [], []>} : vector<512x32xf32>, vector<32x64xf32>, vector<512x64xf32> -> vector<512x64xf32>
    %4 = vector.extract_strided_slice %3 {offsets = [0, 0], sizes = [512, 32], strides = [1, 1]} : vector<512x64xf32> to vector<512x32xf32>
    %c1 = arith.constant 1 : index
    %c0_4 = arith.constant 0 : index
    %5 = vector.load %arg4[%c1, %c0_4] : memref<13x32xf32, #tpu.memory_space<vmem>>, vector<1x32xf32>
    %6 = vector.broadcast %5 : vector<1x32xf32> to vector<512x32xf32>
    %7 = arith.addf %4, %6 : vector<512x32xf32>
    %8 = math.tanh %7 : vector<512x32xf32>
    %9 = vector.extract_strided_slice %3 {offsets = [0, 32], sizes = [512, 32], strides = [1, 1]} : vector<512x64xf32> to vector<512x32xf32>
    %c0_5 = arith.constant 0 : index
    %c0_6 = arith.constant 0 : index
    %10 = vector.load %arg4[%c0_5, %c0_6] : memref<13x32xf32, #tpu.memory_space<vmem>>, vector<1x32xf32>
    %11 = vector.extract_strided_slice %8 {offsets = [0, 0], sizes = [128, 32], strides = [1, 1]} : vector<512x32xf32> to vector<128x32xf32>
    %12 = vector.extract_strided_slice %8 {offsets = [128, 0], sizes = [128, 32], strides = [1, 1]} : vector<512x32xf32> to vector<128x32xf32>
    %13 = vector.extract_strided_slice %8 {offsets = [256, 0], sizes = [128, 32], strides = [1, 1]} : vector<512x32xf32> to vector<128x32xf32>
    %14 = vector.extract_strided_slice %8 {offsets = [384, 0], sizes = [128, 32], strides = [1, 1]} : vector<512x32xf32> to vector<128x32xf32>
    %15 = arith.mulf %11, %12 : vector<128x32xf32>
    %16 = arith.mulf %13, %14 : vector<128x32xf32>
    %17 = arith.mulf %15, %16 : vector<128x32xf32>
    %18 = vector.broadcast %10 : vector<1x32xf32> to vector<128x32xf32>
    %19 = arith.mulf %17, %18 : vector<128x32xf32>
    %c0_7 = arith.constant 0 : index
    %c0_8 = arith.constant 0 : index
    %c0_9 = arith.constant 0 : index
    %20 = vector.load %arg3[%c0_7, %c0_8, %c0_9] : memref<14x32x32xf32, #tpu.memory_space<vmem>>, vector<1x32x32xf32>
    %21 = vector.shape_cast %20 : vector<1x32x32xf32> to vector<32x32xf32>
    %cst_10 = arith.constant dense<0.000000e+00> : vector<128x32xf32>
    %22 = tpu.matmul %19, %21, %cst_10 {dimension_numbers = #tpu.dot_dimension_numbers<[1], [0], [0], [1], [0, 0, 1, 1], [], []>} : vector<128x32xf32>, vector<32x32xf32>, vector<128x32xf32> -> vector<128x32xf32>
    %c2 = arith.constant 2 : index
    %c0_11 = arith.constant 0 : index
    %23 = vector.load %arg4[%c2, %c0_11] : memref<13x32xf32, #tpu.memory_space<vmem>>, vector<1x32xf32>
    %24 = vector.broadcast %23 : vector<1x32xf32> to vector<128x32xf32>
    %25 = arith.addf %22, %24 : vector<128x32xf32>
    %cst_12 = arith.constant 0.000000e+00 : f32
    %26 = vector.broadcast %cst_12 : f32 to vector<128x32xf32>
    %27 = arith.maximumf %25, %26 : vector<128x32xf32>
    %c12 = arith.constant 12 : index
    %c0_13 = arith.constant 0 : index
    %28 = vector.load %arg4[%c12, %c0_13] : memref<13x32xf32, #tpu.memory_space<vmem>>, vector<1x32xf32>
    %c1_14 = arith.constant 1 : index
    %c0_15 = arith.constant 0 : index
    %c0_16 = arith.constant 0 : index
    %29 = vector.load %arg3[%c1_14, %c0_15, %c0_16] : memref<14x32x32xf32, #tpu.memory_space<vmem>>, vector<1x32x32xf32>
    %30 = vector.shape_cast %29 : vector<1x32x32xf32> to vector<32x32xf32>
    %cst_17 = arith.constant dense<0.000000e+00> : vector<128x32xf32>
    %31 = tpu.matmul %27, %30, %cst_17 {dimension_numbers = #tpu.dot_dimension_numbers<[1], [0], [0], [1], [0, 0, 1, 1], [], []>} : vector<128x32xf32>, vector<32x32xf32>, vector<128x32xf32> -> vector<128x32xf32>
    %32 = vector.extract_strided_slice %9 {offsets = [0, 0], sizes = [128, 32], strides = [1, 1]} : vector<512x32xf32> to vector<128x32xf32>
    %33 = arith.addf %31, %32 : vector<128x32xf32>
    %c3 = arith.constant 3 : index
    %c0_18 = arith.constant 0 : index
    %34 = vector.load %arg4[%c3, %c0_18] : memref<13x32xf32, #tpu.memory_space<vmem>>, vector<1x32xf32>
    %35 = vector.broadcast %34 : vector<1x32xf32> to vector<128x32xf32>
    %36 = arith.addf %33, %35 : vector<128x32xf32>
    %cst_19 = arith.constant 0.000000e+00 : f32
    %37 = vector.broadcast %cst_19 : f32 to vector<128x32xf32>
    %38 = arith.maximumf %36, %37 : vector<128x32xf32>
    %c2_20 = arith.constant 2 : index
    %c0_21 = arith.constant 0 : index
    %c0_22 = arith.constant 0 : index
    %39 = vector.load %arg3[%c2_20, %c0_21, %c0_22] : memref<14x32x32xf32, #tpu.memory_space<vmem>>, vector<1x32x32xf32>
    %40 = vector.shape_cast %39 : vector<1x32x32xf32> to vector<32x32xf32>
    %cst_23 = arith.constant dense<0.000000e+00> : vector<128x32xf32>
    %41 = tpu.matmul %38, %40, %cst_23 {dimension_numbers = #tpu.dot_dimension_numbers<[1], [0], [0], [1], [0, 0, 1, 1], [], []>} : vector<128x32xf32>, vector<32x32xf32>, vector<128x32xf32> -> vector<128x32xf32>
    %c4 = arith.constant 4 : index
    %c0_24 = arith.constant 0 : index
    %42 = vector.load %arg4[%c4, %c0_24] : memref<13x32xf32, #tpu.memory_space<vmem>>, vector<1x32xf32>
    %43 = vector.broadcast %42 : vector<1x32xf32> to vector<128x32xf32>
    %44 = arith.addf %41, %43 : vector<128x32xf32>
    %cst_25 = arith.constant 0.000000e+00 : f32
    %45 = vector.broadcast %cst_25 : f32 to vector<128x32xf32>
    %46 = arith.maximumf %44, %45 : vector<128x32xf32>
    %c6 = arith.constant 6 : index
    %c0_26 = arith.constant 0 : index
    %c0_27 = arith.constant 0 : index
    %47 = vector.load %arg3[%c6, %c0_26, %c0_27] : memref<14x32x32xf32, #tpu.memory_space<vmem>>, vector<1x32x32xf32>
    %48 = vector.shape_cast %47 : vector<1x32x32xf32> to vector<32x32xf32>
    %cst_28 = arith.constant dense<0.000000e+00> : vector<128x32xf32>
    %49 = tpu.matmul %46, %48, %cst_28 {dimension_numbers = #tpu.dot_dimension_numbers<[1], [0], [0], [1], [0, 0, 1, 1], [], []>} : vector<128x32xf32>, vector<32x32xf32>, vector<128x32xf32> -> vector<128x32xf32>
    %c8 = arith.constant 8 : index
    %c0_29 = arith.constant 0 : index
    %50 = vector.load %arg4[%c8, %c0_29] : memref<13x32xf32, #tpu.memory_space<vmem>>, vector<1x32xf32>
    %51 = vector.broadcast %50 : vector<1x32xf32> to vector<128x32xf32>
    %52 = arith.addf %49, %51 : vector<128x32xf32>
    %cst_30 = arith.constant 0.000000e+00 : f32
    %53 = vector.broadcast %cst_30 : f32 to vector<128x32xf32>
    %54 = arith.maximumf %52, %53 : vector<128x32xf32>
    %c10 = arith.constant 10 : index
    %c0_31 = arith.constant 0 : index
    %c0_32 = arith.constant 0 : index
    %55 = vector.load %arg3[%c10, %c0_31, %c0_32] : memref<14x32x32xf32, #tpu.memory_space<vmem>>, vector<1x32x32xf32>
    %56 = vector.shape_cast %55 : vector<1x32x32xf32> to vector<32x32xf32>
    %cst_33 = arith.constant dense<0.000000e+00> : vector<128x32xf32>
    %57 = tpu.matmul %54, %56, %cst_33 {dimension_numbers = #tpu.dot_dimension_numbers<[1], [0], [0], [1], [0, 0, 1, 1], [], []>} : vector<128x32xf32>, vector<32x32xf32>, vector<128x32xf32> -> vector<128x32xf32>
    %58 = vector.broadcast %28 : vector<1x32xf32> to vector<128x32xf32>
    %59 = arith.addf %58, %57 : vector<128x32xf32>
    %c1_34 = arith.constant 1 : index
    %c0_35 = arith.constant 0 : index
    %c0_36 = arith.constant 0 : index
    %60 = vector.load %arg3[%c1_34, %c0_35, %c0_36] : memref<14x32x32xf32, #tpu.memory_space<vmem>>, vector<1x32x32xf32>
    %61 = vector.shape_cast %60 : vector<1x32x32xf32> to vector<32x32xf32>
    %cst_37 = arith.constant dense<0.000000e+00> : vector<128x32xf32>
    %62 = tpu.matmul %54, %61, %cst_37 {dimension_numbers = #tpu.dot_dimension_numbers<[1], [0], [0], [1], [0, 0, 1, 1], [], []>} : vector<128x32xf32>, vector<32x32xf32>, vector<128x32xf32> -> vector<128x32xf32>
    %63 = vector.extract_strided_slice %9 {offsets = [128, 0], sizes = [128, 32], strides = [1, 1]} : vector<512x32xf32> to vector<128x32xf32>
    %64 = arith.addf %62, %63 : vector<128x32xf32>
    %c3_38 = arith.constant 3 : index
    %c0_39 = arith.constant 0 : index
    %65 = vector.load %arg4[%c3_38, %c0_39] : memref<13x32xf32, #tpu.memory_space<vmem>>, vector<1x32xf32>
    %66 = vector.broadcast %65 : vector<1x32xf32> to vector<128x32xf32>
    %67 = arith.addf %64, %66 : vector<128x32xf32>
    %cst_40 = arith.constant 0.000000e+00 : f32
    %68 = vector.broadcast %cst_40 : f32 to vector<128x32xf32>
    %69 = arith.maximumf %67, %68 : vector<128x32xf32>
    %c3_41 = arith.constant 3 : index
    %c0_42 = arith.constant 0 : index
    %c0_43 = arith.constant 0 : index
    %70 = vector.load %arg3[%c3_41, %c0_42, %c0_43] : memref<14x32x32xf32, #tpu.memory_space<vmem>>, vector<1x32x32xf32>
    %71 = vector.shape_cast %70 : vector<1x32x32xf32> to vector<32x32xf32>
    %cst_44 = arith.constant dense<0.000000e+00> : vector<128x32xf32>
    %72 = tpu.matmul %69, %71, %cst_44 {dimension_numbers = #tpu.dot_dimension_numbers<[1], [0], [0], [1], [0, 0, 1, 1], [], []>} : vector<128x32xf32>, vector<32x32xf32>, vector<128x32xf32> -> vector<128x32xf32>
    %c5 = arith.constant 5 : index
    %c0_45 = arith.constant 0 : index
    %73 = vector.load %arg4[%c5, %c0_45] : memref<13x32xf32, #tpu.memory_space<vmem>>, vector<1x32xf32>
    %74 = vector.broadcast %73 : vector<1x32xf32> to vector<128x32xf32>
    %75 = arith.addf %72, %74 : vector<128x32xf32>
    %cst_46 = arith.constant 0.000000e+00 : f32
    %76 = vector.broadcast %cst_46 : f32 to vector<128x32xf32>
    %77 = arith.maximumf %75, %76 : vector<128x32xf32>
    %c7 = arith.constant 7 : index
    %c0_47 = arith.constant 0 : index
    %c0_48 = arith.constant 0 : index
    %78 = vector.load %arg3[%c7, %c0_47, %c0_48] : memref<14x32x32xf32, #tpu.memory_space<vmem>>, vector<1x32x32xf32>
    %79 = vector.shape_cast %78 : vector<1x32x32xf32> to vector<32x32xf32>
    %cst_49 = arith.constant dense<0.000000e+00> : vector<128x32xf32>
    %80 = tpu.matmul %77, %79, %cst_49 {dimension_numbers = #tpu.dot_dimension_numbers<[1], [0], [0], [1], [0, 0, 1, 1], [], []>} : vector<128x32xf32>, vector<32x32xf32>, vector<128x32xf32> -> vector<128x32xf32>
    %c9 = arith.constant 9 : index
    %c0_50 = arith.constant 0 : index
    %81 = vector.load %arg4[%c9, %c0_50] : memref<13x32xf32, #tpu.memory_space<vmem>>, vector<1x32xf32>
    %82 = vector.broadcast %81 : vector<1x32xf32> to vector<128x32xf32>
    %83 = arith.addf %80, %82 : vector<128x32xf32>
    %cst_51 = arith.constant 0.000000e+00 : f32
    %84 = vector.broadcast %cst_51 : f32 to vector<128x32xf32>
    %85 = arith.maximumf %83, %84 : vector<128x32xf32>
    %c11 = arith.constant 11 : index
    %c0_52 = arith.constant 0 : index
    %c0_53 = arith.constant 0 : index
    %86 = vector.load %arg3[%c11, %c0_52, %c0_53] : memref<14x32x32xf32, #tpu.memory_space<vmem>>, vector<1x32x32xf32>
    %87 = vector.shape_cast %86 : vector<1x32x32xf32> to vector<32x32xf32>
    %cst_54 = arith.constant dense<0.000000e+00> : vector<128x32xf32>
    %88 = tpu.matmul %85, %87, %cst_54 {dimension_numbers = #tpu.dot_dimension_numbers<[1], [0], [0], [1], [0, 0, 1, 1], [], []>} : vector<128x32xf32>, vector<32x32xf32>, vector<128x32xf32> -> vector<128x32xf32>
    %89 = arith.addf %59, %88 : vector<128x32xf32>
    %c1_55 = arith.constant 1 : index
    %c0_56 = arith.constant 0 : index
    %c0_57 = arith.constant 0 : index
    %90 = vector.load %arg3[%c1_55, %c0_56, %c0_57] : memref<14x32x32xf32, #tpu.memory_space<vmem>>, vector<1x32x32xf32>
    %91 = vector.shape_cast %90 : vector<1x32x32xf32> to vector<32x32xf32>
    %cst_58 = arith.constant dense<0.000000e+00> : vector<128x32xf32>
    %92 = tpu.matmul %85, %91, %cst_58 {dimension_numbers = #tpu.dot_dimension_numbers<[1], [0], [0], [1], [0, 0, 1, 1], [], []>} : vector<128x32xf32>, vector<32x32xf32>, vector<128x32xf32> -> vector<128x32xf32>
    %93 = vector.extract_strided_slice %9 {offsets = [256, 0], sizes = [128, 32], strides = [1, 1]} : vector<512x32xf32> to vector<128x32xf32>
    %94 = arith.addf %92, %93 : vector<128x32xf32>
    %c3_59 = arith.constant 3 : index
    %c0_60 = arith.constant 0 : index
    %95 = vector.load %arg4[%c3_59, %c0_60] : memref<13x32xf32, #tpu.memory_space<vmem>>, vector<1x32xf32>
    %96 = vector.broadcast %95 : vector<1x32xf32> to vector<128x32xf32>
    %97 = arith.addf %94, %96 : vector<128x32xf32>
    %cst_61 = arith.constant 0.000000e+00 : f32
    %98 = vector.broadcast %cst_61 : f32 to vector<128x32xf32>
    %99 = arith.maximumf %97, %98 : vector<128x32xf32>
    %c4_62 = arith.constant 4 : index
    %c0_63 = arith.constant 0 : index
    %c0_64 = arith.constant 0 : index
    %100 = vector.load %arg3[%c4_62, %c0_63, %c0_64] : memref<14x32x32xf32, #tpu.memory_space<vmem>>, vector<1x32x32xf32>
    %101 = vector.shape_cast %100 : vector<1x32x32xf32> to vector<32x32xf32>
    %cst_65 = arith.constant dense<0.000000e+00> : vector<128x32xf32>
    %102 = tpu.matmul %99, %101, %cst_65 {dimension_numbers = #tpu.dot_dimension_numbers<[1], [0], [0], [1], [0, 0, 1, 1], [], []>} : vector<128x32xf32>, vector<32x32xf32>, vector<128x32xf32> -> vector<128x32xf32>
    %c6_66 = arith.constant 6 : index
    %c0_67 = arith.constant 0 : index
    %103 = vector.load %arg4[%c6_66, %c0_67] : memref<13x32xf32, #tpu.memory_space<vmem>>, vector<1x32xf32>
    %104 = vector.broadcast %103 : vector<1x32xf32> to vector<128x32xf32>
    %105 = arith.addf %102, %104 : vector<128x32xf32>
    %cst_68 = arith.constant 0.000000e+00 : f32
    %106 = vector.broadcast %cst_68 : f32 to vector<128x32xf32>
    %107 = arith.maximumf %105, %106 : vector<128x32xf32>
    %c8_69 = arith.constant 8 : index
    %c0_70 = arith.constant 0 : index
    %c0_71 = arith.constant 0 : index
    %108 = vector.load %arg3[%c8_69, %c0_70, %c0_71] : memref<14x32x32xf32, #tpu.memory_space<vmem>>, vector<1x32x32xf32>
    %109 = vector.shape_cast %108 : vector<1x32x32xf32> to vector<32x32xf32>
    %cst_72 = arith.constant dense<0.000000e+00> : vector<128x32xf32>
    %110 = tpu.matmul %107, %109, %cst_72 {dimension_numbers = #tpu.dot_dimension_numbers<[1], [0], [0], [1], [0, 0, 1, 1], [], []>} : vector<128x32xf32>, vector<32x32xf32>, vector<128x32xf32> -> vector<128x32xf32>
    %c10_73 = arith.constant 10 : index
    %c0_74 = arith.constant 0 : index
    %111 = vector.load %arg4[%c10_73, %c0_74] : memref<13x32xf32, #tpu.memory_space<vmem>>, vector<1x32xf32>
    %112 = vector.broadcast %111 : vector<1x32xf32> to vector<128x32xf32>
    %113 = arith.addf %110, %112 : vector<128x32xf32>
    %cst_75 = arith.constant 0.000000e+00 : f32
    %114 = vector.broadcast %cst_75 : f32 to vector<128x32xf32>
    %115 = arith.maximumf %113, %114 : vector<128x32xf32>
    %c12_76 = arith.constant 12 : index
    %c0_77 = arith.constant 0 : index
    %c0_78 = arith.constant 0 : index
    %116 = vector.load %arg3[%c12_76, %c0_77, %c0_78] : memref<14x32x32xf32, #tpu.memory_space<vmem>>, vector<1x32x32xf32>
    %117 = vector.shape_cast %116 : vector<1x32x32xf32> to vector<32x32xf32>
    %cst_79 = arith.constant dense<0.000000e+00> : vector<128x32xf32>
    %118 = tpu.matmul %115, %117, %cst_79 {dimension_numbers = #tpu.dot_dimension_numbers<[1], [0], [0], [1], [0, 0, 1, 1], [], []>} : vector<128x32xf32>, vector<32x32xf32>, vector<128x32xf32> -> vector<128x32xf32>
    %119 = arith.addf %89, %118 : vector<128x32xf32>
    %c1_80 = arith.constant 1 : index
    %c0_81 = arith.constant 0 : index
    %c0_82 = arith.constant 0 : index
    %120 = vector.load %arg3[%c1_80, %c0_81, %c0_82] : memref<14x32x32xf32, #tpu.memory_space<vmem>>, vector<1x32x32xf32>
    %121 = vector.shape_cast %120 : vector<1x32x32xf32> to vector<32x32xf32>
    %cst_83 = arith.constant dense<0.000000e+00> : vector<128x32xf32>
    %122 = tpu.matmul %115, %121, %cst_83 {dimension_numbers = #tpu.dot_dimension_numbers<[1], [0], [0], [1], [0, 0, 1, 1], [], []>} : vector<128x32xf32>, vector<32x32xf32>, vector<128x32xf32> -> vector<128x32xf32>
    %123 = vector.extract_strided_slice %9 {offsets = [384, 0], sizes = [128, 32], strides = [1, 1]} : vector<512x32xf32> to vector<128x32xf32>
    %124 = arith.addf %122, %123 : vector<128x32xf32>
    %c3_84 = arith.constant 3 : index
    %c0_85 = arith.constant 0 : index
    %125 = vector.load %arg4[%c3_84, %c0_85] : memref<13x32xf32, #tpu.memory_space<vmem>>, vector<1x32xf32>
    %126 = vector.broadcast %125 : vector<1x32xf32> to vector<128x32xf32>
    %127 = arith.addf %124, %126 : vector<128x32xf32>
    %cst_86 = arith.constant 0.000000e+00 : f32
    %128 = vector.broadcast %cst_86 : f32 to vector<128x32xf32>
    %129 = arith.maximumf %127, %128 : vector<128x32xf32>
    %c5_87 = arith.constant 5 : index
    %c0_88 = arith.constant 0 : index
    %c0_89 = arith.constant 0 : index
    %130 = vector.load %arg3[%c5_87, %c0_88, %c0_89] : memref<14x32x32xf32, #tpu.memory_space<vmem>>, vector<1x32x32xf32>
    %131 = vector.shape_cast %130 : vector<1x32x32xf32> to vector<32x32xf32>
    %cst_90 = arith.constant dense<0.000000e+00> : vector<128x32xf32>
    %132 = tpu.matmul %129, %131, %cst_90 {dimension_numbers = #tpu.dot_dimension_numbers<[1], [0], [0], [1], [0, 0, 1, 1], [], []>} : vector<128x32xf32>, vector<32x32xf32>, vector<128x32xf32> -> vector<128x32xf32>
    %c7_91 = arith.constant 7 : index
    %c0_92 = arith.constant 0 : index
    %133 = vector.load %arg4[%c7_91, %c0_92] : memref<13x32xf32, #tpu.memory_space<vmem>>, vector<1x32xf32>
    %134 = vector.broadcast %133 : vector<1x32xf32> to vector<128x32xf32>
    %135 = arith.addf %132, %134 : vector<128x32xf32>
    %cst_93 = arith.constant 0.000000e+00 : f32
    %136 = vector.broadcast %cst_93 : f32 to vector<128x32xf32>
    %137 = arith.maximumf %135, %136 : vector<128x32xf32>
    %c9_94 = arith.constant 9 : index
    %c0_95 = arith.constant 0 : index
    %c0_96 = arith.constant 0 : index
    %138 = vector.load %arg3[%c9_94, %c0_95, %c0_96] : memref<14x32x32xf32, #tpu.memory_space<vmem>>, vector<1x32x32xf32>
    %139 = vector.shape_cast %138 : vector<1x32x32xf32> to vector<32x32xf32>
    %cst_97 = arith.constant dense<0.000000e+00> : vector<128x32xf32>
    %140 = tpu.matmul %137, %139, %cst_97 {dimension_numbers = #tpu.dot_dimension_numbers<[1], [0], [0], [1], [0, 0, 1, 1], [], []>} : vector<128x32xf32>, vector<32x32xf32>, vector<128x32xf32> -> vector<128x32xf32>
    %c11_98 = arith.constant 11 : index
    %c0_99 = arith.constant 0 : index
    %141 = vector.load %arg4[%c11_98, %c0_99] : memref<13x32xf32, #tpu.memory_space<vmem>>, vector<1x32xf32>
    %142 = vector.broadcast %141 : vector<1x32xf32> to vector<128x32xf32>
    %143 = arith.addf %140, %142 : vector<128x32xf32>
    %cst_100 = arith.constant 0.000000e+00 : f32
    %144 = vector.broadcast %cst_100 : f32 to vector<128x32xf32>
    %145 = arith.maximumf %143, %144 : vector<128x32xf32>
    %c13 = arith.constant 13 : index
    %c0_101 = arith.constant 0 : index
    %c0_102 = arith.constant 0 : index
    %146 = vector.load %arg3[%c13, %c0_101, %c0_102] : memref<14x32x32xf32, #tpu.memory_space<vmem>>, vector<1x32x32xf32>
    %147 = vector.shape_cast %146 : vector<1x32x32xf32> to vector<32x32xf32>
    %cst_103 = arith.constant dense<0.000000e+00> : vector<128x32xf32>
    %148 = tpu.matmul %145, %147, %cst_103 {dimension_numbers = #tpu.dot_dimension_numbers<[1], [0], [0], [1], [0, 0, 1, 1], [], []>} : vector<128x32xf32>, vector<32x32xf32>, vector<128x32xf32> -> vector<128x32xf32>
    %149 = arith.addf %119, %148 : vector<128x32xf32>
    %150 = tpu.concatenate %54, %85, %115, %145 in 1 : vector<128x32xf32>, vector<128x32xf32>, vector<128x32xf32>, vector<128x32xf32> -> vector<128x128xf32>
    %c0_104 = arith.constant 0 : index
    %c0_105 = arith.constant 0 : index
    %151 = vector.load %arg5[%c0_104, %c0_105] : memref<128x128xf32, #tpu.memory_space<vmem>>, vector<128x128xf32>
    tpu.vector_store %arg5[%c0_104, %c0_105], %150 {strides = array<i32>} : memref<128x128xf32, #tpu.memory_space<vmem>>, vector<128x128xf32>,
    %cst_106 = arith.constant 0.000000e+00 : f32
    %152 = vector.broadcast %cst_106 : f32 to vector<128x64xf32>
    %153 = tpu.concatenate %19, %149, %152 in 1 : vector<128x32xf32>, vector<128x32xf32>, vector<128x64xf32> -> vector<128x128xf32>
    %c0_107 = arith.constant 0 : index
    %c0_108 = arith.constant 0 : index
    %154 = vector.load %arg6[%c0_107, %c0_108] : memref<128x128xf32, #tpu.memory_space<vmem>>, vector<128x128xf32>
    tpu.vector_store %arg6[%c0_107, %c0_108], %153 {strides = array<i32>} : memref<128x128xf32, #tpu.memory_space<vmem>>, vector<128x128xf32>,
    return
  }
  func.func @transform_0(%arg0: i32) -> (i32, i32, i32) {
    %c0_i32 = arith.constant 0 : i32
    %c0_i32_0 = arith.constant 0 : i32
    %c0_i32_1 = arith.constant 0 : i32
    return %c0_i32, %arg0, %c0_i32_0 : i32, i32, i32
  }
  func.func @transform_1(%arg0: i32) -> (i32, i32) {
    %c0_i32 = arith.constant 0 : i32
    %c0_i32_0 = arith.constant 0 : i32
    %c0_i32_1 = arith.constant 0 : i32
    return %c0_i32, %c0_i32_0 : i32, i32
  }
  func.func @transform_2(%arg0: i32) -> (i32, i32, i32) {
    %c0_i32 = arith.constant 0 : i32
    %c0_i32_0 = arith.constant 0 : i32
    %c0_i32_1 = arith.constant 0 : i32
    %c0_i32_2 = arith.constant 0 : i32
    return %c0_i32, %c0_i32_0, %c0_i32_1 : i32, i32, i32
  }
  func.func @transform_3(%arg0: i32) -> (i32, i32) {
    %c0_i32 = arith.constant 0 : i32
    %c0_i32_0 = arith.constant 0 : i32
    %c0_i32_1 = arith.constant 0 : i32
    return %c0_i32, %c0_i32_0 : i32, i32
  }
  func.func @transform_4(%arg0: i32) -> (i32, i32) {
    %c0_i32 = arith.constant 0 : i32
    %c0_i32_0 = arith.constant 0 : i32
    return %arg0, %c0_i32 : i32, i32
  }
  func.func @transform_5(%arg0: i32) -> (i32, i32) {
    %c0_i32 = arith.constant 0 : i32
    %c0_i32_0 = arith.constant 0 : i32
    return %arg0, %c0_i32 : i32, i32
  }
}

</mosaic_0001>

<bundles_post_ra>
// kernel: outcell_forward.1
= control target key start
LH: loop header
LB: loop body
LE: loop exit
PB: predicated region body
PF: predicated region fallthrough
CT: control target
= control target key end

     0   :  { %s7545_s18 = smov 0   ;;  %s7547_s19 = smov 0   ;;  %s9243_s0 = inlined_call_operand.vmem [shape: f32[4,256,32], index: 0, kind: input, shape index: {}]   ;;  %s9244_s1 = inlined_call_operand.vmem [shape: f32[32,64], index: 1, kind: input, shape index: {}]   ;;  %s9245_s2 = inlined_call_operand.vmem [shape: f32[14,32,32], index: 2, kind: input, shape index: {}]   ;;  %s9246_s3 = inlined_call_operand.vmem [shape: f32[13,32], index: 3, kind: input, shape index: {}]   ;;  %s9247_s4 = inlined_call_operand.vmem [shape: f32[256,128], index: 4, kind: output, shape index: {0}]   ;;  %s9248_s5 = inlined_call_operand.vmem [shape: f32[256,128], index: 5, kind: output, shape index: {1}]  }
   0x1   :  { %s7549_s20 = smov 0  }
   0x2 LB: > { %s5647_s21 = sadd.s32 4294967295, %s7510_s20   ;;  %s7562_s22 = sadd.s32 1, %s7510_s20   ;;  %s7510_s20 = sphi %s7549_s20, %s9278_s20   ;;  %s7506_s19 = sphi %s7547_s19, %s9277_s19   ;;  %s7502_s18 = sphi %s7545_s18, %s9276_s18  }
   0x3   : > { %s20_s23 = ssub.s32 %s7510_s20, %s7562_s22  ;;  %s23_s24 = sadd.s32 1, %s7506_s19 }
   0x4   : > { %p21_p0 = scmp.eq.s32.totalorder %s20_s23, 0  ;;  %p30_p1 = scmp.ne.s32.totalorder %s7506_s19, %s7502_s18 }
   0x5   : > { %p31_p2 = scmp.eq.s32.totalorder %s7510_s20, 0  ;;  %p5650_p4 = scmp.ge.s32.totalorder %s7510_s20, 2 }
   0x6   : > { %s7571_s25 = scalar_select %p21_p0, %s7506_s19, %s23_s24  }
   0x7   : > { %p32_p3 = por %p31_p2, %p30_p1  ;;  %180 = sbr.rel (%p5650_p4) target bundleno = 50 (0x32), region = 28 }
   0xe   : > { %183 = sbr.rel (!%p32_p3) target bundleno = 50 (0x32), region = 32  ;;  %s185_s26 = sand.u32 (%p32_p3), 1, %s7506_s19  }
   0xf   : > { %s6063_s27 = sshll.u32 (%p32_p3), %s7510_s20, 7  ;;  %s5651_s28 = sshll.u32 (%p32_p3), %s185_s26, 9 }
  0x10   : > { %s7579_s6 = scalar_lea.vmem (%p32_p3), %s9243_s0, %s6063_s27  ;;  %s7584_s7 = scalar_lea.vmem (%p32_p3), [#allocation2], %s5651_s28 }
  0x11   : > { %v344_v0 = vld [vmem:[%s7579_s6] sm:$0xff] (%p32_p3)  ;;  %v346_v1 = vld [vmem:[%s7579_s6 + $0x8] sm:$0xff] (%p32_p3)  ;;  %v348_v2 = vld [vmem:[%s7579_s6 + $0x10] sm:$0xff] (%p32_p3) }
  0x12   : > { %345 = vst [vmem:[%s7584_s7] sm:$0xff] (%p32_p3), %v344_v0  ;;  %347 = vst [vmem:[%s7584_s7 + $0x8] sm:$0xff] (%p32_p3), %v346_v1  ;;  %v350_v3 = vld [vmem:[%s7579_s6 + $0x18] sm:$0xff] (%p32_p3)  ;;  %v352_v4 = vld [vmem:[%s7579_s6 + $0x20] sm:$0xff] (%p32_p3) }
  0x13   : > { %349 = vst [vmem:[%s7584_s7 + $0x10] sm:$0xff] (%p32_p3), %v348_v2  ;;  %v354_v5 = vld [vmem:[%s7579_s6 + $0x28] sm:$0xff] (%p32_p3)  ;;  %351 = vst [vmem:[%s7584_s7 + $0x18] sm:$0xff] (%p32_p3), %v350_v3  ;;  %v356_v6 = vld [vmem:[%s7579_s6 + $0x30] sm:$0xff] (%p32_p3) }
  0x14   : > { %353 = vst [vmem:[%s7584_s7 + $0x20] sm:$0xff] (%p32_p3), %v352_v4  ;;  %355 = vst [vmem:[%s7584_s7 + $0x28] sm:$0xff] (%p32_p3), %v354_v5  ;;  %v358_v7 = vld [vmem:[%s7579_s6 + $0x38] sm:$0xff] (%p32_p3)  ;;  %v360_v8 = vld [vmem:[%s7579_s6 + $0x40] sm:$0xff] (%p32_p3) }
  0x15   : > { %357 = vst [vmem:[%s7584_s7 + $0x30] sm:$0xff] %v356_v6  ;;  %359 = vst [vmem:[%s7584_s7 + $0x38] sm:$0xff] %v358_v7  ;;  %v362_v9 = vld [vmem:[%s7579_s6 + $0x48] sm:$0xff]  ;;  %v364_v10 = vld [vmem:[%s7579_s6 + $0x50] sm:$0xff] }
  0x16   : > { %361 = vst [vmem:[%s7584_s7 + $0x40] sm:$0xff] %v360_v8  ;;  %v366_v11 = vld [vmem:[%s7579_s6 + $0x58] sm:$0xff]  ;;  %363 = vst [vmem:[%s7584_s7 + $0x48] sm:$0xff] %v362_v9  ;;  %v368_v12 = vld [vmem:[%s7579_s6 + $0x60] sm:$0xff] }
  0x17   : > { %365 = vst [vmem:[%s7584_s7 + $0x50] sm:$0xff] %v364_v10  ;;  %367 = vst [vmem:[%s7584_s7 + $0x58] sm:$0xff] %v366_v11  ;;  %v370_v13 = vld [vmem:[%s7579_s6 + $0x68] sm:$0xff]  ;;  %v372_v14 = vld [vmem:[%s7579_s6 + $0x70] sm:$0xff] }
  0x18   : > { %369 = vst [vmem:[%s7584_s7 + $0x60] sm:$0xff] %v368_v12  ;;  %371 = vst [vmem:[%s7584_s7 + $0x68] sm:$0xff] %v370_v13  ;;  %v374_v15 = vld [vmem:[%s7579_s6 + $0x78] sm:$0xff]  ;;  %v376_v16 = vld [vmem:[%s7579_s6 + $0x100] sm:$0xff] }
  0x19   : > { %373 = vst [vmem:[%s7584_s7 + $0x70] sm:$0xff] %v372_v14  ;;  %v378_v17 = vld [vmem:[%s7579_s6 + $0x108] sm:$0xff]  ;;  %375 = vst [vmem:[%s7584_s7 + $0x78] sm:$0xff] %v374_v15  ;;  %v380_v18 = vld [vmem:[%s7579_s6 + $0x110] sm:$0xff] }
  0x1a   : > { %377 = vst [vmem:[%s7584_s7 + $0x80] sm:$0xff] %v376_v16  ;;  %379 = vst [vmem:[%s7584_s7 + $0x88] sm:$0xff] %v378_v17  ;;  %v382_v19 = vld [vmem:[%s7579_s6 + $0x118] sm:$0xff]  ;;  %v384_v20 = vld [vmem:[%s7579_s6 + $0x120] sm:$0xff] }
  0x1b   : > { %381 = vst [vmem:[%s7584_s7 + $0x90] sm:$0xff] %v380_v18  ;;  %383 = vst [vmem:[%s7584_s7 + $0x98] sm:$0xff] %v382_v19  ;;  %v386_v21 = vld [vmem:[%s7579_s6 + $0x128] sm:$0xff]  ;;  %v388_v22 = vld [vmem:[%s7579_s6 + $0x130] sm:$0xff] }
  0x1c   : > { %385 = vst [vmem:[%s7584_s7 + $0xa0] sm:$0xff] %v384_v20  ;;  %v390_v23 = vld [vmem:[%s7579_s6 + $0x138] sm:$0xff]  ;;  %387 = vst [vmem:[%s7584_s7 + $0xa8] sm:$0xff] %v386_v21  ;;  %v392_v24 = vld [vmem:[%s7579_s6 + $0x140] sm:$0xff] }
  0x1d   : > { %389 = vst [vmem:[%s7584_s7 + $0xb0] sm:$0xff] %v388_v22  ;;  %391 = vst [vmem:[%s7584_s7 + $0xb8] sm:$0xff] %v390_v23  ;;  %v394_v25 = vld [vmem:[%s7579_s6 + $0x148] sm:$0xff]  ;;  %v396_v26 = vld [vmem:[%s7579_s6 + $0x150] sm:$0xff] }
  0x1e   : > { %393 = vst [vmem:[%s7584_s7 + $0xc0] sm:$0xff] %v392_v24  ;;  %395 = vst [vmem:[%s7584_s7 + $0xc8] sm:$0xff] %v394_v25  ;;  %v398_v27 = vld [vmem:[%s7579_s6 + $0x158] sm:$0xff]  ;;  %v400_v28 = vld [vmem:[%s7579_s6 + $0x160] sm:$0xff] }
  0x1f   : > { %397 = vst [vmem:[%s7584_s7 + $0xd0] sm:$0xff] %v396_v26  ;;  %v402_v29 = vld [vmem:[%s7579_s6 + $0x168] sm:$0xff]  ;;  %399 = vst [vmem:[%s7584_s7 + $0xd8] sm:$0xff] %v398_v27  ;;  %v404_v30 = vld [vmem:[%s7579_s6 + $0x170] sm:$0xff] }
  0x20   : > { %401 = vst [vmem:[%s7584_s7 + $0xe0] sm:$0xff] %v400_v28  ;;  %403 = vst [vmem:[%s7584_s7 + $0xe8] sm:$0xff] %v402_v29  ;;  %v406_v31 = vld [vmem:[%s7579_s6 + $0x178] sm:$0xff]  ;;  %v408_v32 = vld [vmem:[%s7579_s6 + $0x200] sm:$0xff] }
  0x21   : > { %405 = vst [vmem:[%s7584_s7 + $0xf0] sm:$0xff] %v404_v30  ;;  %407 = vst [vmem:[%s7584_s7 + $0xf8] sm:$0xff] %v406_v31  ;;  %v410_v33 = vld [vmem:[%s7579_s6 + $0x208] sm:$0xff]  ;;  %v412_v34 = vld [vmem:[%s7579_s6 + $0x210] sm:$0xff] }
  0x22   : > { %409 = vst [vmem:[%s7584_s7 + $0x100] sm:$0xff] %v408_v32  ;;  %v414_v35 = vld [vmem:[%s7579_s6 + $0x218] sm:$0xff]  ;;  %411 = vst [vmem:[%s7584_s7 + $0x108] sm:$0xff] %v410_v33  ;;  %v416_v36 = vld [vmem:[%s7579_s6 + $0x220] sm:$0xff] }
  0x23   : > { %413 = vst [vmem:[%s7584_s7 + $0x110] sm:$0xff] %v412_v34  ;;  %415 = vst [vmem:[%s7584_s7 + $0x118] sm:$0xff] %v414_v35  ;;  %v418_v37 = vld [vmem:[%s7579_s6 + $0x228] sm:$0xff]  ;;  %v420_v38 = vld [vmem:[%s7579_s6 + $0x230] sm:$0xff] }
  0x24   : > { %417 = vst [vmem:[%s7584_s7 + $0x120] sm:$0xff] %v416_v36  ;;  %419 = vst [vmem:[%s7584_s7 + $0x128] sm:$0xff] %v418_v37  ;;  %v422_v39 = vld [vmem:[%s7579_s6 + $0x238] sm:$0xff]  ;;  %v424_v40 = vld [vmem:[%s7579_s6 + $0x240] sm:$0xff] }
  0x25   : > { %421 = vst [vmem:[%s7584_s7 + $0x130] sm:$0xff] %v420_v38  ;;  %v426_v41 = vld [vmem:[%s7579_s6 + $0x248] sm:$0xff]  ;;  %423 = vst [vmem:[%s7584_s7 + $0x138] sm:$0xff] %v422_v39  ;;  %v428_v42 = vld [vmem:[%s7579_s6 + $0x250] sm:$0xff] }
  0x26   : > { %425 = vst [vmem:[%s7584_s7 + $0x140] sm:$0xff] %v424_v40  ;;  %427 = vst [vmem:[%s7584_s7 + $0x148] sm:$0xff] %v426_v41  ;;  %v430_v43 = vld [vmem:[%s7579_s6 + $0x258] sm:$0xff]  ;;  %v432_v44 = vld [vmem:[%s7579_s6 + $0x260] sm:$0xff] }
  0x27   : > { %429 = vst [vmem:[%s7584_s7 + $0x150] sm:$0xff] %v428_v42  ;;  %431 = vst [vmem:[%s7584_s7 + $0x158] sm:$0xff] %v430_v43  ;;  %v434_v45 = vld [vmem:[%s7579_s6 + $0x268] sm:$0xff]  ;;  %v436_v46 = vld [vmem:[%s7579_s6 + $0x270] sm:$0xff] }
  0x28   : > { %433 = vst [vmem:[%s7584_s7 + $0x160] sm:$0xff] %v432_v44  ;;  %v438_v47 = vld [vmem:[%s7579_s6 + $0x278] sm:$0xff]  ;;  %435 = vst [vmem:[%s7584_s7 + $0x168] sm:$0xff] %v434_v45  ;;  %v440_v48 = vld [vmem:[%s7579_s6 + $0x300] sm:$0xff] }
  0x29   : > { %437 = vst [vmem:[%s7584_s7 + $0x170] sm:$0xff] %v436_v46  ;;  %439 = vst [vmem:[%s7584_s7 + $0x178] sm:$0xff] %v438_v47  ;;  %v442_v49 = vld [vmem:[%s7579_s6 + $0x308] sm:$0xff]  ;;  %v444_v50 = vld [vmem:[%s7579_s6 + $0x310] sm:$0xff] }
  0x2a   : > { %441 = vst [vmem:[%s7584_s7 + $0x180] sm:$0xff] %v440_v48  ;;  %443 = vst [vmem:[%s7584_s7 + $0x188] sm:$0xff] %v442_v49  ;;  %v446_v51 = vld [vmem:[%s7579_s6 + $0x318] sm:$0xff]  ;;  %v448_v52 = vld [vmem:[%s7579_s6 + $0x320] sm:$0xff] }
  0x2b   : > { %445 = vst [vmem:[%s7584_s7 + $0x190] sm:$0xff] %v444_v50  ;;  %v450_v53 = vld [vmem:[%s7579_s6 + $0x328] sm:$0xff]  ;;  %447 = vst [vmem:[%s7584_s7 + $0x198] sm:$0xff] %v446_v51  ;;  %v452_v54 = vld [vmem:[%s7579_s6 + $0x330] sm:$0xff] }
  0x2c   : > { %449 = vst [vmem:[%s7584_s7 + $0x1a0] sm:$0xff] %v448_v52  ;;  %451 = vst [vmem:[%s7584_s7 + $0x1a8] sm:$0xff] %v450_v53  ;;  %v454_v55 = vld [vmem:[%s7579_s6 + $0x338] sm:$0xff]  ;;  %v456_v56 = vld [vmem:[%s7579_s6 + $0x340] sm:$0xff] }
  0x2d   : > { %453 = vst [vmem:[%s7584_s7 + $0x1b0] sm:$0xff] %v452_v54  ;;  %455 = vst [vmem:[%s7584_s7 + $0x1b8] sm:$0xff] %v454_v55  ;;  %v458_v57 = vld [vmem:[%s7579_s6 + $0x348] sm:$0xff]  ;;  %v460_v58 = vld [vmem:[%s7579_s6 + $0x350] sm:$0xff] }
  0x2e   : > { %457 = vst [vmem:[%s7584_s7 + $0x1c0] sm:$0xff] %v456_v56  ;;  %v462_v59 = vld [vmem:[%s7579_s6 + $0x358] sm:$0xff]  ;;  %459 = vst [vmem:[%s7584_s7 + $0x1c8] sm:$0xff] %v458_v57  ;;  %v464_v60 = vld [vmem:[%s7579_s6 + $0x360] sm:$0xff] }
  0x2f   : > { %461 = vst [vmem:[%s7584_s7 + $0x1d0] sm:$0xff] %v460_v58  ;;  %463 = vst [vmem:[%s7584_s7 + $0x1d8] sm:$0xff] %v462_v59  ;;  %v466_v61 = vld [vmem:[%s7579_s6 + $0x368] sm:$0xff]  ;;  %v468_v62 = vld [vmem:[%s7579_s6 + $0x370] sm:$0xff] }
  0x30   : > { %465 = vst [vmem:[%s7584_s7 + $0x1e0] sm:$0xff] %v464_v60  ;;  %467 = vst [vmem:[%s7584_s7 + $0x1e8] sm:$0xff] %v466_v61  ;;  %v470_v63 = vld [vmem:[%s7579_s6 + $0x378] sm:$0xff] }
  0x31   : > { %469 = vst [vmem:[%s7584_s7 + $0x1f0] sm:$0xff] %v468_v62  ;;  %471 = vst [vmem:[%s7584_s7 + $0x1f8] sm:$0xff] %v470_v63 }
  0x32 PF: > { %p5654_p5 = scmp.ge.s32.totalorder %s7510_s20, 1  ;;  %p476_p6 = scmp.lt.s32.totalorder %s7510_s20, 3 }
  0x34   : > { %p477_p7 = pnand %p5654_p5, %p476_p6 }
  0x36   : > { %480 = sbr.rel (%p477_p7) target bundleno = 3609 (0xe19), region = 70 }
  0x3d   : > { %v592_v0 = vld [vmem:[%s9244_s1] sm:$0xff]  ;;  %v593_v1 = vld [vmem:[%s9244_s1 + $0x8] sm:$0xff]  ;;  %v594_v2 = vld [vmem:[%s9244_s1 + $0x10] sm:$0xff]  ;;  %s483_s14 = sand.u32 1, %s7502_s18   ;;  %vm596_vm0 = vcmask 261120   ;;  %s7512_s7 = smov 96  }
  0x3e   : > { %v7120_v3 = vpack.c.bf16 %v593_v1, %v592_v0  ;;  %v595_v4 = vld [vmem:[%s9244_s1 + $0x18] sm:$0xff]  ;;  %s5655_s17 = sshll.u32 %s483_s14, 9  ;;  %s7513_s28 = smov 32   ;;  %vm5389_vm1 = vcmask 523264   ;;  %vm5406_vm2 = vcmask 785408  }
  0x3f   : > { %v7124_v5 = vpack.c.bf16 %v595_v4, %v594_v2  ;;  %s7726_s23 = scalar_lea.vmem [#allocation2], %s5655_s17  ;;  %s7514_s17 = smov 64  }
  0x40   : > { %7121 = vmatprep.subr.bf16.mxu0 %v7120_v3  ;;  %v528_v6 = vld [vmem:[%s7726_s23] sm:$0xff]  ;;  %7264 = vmatprep.subr.bf16.mxu1 %v7120_v3  ;;  %v529_v7 = vld [vmem:[%s7726_s23 + $0x8] sm:$0xff]  ;;  %v530_v8 = vld [vmem:[%s7726_s23 + $0x10] sm:$0xff]  ;;  %s5656_s10 = sshll.u32 %s5647_s21, 4 }
  0x41   : > { %7123 = vmatpush3.bf16.msra.mxu0 %v7120_v3  ;;  %6480 = vmatprep.mubr.msk.f32.mxu0 %vm596_vm0, %v528_v6  ;;  %v531_v9 = vld [vmem:[%s7726_s23 + $0x18] sm:$0xff]  ;;  %v532_v10 = vld [vmem:[%s7726_s23 + $0x20] sm:$0xff]  ;;  %v533_v11 = vld [vmem:[%s7726_s23 + $0x28] sm:$0xff]  ;;  %p517_p8 = scmp.lt.s32.totalorder %s5656_s10, 31 }
  0x42   : > { %7125 = vmatprep.subr.bf16.mxu0 %v7124_v5  ;;  %7266 = vmatpush3.bf16.msra.mxu1 %v7120_v3  ;;  %v584_v12 = vld [vmem:[%s7726_s23 + $0x1c0] sm:$0xff]  ;;  %v534_v13 = vld [vmem:[%s7726_s23 + $0x30] sm:$0xff]  ;;  %v585_v14 = vld [vmem:[%s7726_s23 + $0x1c8] sm:$0xff] }
  0x43   : > { %7265 = vmatprep.subr.bf16.mxu1 %v7124_v5  ;;  %6564 = vmatprep.mubr.msk.f32.mxu1 %vm596_vm0, %v584_v12  ;;  %v586_v15 = vld [vmem:[%s7726_s23 + $0x1d0] sm:$0xff]  ;;  %v587_v16 = vld [vmem:[%s7726_s23 + $0x1d8] sm:$0xff]  ;;  %v588_v18 = vld [vmem:[%s7726_s23 + $0x1e0] sm:$0xff]  ;;  %s9280_s10 = smov (!%p517_p8, %s5656_s10), 31 }
  0x44   : > { %v535_v17 = vld [vmem:[%s7726_s23 + $0x38] sm:$0xff]  ;;  %v536_v19 = vld [vmem:[%s7726_s23 + $0x40] sm:$0xff]  ;;  %v589_v20 = vld [vmem:[%s7726_s23 + $0x1e8] sm:$0xff]  ;;  %s5657_s11 = sshll.u32 %s9280_s10, 3 }
  0x45   : > { %7127 = vmatpush3.bf16.msra.mxu0 %v7124_v5  ;;  %v537_v21 = vld [vmem:[%s7726_s23 + $0x48] sm:$0xff]  ;;  %v590_v22 = vld [vmem:[%s7726_s23 + $0x1f0] sm:$0xff]  ;;  %v591_v24 = vld [vmem:[%s7726_s23 + $0x1f8] sm:$0xff]  ;;  %s9041_s12 = scalar_lea.vmem %s9247_s4, %s5657_s11 }
  0x46   : > { %7267 = vmatpush3.bf16.msra.mxu1 %v7124_v5  ;;  %v538_v23 = vld [vmem:[%s7726_s23 + $0x50] sm:$0xff]  ;;  %v539_v25 = vld [vmem:[%s7726_s23 + $0x58] sm:$0xff]  ;;  %v540_v26 = vld [vmem:[%s7726_s23 + $0x60] sm:$0xff] }
  0x47   : > { %v541_v27 = vld [vmem:[%s7726_s23 + $0x68] sm:$0xff]  ;;  %v542_v28 = vld [vmem:[%s7726_s23 + $0x70] sm:$0xff]  ;;  %v543_v29 = vld [vmem:[%s7726_s23 + $0x78] sm:$0xff] }
  0x48   : > { %6481 = vmatmul.mubr.msk.f32.vlgmr.msra.gmra.mrb[0].mxu0 %vm596_vm0, %v529_v7  ;;  %v544_v30 = vld [vmem:[%s7726_s23 + $0x80] sm:$0xff]  ;;  %v545_v31 = vld [vmem:[%s7726_s23 + $0x88] sm:$0xff]  ;;  %v546_v32 = vld [vmem:[%s7726_s23 + $0x90] sm:$0xff] }
  0x49   : > { %6483 = vmatprep.mubr.msk.f32.mxu0 %vm596_vm0, %v530_v8  ;;  %6565 = vmatmul.mubr.msk.f32.vlgmr.msra.gmra.mrb[0].mxu1 %vm596_vm0, %v585_v14  ;;  %v547_v33 = vld [vmem:[%s7726_s23 + $0x98] sm:$0xff]  ;;  %v548_v34 = vld [vmem:[%s7726_s23 + $0xa0] sm:$0xff]  ;;  %v549_v35 = vld [vmem:[%s7726_s23 + $0xa8] sm:$0xff] }
  0x4a   : > { %6567 = vmatprep.mubr.msk.f32.mxu1 %vm596_vm0, %v586_v15  ;;  %v550_v36 = vld [vmem:[%s7726_s23 + $0xb0] sm:$0xff]  ;;  %v551_v37 = vld [vmem:[%s7726_s23 + $0xb8] sm:$0xff]  ;;  %v552_v38 = vld [vmem:[%s7726_s23 + $0xc0] sm:$0xff] }
  0x4b   : > { %v553_v39 = vld [vmem:[%s7726_s23 + $0xc8] sm:$0xff]  ;;  %v554_v40 = vld [vmem:[%s7726_s23 + $0xd0] sm:$0xff]  ;;  %v555_v41 = vld [vmem:[%s7726_s23 + $0xd8] sm:$0xff] }
  0x4c   : > { %6484 = vmatmul.mubr.msk.f32.gmra.mrb[2].mxu0 %vm596_vm0, %v531_v9  ;;  %v556_v42 = vld [vmem:[%s7726_s23 + $0xe0] sm:$0xff]  ;;  %v557_v43 = vld [vmem:[%s7726_s23 + $0xe8] sm:$0xff]  ;;  %v558_v44 = vld [vmem:[%s7726_s23 + $0xf0] sm:$0xff] }
  0x4d   : > { %6486 = vmatprep.mubr.msk.f32.mxu0 %vm596_vm0, %v532_v10  ;;  %6568 = vmatmul.mubr.msk.f32.gmra.mrb[2].mxu1 %vm596_vm0, %v587_v16  ;;  %v559_v45 = vld [vmem:[%s7726_s23 + $0xf8] sm:$0xff]  ;;  %v560_v46 = vld [vmem:[%s7726_s23 + $0x100] sm:$0xff]  ;;  %v561_v47 = vld [vmem:[%s7726_s23 + $0x108] sm:$0xff] }
  0x4e   : > { %6570 = vmatprep.mubr.msk.f32.mxu1 %vm596_vm0, %v588_v18  ;;  %v562_v48 = vld [vmem:[%s7726_s23 + $0x110] sm:$0xff]  ;;  %v563_v49 = vld [vmem:[%s7726_s23 + $0x118] sm:$0xff]  ;;  %v564_v50 = vld [vmem:[%s7726_s23 + $0x120] sm:$0xff] }
  0x4f   : > { %v565_v51 = vld [vmem:[%s7726_s23 + $0x128] sm:$0xff]  ;;  %v566_v52 = vld [vmem:[%s7726_s23 + $0x130] sm:$0xff]  ;;  %v567_v53 = vld [vmem:[%s7726_s23 + $0x138] sm:$0xff] }
  0x50   : > { %6487 = vmatmul.mubr.msk.f32.gmra.mrb[4].mxu0 %vm596_vm0, %v533_v11  ;;  %v568_v54 = vld [vmem:[%s7726_s23 + $0x140] sm:$0xff]  ;;  %v569_v55 = vld [vmem:[%s7726_s23 + $0x148] sm:$0xff]  ;;  %v570_v56 = vld [vmem:[%s7726_s23 + $0x150] sm:$0xff] }
  0x51   : > { %6489 = vmatprep.mubr.msk.f32.mxu0 %vm596_vm0, %v534_v13  ;;  %6571 = vmatmul.mubr.msk.f32.gmra.mrb[4].mxu1 %vm596_vm0, %v589_v20  ;;  %v571_v57 = vld [vmem:[%s7726_s23 + $0x158] sm:$0xff]  ;;  %v572_v58 = vld [vmem:[%s7726_s23 + $0x160] sm:$0xff]  ;;  %v573_v59 = vld [vmem:[%s7726_s23 + $0x168] sm:$0xff] }
  0x52   : > { %6573 = vmatprep.mubr.msk.f32.mxu1 %vm596_vm0, %v590_v22  ;;  %v574_v60 = vld [vmem:[%s7726_s23 + $0x170] sm:$0xff]  ;;  %v575_v61 = vld [vmem:[%s7726_s23 + $0x178] sm:$0xff]  ;;  %v576_v62 = vld [vmem:[%s7726_s23 + $0x180] sm:$0xff] }
  0x53   : > { %v577_v63 = vld [vmem:[%s7726_s23 + $0x188] sm:$0xff]  ;;  %v578_v0 = vld [vmem:[%s7726_s23 + $0x190] sm:$0xff]  ;;  %v579_v1 = vld [vmem:[%s7726_s23 + $0x198] sm:$0xff] }
  0x54   : > { %6490 = vmatmul.mubr.msk.f32.gmra.mrb[6].mxu0 %vm596_vm0, %v535_v17  ;;  %v580_v2 = vld [vmem:[%s7726_s23 + $0x1a0] sm:$0xff]  ;;  %v581_v3 = vld [vmem:[%s7726_s23 + $0x1a8] sm:$0xff]  ;;  %v582_v4 = vld [vmem:[%s7726_s23 + $0x1b0] sm:$0xff] }
  0x55   : > { %6492 = vmatprep.mubr.msk.f32.mxu0 %vm596_vm0, %v536_v19  ;;  %6574 = vmatmul.mubr.msk.f32.gmra.mrb[6].mxu1 %vm596_vm0, %v591_v24  ;;  %v583_v5 = vld [vmem:[%s7726_s23 + $0x1b8] sm:$0xff]  ;;  %v1376_v6 = vld [vmem:[%s9245_s2] sm:$0xff]  ;;  %v1377_v7 = vld [vmem:[%s9245_s2 + $0x8] sm:$0xff] }
  0x56   : > { %v7128_v8 = vpack.c.bf16 %v1377_v7, %v1376_v6  ;;  %v1378_v9 = vld [vmem:[%s9245_s2 + $0x10] sm:$0xff]  ;;  %v1379_v10 = vld [vmem:[%s9245_s2 + $0x18] sm:$0xff] }
  0x57   : > { %v7132_v11 = vpack.c.bf16 %v1379_v10, %v1378_v9 }
  0x58   : > { %6493 = vmatmul.mubr.msk.f32.gmra.mrb[8].mxu0 %vm596_vm0, %v537_v21  ;;  %7129 = vmatprep.subr.bf16.mxu1 %v7128_v8 }
  0x59   : > { %6495 = vmatprep.mubr.msk.f32.mxu0 %vm596_vm0, %v538_v23  ;;  %7131 = vmatpush3.bf16.msra.mxu1 %v7128_v8 }
  0x5a   : > { %7133 = vmatprep.subr.bf16.mxu1 %v7132_v11 }
  0x5c   : > { %6496 = vmatmul.mubr.msk.f32.gmra.mrb[10].mxu0 %vm596_vm0, %v539_v25 }
  0x5d   : > { %6498 = vmatprep.mubr.msk.f32.mxu0 %vm596_vm0, %v540_v26  ;;  %7135 = vmatpush3.bf16.msra.mxu1 %v7132_v11 }
  0x60   : > { %6499 = vmatmul.mubr.msk.f32.gmra.mrb[12].mxu0 %vm596_vm0, %v541_v27 }
  0x61   : > { %6501 = vmatprep.mubr.msk.f32.mxu0 %vm596_vm0, %v542_v28 }
  0x64   : > { %6502 = vmatmul.mubr.msk.f32.gmra.mrb[14].mxu0 %vm596_vm0, %v543_v29 }
  0x65   : > { %6504 = vmatprep.mubr.msk.f32.mxu0 %vm596_vm0, %v544_v30 }
  0x68   : > { %6505 = vmatmul.mubr.msk.f32.gmra.mrb[16].mxu0 %vm596_vm0, %v545_v31 }
  0x69   : > { %6507 = vmatprep.mubr.msk.f32.mxu0 %vm596_vm0, %v546_v32 }
  0x6c   : > { %6508 = vmatmul.mubr.msk.f32.gmra.mrb[18].mxu0 %vm596_vm0, %v547_v33 }
  0x6d   : > { %6510 = vmatprep.mubr.msk.f32.mxu0 %vm596_vm0, %v548_v34  ;;  %v7913_v34 = vld [vmem:[%s9246_s3 + $0x1] ss:$0 sm:$0xff] }
  0x70   : > { %6511 = vmatmul.mubr.msk.f32.gmra.mrb[20].mxu0 %vm596_vm0, %v549_v35 }
  0x71   : > { %6513 = vmatprep.mubr.msk.f32.mxu0 %vm596_vm0, %v550_v36 }
  0x74   : > { %6514 = vmatmul.mubr.msk.f32.gmra.mrb[22].mxu0 %vm596_vm0, %v551_v37 }
  0x75   : > { %6516 = vmatprep.mubr.msk.f32.mxu0 %vm596_vm0, %v552_v38 }
  0x78   : > { %6517 = vmatmul.mubr.msk.f32.gmra.mrb[24].mxu0 %vm596_vm0, %v553_v39 }
  0x79   : > { %6519 = vmatprep.mubr.msk.f32.mxu0 %vm596_vm0, %v554_v40 }
  0x7c   : > { %6520 = vmatmul.mubr.msk.f32.gmra.mrb[26].mxu0 %vm596_vm0, %v555_v41 }
  0x7d   : > { %6522 = vmatprep.mubr.msk.f32.mxu0 %vm596_vm0, %v556_v42 }
  0x80   : > { %6523 = vmatmul.mubr.msk.f32.gmra.mrb[28].mxu0 %vm596_vm0, %v557_v43 }
  0x81   : > { %6525 = vmatprep.mubr.msk.f32.mxu0 %vm596_vm0, %v558_v44 }
  0x84   : > { %6526 = vmatmul.mubr.msk.f32.gmra.mrb[30].mxu0 %vm596_vm0, %v559_v45 }
  0x85   : > { %6528 = vmatprep.mubr.msk.f32.mxu0 %vm596_vm0, %v560_v46 }
  0x88   : > { %6529 = vmatmul.mubr.msk.f32.gmra.mrb[32].mxu0 %vm596_vm0, %v561_v47 }
  0x89   : > { %6531 = vmatprep.mubr.msk.f32.mxu0 %vm596_vm0, %v562_v48 }
  0x8c   : > { %6532 = vmatmul.mubr.msk.f32.gmra.mrb[34].mxu0 %vm596_vm0, %v563_v49 }
  0x8d   : > { %6534 = vmatprep.mubr.msk.f32.mxu0 %vm596_vm0, %v564_v50 }
  0x90   : > { %6535 = vmatmul.mubr.msk.f32.gmra.mrb[36].mxu0 %vm596_vm0, %v565_v51 }
  0x91   : > { %6537 = vmatprep.mubr.msk.f32.mxu0 %vm596_vm0, %v566_v52 }
  0x94   : > { %6538 = vmatmul.mubr.msk.f32.gmra.mrb[38].mxu0 %vm596_vm0, %v567_v53 }
  0x95   : > { %6540 = vmatprep.mubr.msk.f32.mxu0 %vm596_vm0, %v568_v54 }
  0x98   : > { %6541 = vmatmul.mubr.msk.f32.gmra.mrb[40].mxu0 %vm596_vm0, %v569_v55 }
  0x99   : > { %6543 = vmatprep.mubr.msk.f32.mxu0 %vm596_vm0, %v570_v56 }
  0x9c   : > { %6544 = vmatmul.mubr.msk.f32.gmra.mrb[42].mxu0 %vm596_vm0, %v571_v57 }
  0x9d   : > { %6546 = vmatprep.mubr.msk.f32.mxu0 %vm596_vm0, %v572_v58 }
  0xa0   : > { %6547 = vmatmul.mubr.msk.f32.gmra.mrb[44].mxu0 %vm596_vm0, %v573_v59 }
  0xa1   : > { %6549 = vmatprep.mubr.msk.f32.mxu0 %vm596_vm0, %v574_v60 }
  0xa4   : > { %6550 = vmatmul.mubr.msk.f32.gmra.mrb[46].mxu0 %vm596_vm0, %v575_v61 }
  0xa5   : > { %6552 = vmatprep.mubr.msk.f32.mxu0 %vm596_vm0, %v576_v62 }
  0xa8   : > { %6553 = vmatmul.mubr.msk.f32.gmra.mrb[48].mxu0 %vm596_vm0, %v577_v63 }
  0xa9   : > { %6555 = vmatprep.mubr.msk.f32.mxu0 %vm596_vm0, %v578_v0 }
  0xac   : > { %6556 = vmatmul.mubr.msk.f32.gmra.mrb[50].mxu0 %vm596_vm0, %v579_v1 }
  0xad   : > { %6558 = vmatprep.mubr.msk.f32.mxu0 %vm596_vm0, %v580_v2 }
  0xb0   : > { %6559 = vmatmul.mubr.msk.f32.gmra.mrb[52].mxu0 %vm596_vm0, %v581_v3 }
  0xb1   : > { %6561 = vmatprep.mubr.msk.f32.mxu0 %vm596_vm0, %v582_v4 }
  0xb4   : > { %6562 = vmatmul.mubr.msk.f32.gmra.mrb[54].mxu0 %vm596_vm0, %v583_v5 }
 0x11b   : > { %v6482_v12 = vpop.f32.mrb[0].mxu0 }
 0x11c   : > { %v855_v13 = vpop.f32.mrb[1].mxu0  ;;  %v7871_v16 = vpop.f32.mrb[0].mxu1  ;;  %v1180_v36 = vadd.f32 %v6482_v12, %v7913_v34 }
 0x11d   : > { %1616 = vrot.lane.b32.xlu0 %v855_v13, %s7512_s7  ;;  %v7873_v18 = vpop.f32.mrb[1].mxu1  ;;  %v1179_v38 = vadd.f32 %v7913_v34, %v855_v13 }
 0x11e   : > { %7359 = vtanh.f32 %v1180_v36 }
 0x11f   : > { %v6485_v14 = vpop.f32.mrb[2].mxu0  ;;  %7361 = vtanh.f32 %v1179_v38 }
 0x120   : > { %v865_v15 = vpop.f32.mrb[3].mxu0  ;;  %v7877_v20 = vpop.f32.mrb[2].mxu1  ;;  %v1182_v40 = vadd.f32 %v6485_v14, %v7913_v34 }
 0x121   : > { %1618 = vrot.lane.b32.xlu0 %v6482_v12, %s7512_s7  ;;  %1620 = vrot.lane.b32.xlu1 %v865_v15, %s7512_s7  ;;  %v7879_v22 = vpop.f32.mrb[3].mxu1  ;;  %v1181_v43 = vadd.f32 %v7913_v34, %v865_v15 }
 0x123   : > { %v6488_v17 = vpop.f32.mrb[4].mxu0 }
 0x124   : > { %v875_v19 = vpop.f32.mrb[5].mxu0  ;;  %v7883_v24 = vpop.f32.mrb[4].mxu1  ;;  %v1184_v46 = vadd.f32 %v6488_v17, %v7913_v34 }
 0x125   : > { %1622 = vrot.lane.b32.xlu1 %v6485_v14, %s7512_s7  ;;  %1624 = vrot.lane.b32.xlu0 %v875_v19, %s7512_s7  ;;  %v7887_v26 = vpop.f32.mrb[5].mxu1  ;;  %v1183_v49 = vadd.f32 %v7913_v34, %v875_v19 }
 0x127   : > { %v6491_v21 = vpop.f32.mrb[6].mxu0 }
 0x128   : > { %v885_v23 = vpop.f32.mrb[7].mxu0  ;;  %v7894_v28 = vpop.f32.mrb[6].mxu1  ;;  %v1186_v52 = vadd.f32 %v6491_v21, %v7913_v34 }
 0x129   : > { %1626 = vrot.lane.b32.xlu1 %v6488_v17, %s7512_s7  ;;  %1628 = vrot.lane.b32.xlu0 %v885_v23, %s7512_s7  ;;  %v7898_v30 = vpop.f32.mrb[7].mxu1  ;;  %v1185_v55 = vadd.f32 %v7913_v34, %v885_v23  ;;  %v7360_v57 = vpop.eup %7359 }
 0x12a   : > { %v7362_v58 = vpop.eup %7361 }
 0x12b   : > { %v7885_v25 = vpop.f32.mrb[8].mxu0 }
 0x12c   : > { %v7889_v27 = vpop.f32.mrb[9].mxu0  ;;  %v1188_v61 = vadd.f32 %v7885_v25, %v7913_v34 }
 0x12d   : > { %1630 = vrot.lane.b32.xlu1 %v6491_v21, %s7512_s7  ;;  %1632 = vrot.lane.b32.xlu0 %v7889_v27, %s7512_s7  ;;  %v1187_v1 = vadd.f32 %v7913_v34, %v7889_v27 }
 0x12f   : > { %v7896_v29 = vpop.f32.mrb[10].mxu0 }
 0x130   : > { %v7900_v31 = vpop.f32.mrb[11].mxu0  ;;  %v1190_v9 = vadd.f32 %v7896_v29, %v7913_v34 }
 0x131   : > { %1634 = vrot.lane.b32.xlu1 %v7885_v25, %s7512_s7  ;;  %1636 = vrot.lane.b32.xlu0 %v7900_v31, %s7512_s7  ;;  %v1189_v13 = vadd.f32 %v7913_v34, %v7900_v31 }
 0x133   : > { %v7906_v32 = vpop.f32.mrb[12].mxu0 }
 0x134   : > { %v7908_v33 = vpop.f32.mrb[13].mxu0  ;;  %v1192_v27 = vadd.f32 %v7906_v32, %v7913_v34 }
 0x135   : > { %1638 = vrot.lane.b32.xlu1 %v7896_v29, %s7512_s7  ;;  %1640 = vrot.lane.b32.xlu0 %v7908_v33, %s7512_s7  ;;  %v1191_v38 = vadd.f32 %v7913_v34, %v7908_v33 }
 0x137   : > { %v7919_v35 = vpop.f32.mrb[14].mxu0 }
 0x138   : > { %v7922_v37 = vpop.f32.mrb[15].mxu0  ;;  %v1194_v33 = vadd.f32 %v7919_v35, %v7913_v34 }
 0x139   : > { %1642 = vrot.lane.b32.xlu1 %v7906_v32, %s7512_s7  ;;  %1644 = vrot.lane.b32.xlu0 %v7922_v37, %s7512_s7 }
 0x13b   : > { %v6506_v39 = vpop.f32.mrb[16].mxu0 }
 0x13c   : > { %v1196_v41 = vadd.f32 %v6506_v39, %v7913_v34  ;;  %v935_v42 = vpop.f32.mrb[17].mxu0 }
 0x13d   : > { %v1195_v44 = vadd.f32 %v7913_v34, %v935_v42  ;;  %1646 = vrot.lane.b32.xlu1 %v7919_v35, %s7512_s7  ;;  %2566 = vrot.lane.b32.xlu0 %v935_v42, %s7512_s7 }
 0x13e   : > { %7363 = vtanh.f32 %v1196_v41 }
 0x13f   : > { %7365 = vtanh.f32 %v1195_v44  ;;  %v6509_v45 = vpop.f32.mrb[18].mxu0 }
 0x140   : > { %7367 = vtanh.f32 %v1182_v40  ;;  %v1198_v47 = vadd.f32 %v6509_v45, %v7913_v34  ;;  %v945_v48 = vpop.f32.mrb[19].mxu0 }
 0x141   : > { %7369 = vtanh.f32 %v1181_v43  ;;  %v1197_v50 = vadd.f32 %v7913_v34, %v945_v48  ;;  %2568 = vrot.lane.b32.xlu1 %v6506_v39, %s7512_s7  ;;  %2570 = vrot.lane.b32.xlu0 %v945_v48, %s7512_s7  ;;  %v1193_v48 = vadd.f32 %v7913_v34, %v7922_v37 }
 0x142   : > { %7371 = vtanh.f32 %v1198_v47 }
 0x143   : > { %7373 = vtanh.f32 %v1197_v50  ;;  %v6512_v51 = vpop.f32.mrb[20].mxu0 }
 0x144   : > { %7375 = vtanh.f32 %v1184_v46  ;;  %v1200_v53 = vadd.f32 %v6512_v51, %v7913_v34  ;;  %v955_v54 = vpop.f32.mrb[21].mxu0 }
 0x145   : > { %7377 = vtanh.f32 %v1183_v49  ;;  %v1199_v56 = vadd.f32 %v7913_v34, %v955_v54  ;;  %2572 = vrot.lane.b32.xlu1 %v6509_v45, %s7512_s7  ;;  %2574 = vrot.lane.b32.xlu0 %v955_v54, %s7512_s7 }
 0x146   : > { %7379 = vtanh.f32 %v1200_v53 }
 0x147   : > { %7381 = vtanh.f32 %v1199_v56  ;;  %v6515_v59 = vpop.f32.mrb[22].mxu0 }
 0x148   : > { %v7364_v60 = vpop.eup %7363  ;;  %7383 = vtanh.f32 %v1186_v52  ;;  %v1202_v62 = vadd.f32 %v6515_v59, %v7913_v34  ;;  %v965_v63 = vpop.f32.mrb[23].mxu0 }
 0x149   : > { %v7366_v0 = vpop.eup %7365  ;;  %7385 = vtanh.f32 %v1185_v55  ;;  %v7953_v2 = vmul.f32 %v7364_v60, %v7360_v57  ;;  %v1201_v3 = vadd.f32 %v7913_v34, %v965_v63  ;;  %2576 = vrot.lane.b32.xlu1 %v6512_v51, %s7512_s7  ;;  %2578 = vrot.lane.b32.xlu0 %v965_v63, %s7512_s7 }
 0x14a   : > { %v7368_v4 = vpop.eup %7367  ;;  %7387 = vtanh.f32 %v1202_v62  ;;  %v7958_v5 = vmul.f32 %v7366_v0, %v7362_v58 }
 0x14b   : > { %v7370_v6 = vpop.eup %7369  ;;  %7389 = vtanh.f32 %v1201_v3  ;;  %v6518_v7 = vpop.f32.mrb[24].mxu0 }
 0x14c   : > { %v7372_v8 = vpop.eup %7371  ;;  %7391 = vtanh.f32 %v1188_v61  ;;  %v1204_v10 = vadd.f32 %v6518_v7, %v7913_v34  ;;  %v975_v11 = vpop.f32.mrb[25].mxu0 }
 0x14d   : > { %v7374_v12 = vpop.eup %7373  ;;  %7393 = vtanh.f32 %v1187_v1  ;;  %v1203_v14 = vadd.f32 %v7913_v34, %v975_v11  ;;  %2580 = vrot.lane.b32.xlu1 %v6515_v59, %s7512_s7  ;;  %2582 = vrot.lane.b32.xlu0 %v975_v11, %s7512_s7  ;;  %v7968_v15 = vmul.f32 %v7372_v8, %v7368_v4 }
 0x14e   : > { %v7376_v17 = vpop.eup %7375  ;;  %7395 = vtanh.f32 %v1204_v10  ;;  %v7970_v19 = vmul.f32 %v7374_v12, %v7370_v6 }
 0x14f   : > { %v7378_v21 = vpop.eup %7377  ;;  %7397 = vtanh.f32 %v1203_v14  ;;  %v6521_v23 = vpop.f32.mrb[26].mxu0 }
 0x150   : > { %v7380_v25 = vpop.eup %7379  ;;  %7399 = vtanh.f32 %v1190_v9  ;;  %v1206_v29 = vadd.f32 %v6521_v23, %v7913_v34  ;;  %v985_v31 = vpop.f32.mrb[27].mxu0 }
 0x151   : > { %v7382_v36 = vpop.eup %7381  ;;  %7401 = vtanh.f32 %v1189_v13  ;;  %v1205_v39 = vadd.f32 %v7913_v34, %v985_v31  ;;  %2584 = vrot.lane.b32.xlu1 %v6518_v7, %s7512_s7  ;;  %2586 = vrot.lane.b32.xlu0 %v985_v31, %s7512_s7  ;;  %v7980_v40 = vmul.f32 %v7380_v25, %v7376_v17 }
 0x152   : > { %v7384_v41 = vpop.eup %7383  ;;  %7403 = vtanh.f32 %v1206_v29  ;;  %v7982_v42 = vmul.f32 %v7382_v36, %v7378_v21 }
 0x153   : > { %v7386_v32 = vpop.eup %7385  ;;  %7405 = vtanh.f32 %v1205_v39  ;;  %v6524_v43 = vpop.f32.mrb[28].mxu0  ;;  %v1236_v39 = vadd.f32 %v7871_v16, %v7913_v34 }
 0x154   : > { %v7388_v44 = vpop.eup %7387  ;;  %7407 = vtanh.f32 %v1192_v27  ;;  %v1208_v45 = vadd.f32 %v6524_v43, %v7913_v34  ;;  %v995_v46 = vpop.f32.mrb[29].mxu0 }
 0x155   : > { %v7390_v47 = vpop.eup %7389  ;;  %7409 = vtanh.f32 %v1191_v38  ;;  %v1207_v49 = vadd.f32 %v7913_v34, %v995_v46  ;;  %2588 = vrot.lane.b32.xlu1 %v6521_v23, %s7512_s7  ;;  %2590 = vrot.lane.b32.xlu0 %v995_v46, %s7512_s7  ;;  %v7992_v50 = vmul.f32 %v7388_v44, %v7384_v41  ;;  %v1235_v41 = vadd.f32 %v7913_v34, %v7873_v18 }
 0x156   : > { %v7392_v51 = vpop.eup %7391  ;;  %7411 = vtanh.f32 %v1208_v45  ;;  %v7994_v52 = vmul.f32 %v7390_v47, %v7386_v32  ;;  %v1237_v46 = vadd.f32 %v7913_v34, %v7879_v22 }
 0x157   : > { %v7394_v35 = vpop.eup %7393  ;;  %7413 = vtanh.f32 %v1207_v49  ;;  %v6527_v53 = vpop.f32.mrb[30].mxu0 }
 0x158   : > { %v7396_v54 = vpop.eup %7395  ;;  %7415 = vtanh.f32 %v1194_v33  ;;  %v1210_v55 = vadd.f32 %v6527_v53, %v7913_v34  ;;  %v1005_v37 = vpop.f32.mrb[31].mxu0  ;;  %v1238_v33 = vadd.f32 %v7877_v20, %v7913_v34 }
 0x159   : > { %v7398_v56 = vpop.eup %7397  ;;  %7417 = vtanh.f32 %v1193_v48  ;;  %v1209_v57 = vadd.f32 %v7913_v34, %v1005_v37  ;;  %2592 = vrot.lane.b32.xlu1 %v6524_v43, %s7512_s7  ;;  %2594 = vrot.lane.b32.xlu0 %v1005_v37, %s7512_s7  ;;  %v8000_v58 = vmul.f32 %v7396_v54, %v7392_v51  ;;  %v1240_v51 = vadd.f32 %v7883_v24, %v7913_v34 }
 0x15a   : > { %v7400_v59 = vpop.eup %7399  ;;  %7419 = vtanh.f32 %v1210_v55  ;;  %v8002_v60 = vmul.f32 %v7398_v56, %v7394_v35  ;;  %v1242_v56 = vadd.f32 %v7894_v28, %v7913_v34 }
 0x15b   : > { %v7402_v61 = vpop.eup %7401  ;;  %7421 = vtanh.f32 %v1209_v57  ;;  %v8004_v62 = vpop.f32.mrb[32].mxu0 }
 0x15c   : > { %v7404_v63 = vpop.eup %7403  ;;  %v8006_v0 = vpop.f32.mrb[33].mxu0  ;;  %7423 = vtanh.f32 %v1236_v39 }
 0x15d   : > { %v7406_v1 = vpop.eup %7405  ;;  %2596 = vrot.lane.b32.xlu1 %v6527_v53, %s7512_s7  ;;  %3459 = vrot.lane.b32.xlu0 %v8006_v0, %s7512_s7  ;;  %v8011_v3 = vmul.f32 %v7404_v63, %v7400_v59  ;;  %7425 = vtanh.f32 %v1235_v41  ;;  %v1239_v53 = vadd.f32 %v7913_v34, %v7887_v26  ;;  %v1241_v59 = vadd.f32 %v7913_v34, %v7898_v30 }
 0x15e   : > { %v7408_v4 = vpop.eup %7407  ;;  %v8013_v6 = vmul.f32 %v7406_v1, %v7402_v61 }
 0x15f   : > { %v7410_v7 = vpop.eup %7409  ;;  %v8015_v8 = vpop.f32.mrb[34].mxu0 }
 0x160   : > { %v7412_v9 = vpop.eup %7411  ;;  %v8017_v10 = vpop.f32.mrb[35].mxu0 }
 0x161   : > { %v7414_v11 = vpop.eup %7413  ;;  %3461 = vrot.lane.b32.xlu1 %v8004_v62, %s7512_s7  ;;  %3463 = vrot.lane.b32.xlu0 %v8017_v10, %s7512_s7  ;;  %v8023_v12 = vmul.f32 %v7412_v9, %v7408_v4 }
 0x162   : > { %v7416_v13 = vpop.eup %7415  ;;  %v8025_v14 = vmul.f32 %v7414_v11, %v7410_v7  ;;  %v1212_v7 = vadd.f32 %v8004_v62, %v7913_v34 }
 0x163   : > { %v7418_v17 = vpop.eup %7417  ;;  %v8027_v21 = vpop.f32.mrb[36].mxu0 }
 0x164   : > { %v7420_v23 = vpop.eup %7419  ;;  %v8029_v25 = vpop.f32.mrb[37].mxu0 }
 0x165   : > { %v7422_v27 = vpop.eup %7421  ;;  %3465 = vrot.lane.b32.xlu1 %v8015_v8, %s7512_s7  ;;  %3467 = vrot.lane.b32.xlu0 %v8029_v25, %s7512_s7  ;;  %v8035_v29 = vmul.f32 %v7420_v23, %v7416_v13 }
 0x166   : > { %v8037_v31 = vmul.f32 %v7422_v27, %v7418_v17  ;;  %v7424_v61 = vpop.eup %7423  ;;  %v1211_v17 = vadd.f32 %v7913_v34, %v8006_v0  ;;  %v1214_v0 = vadd.f32 %v8015_v8, %v7913_v34 }
 0x167   : > { %v8039_v36 = vpop.f32.mrb[38].mxu0  ;;  %v7426_v63 = vpop.eup %7425 }
 0x168   : > { %v8041_v38 = vpop.f32.mrb[39].mxu0 }
 0x169   : > { %3469 = vrot.lane.b32.xlu1 %v8027_v21, %s7512_s7  ;;  %3471 = vrot.lane.b32.xlu0 %v8041_v38, %s7512_s7 }
 0x16b   : > { %v6542_v32 = vpop.f32.mrb[40].mxu0 }
 0x16c   : > { %v1220_v43 = vadd.f32 %v6542_v32, %v7913_v34  ;;  %v1055_v44 = vpop.f32.mrb[41].mxu0 }
 0x16d   : > { %v1219_v45 = vadd.f32 %v7913_v34, %v1055_v44  ;;  %3473 = vrot.lane.b32.xlu1 %v8039_v36, %s7512_s7  ;;  %3475 = vrot.lane.b32.xlu0 %v1055_v44, %s7512_s7 }
 0x16e   : > { %7427 = vtanh.f32 %v1220_v43 }
 0x16f   : > { %7429 = vtanh.f32 %v1219_v45  ;;  %v6545_v47 = vpop.f32.mrb[42].mxu0 }
 0x170   : > { %v1222_v48 = vadd.f32 %v6545_v47, %v7913_v34  ;;  %7431 = vtanh.f32 %v1238_v33  ;;  %v1065_v49 = vpop.f32.mrb[43].mxu0 }
 0x171   : > { %v1221_v35 = vadd.f32 %v7913_v34, %v1065_v49  ;;  %7433 = vtanh.f32 %v1237_v46  ;;  %3477 = vrot.lane.b32.xlu1 %v6542_v32, %s7512_s7  ;;  %3479 = vrot.lane.b32.xlu0 %v1065_v49, %s7512_s7 }
 0x172   : > { %7435 = vtanh.f32 %v1222_v48  ;;  %v1213_v48 = vadd.f32 %v7913_v34, %v8017_v10  ;;  %v1216_v10 = vadd.f32 %v8027_v21, %v7913_v34 }
 0x173   : > { %7437 = vtanh.f32 %v1221_v35  ;;  %v6548_v54 = vpop.f32.mrb[44].mxu0 }
 0x174   : > { %v1224_v55 = vadd.f32 %v6548_v54, %v7913_v34  ;;  %7439 = vtanh.f32 %v1240_v51  ;;  %v1075_v37 = vpop.f32.mrb[45].mxu0 }
 0x175   : > { %v1223_v57 = vadd.f32 %v7913_v34, %v1075_v37  ;;  %7441 = vtanh.f32 %v1239_v53  ;;  %3481 = vrot.lane.b32.xlu1 %v6545_v47, %s7512_s7  ;;  %3483 = vrot.lane.b32.xlu0 %v1075_v37, %s7512_s7 }
 0x176   : > { %7443 = vtanh.f32 %v1224_v55 }
 0x177   : > { %7445 = vtanh.f32 %v1223_v57  ;;  %v6551_v1 = vpop.f32.mrb[46].mxu0 }
 0x178   : > { %v7428_v4 = vpop.eup %7427  ;;  %v1226_v9 = vadd.f32 %v6551_v1, %v7913_v34  ;;  %7447 = vtanh.f32 %v1242_v56  ;;  %v1085_v11 = vpop.f32.mrb[47].mxu0 }
 0x179   : > { %v7430_v13 = vpop.eup %7429  ;;  %v1225_v23 = vadd.f32 %v7913_v34, %v1085_v11  ;;  %7449 = vtanh.f32 %v1241_v59  ;;  %3485 = vrot.lane.b32.xlu1 %v6548_v54, %s7512_s7  ;;  %3487 = vrot.lane.b32.xlu0 %v1085_v11, %s7512_s7  ;;  %v1333_v27 = vmul.f32 %v7428_v4, %v7424_v61  ;;  %v1215_v59 = vadd.f32 %v7913_v34, %v8029_v25 }
 0x17a   : > { %v7432_v39 = vpop.eup %7431  ;;  %7451 = vtanh.f32 %v1226_v9  ;;  %v1332_v41 = vmul.f32 %v7430_v13, %v7426_v63  ;;  %v1218_v25 = vadd.f32 %v8039_v36, %v7913_v34 }
 0x17b   : > { %v7434_v62 = vpop.eup %7433  ;;  %7453 = vtanh.f32 %v1225_v23  ;;  %v6554_v32 = vpop.f32.mrb[48].mxu0  ;;  %v8085_v43 = vmul.f32 %v1333_v27, %v8000_v58  ;;  %v1217_v23 = vadd.f32 %v7913_v34, %v8041_v38 }
 0x17c   : > { %v7436_v44 = vpop.eup %7435  ;;  %7455 = vtanh.f32 %v1212_v7  ;;  %v1228_v33 = vadd.f32 %v6554_v32, %v7913_v34  ;;  %v1095_v45 = vpop.f32.mrb[49].mxu0  ;;  %v8091_v46 = vmul.f32 %v1332_v41, %v8002_v60 }
 0x17d   : > { %v7438_v47 = vpop.eup %7437  ;;  %7457 = vtanh.f32 %v1211_v17  ;;  %v1227_v49 = vadd.f32 %v7913_v34, %v1095_v45  ;;  %3489 = vrot.lane.b32.xlu1 %v6551_v1, %s7512_s7  ;;  %4352 = vrot.lane.b32.xlu0 %v1095_v45, %s7512_s7  ;;  %v1335_v58 = vmul.f32 %v7436_v44, %v7432_v39 }
 0x17e   : > { %v7440_v51 = vpop.eup %7439  ;;  %7459 = vtanh.f32 %v1228_v33  ;;  %v1334_v8 = vmul.f32 %v7438_v47, %v7434_v62 }
 0x17f   : > { %v7442_v35 = vpop.eup %7441  ;;  %7461 = vtanh.f32 %v1227_v49  ;;  %v6557_v53 = vpop.f32.mrb[50].mxu0  ;;  %v8099_v60 = vmul.f32 %v1335_v58, %v8011_v3 }
 0x180   : > { %v7444_v54 = vpop.eup %7443  ;;  %7463 = vtanh.f32 %v1214_v0  ;;  %v1230_v55 = vadd.f32 %v6557_v53, %v7913_v34  ;;  %v1105_v37 = vpop.f32.mrb[51].mxu0  ;;  %v8105_v56 = vmul.f32 %v1334_v8, %v8013_v6 }
 0x181   : > { %v7446_v57 = vpop.eup %7445  ;;  %7465 = vtanh.f32 %v1213_v48  ;;  %v1229_v61 = vadd.f32 %v7913_v34, %v1105_v37  ;;  %4354 = vrot.lane.b32.xlu1 %v6554_v32, %s7512_s7  ;;  %4356 = vrot.lane.b32.xlu0 %v1105_v37, %s7512_s7  ;;  %v1337_v3 = vmul.f32 %v7444_v54, %v7440_v51  ;;  %v5743_v37 = vld [vmem:[%s9245_s2 + $0x20] sm:$0xff] }
 0x182   : > { %v7448_v63 = vpop.eup %7447  ;;  %7467 = vtanh.f32 %v1230_v55  ;;  %v1336_v21 = vmul.f32 %v7446_v57, %v7442_v35  ;;  %v8141_v35 = vld [vmem:[%s9246_s3] ss:$0 sm:$0xff]  ;;  %v5745_v57 = vld [vmem:[%s9245_s2 + $0x30] sm:$0xff] }
 0x183   : > { %v7450_v1 = vpop.eup %7449  ;;  %7469 = vtanh.f32 %v1229_v61  ;;  %v6560_v4 = vpop.f32.mrb[52].mxu0  ;;  %v8113_v6 = vmul.f32 %v1337_v3, %v8023_v12 }
 0x184   : > { %v7452_v7 = vpop.eup %7451  ;;  %7471 = vtanh.f32 %v1216_v10  ;;  %v1232_v9 = vadd.f32 %v6560_v4, %v7913_v34  ;;  %v1115_v11 = vpop.f32.mrb[53].mxu0  ;;  %v8119_v13 = vmul.f32 %v1336_v21, %v8025_v14 }
 0x185   : > { %v7454_v17 = vpop.eup %7453  ;;  %7473 = vtanh.f32 %v1215_v59  ;;  %v1231_v27 = vadd.f32 %v7913_v34, %v1115_v11  ;;  %4358 = vrot.lane.b32.xlu1 %v6557_v53, %s7512_s7  ;;  %4360 = vrot.lane.b32.xlu0 %v1115_v11, %s7512_s7  ;;  %v1339_v12 = vmul.f32 %v7452_v7, %v7448_v63 }
 0x186   : > { %v7456_v39 = vpop.eup %7455  ;;  %7475 = vtanh.f32 %v1232_v9  ;;  %v1338_v36 = vmul.f32 %v7454_v17, %v7450_v1 }
 0x187   : > { %v7458_v41 = vpop.eup %7457  ;;  %7477 = vtanh.f32 %v1231_v27  ;;  %v6563_v62 = vpop.f32.mrb[54].mxu0  ;;  %v8127_v14 = vmul.f32 %v1339_v12, %v8035_v29 }
 0x188   : > { %v7460_v32 = vpop.eup %7459  ;;  %7479 = vtanh.f32 %v1218_v25  ;;  %v1234_v38 = vadd.f32 %v6563_v62, %v7913_v34  ;;  %v1125_v44 = vpop.f32.mrb[55].mxu0  ;;  %v8131_v0 = vmul.f32 %v1338_v36, %v8037_v31  ;;  %v8283_v36 = vld [vmem:[%s9246_s3 + $0x2] ss:$0 sm:$0xff] }
 0x189   : > { %v7462_v33 = vpop.eup %7461  ;;  %7481 = vtanh.f32 %v1217_v23  ;;  %v1325_v45 = vmul.f32 %v7460_v32, %v7456_v39  ;;  %v1233_v47 = vadd.f32 %v7913_v34, %v1125_v44  ;;  %4362 = vrot.lane.b32.xlu1 %v6560_v4, %s7512_s7  ;;  %4364 = vrot.lane.b32.xlu0 %v1125_v44, %s7512_s7  ;;  %v5767_v44 = vld [vmem:[%s9245_s2 + $0x58] sm:$0xff] }
 0x18a   : > { %v7464_v48 = vpop.eup %7463  ;;  %7483 = vtanh.f32 %v1234_v38  ;;  %v1324_v29 = vmul.f32 %v7462_v33, %v7458_v41  ;;  %v5766_v38 = vld [vmem:[%s9245_s2 + $0x50] sm:$0xff] }
 0x18b   : > { %v7466_v49 = vpop.eup %7465  ;;  %v1341_v58 = vmul.f32 %v1325_v45, %v7953_v2  ;;  %7485 = vtanh.f32 %v1233_v47 }
 0x18c   : > { %v7468_v51 = vpop.eup %7467  ;;  %v1340_v31 = vmul.f32 %v1324_v29, %v7958_v5  ;;  %v7148_v29 = vpack.c.bf16 %v5767_v44, %v5766_v38 }
 0x18d   : > { %v7470_v8 = vpop.eup %7469  ;;  %4366 = vrot.lane.b32.xlu1 %v6563_v62, %s7512_s7  ;;  %4368 = vrot.lane.b32.xlu0 %v7873_v18, %s7512_s7  ;;  %v1327_v34 = vmul.f32 %v7468_v51, %v7464_v48  ;;  %v8150_v5 = vmul.f32 %v8141_v35, %v1341_v58  ;;  %v5744_v18 = vld [vmem:[%s9245_s2 + $0x28] sm:$0xff] }
 0x18e   : > { %v7472_v53 = vpop.eup %7471  ;;  %v8147_v54 = vmul.f32 %v8141_v35, %v1340_v31  ;;  %v1326_v2 = vmul.f32 %v7470_v8, %v7466_v49  ;;  %v8165_v3 = vpack.c.bf16 %v5744_v18, %v5743_v37 }
 0x18f   : > { %v7474_v10 = vpop.eup %7473  ;;  %v1343_v55 = vmul.f32 %v1327_v34, %v7968_v15  ;;  %v5746_v15 = vld [vmem:[%s9245_s2 + $0x38] sm:$0xff] }
 0x190   : > { %v7476_v59 = vpop.eup %7475  ;;  %6584 = vmatprep.mubr.msk.f32.mxu1 %vm596_vm0, %v8147_v54  ;;  %v1342_v61 = vmul.f32 %v1326_v2, %v7970_v19  ;;  %v8174_v1 = vpack.c.bf16 %v5746_v15, %v5745_v57  ;;  %7137 = vmatprep.subr.bf16.mxu1 %v8165_v3 }
 0x191   : > { %v7478_v63 = vpop.eup %7477  ;;  %6585 = vmatmul.mubr.msk.f32.vlgmr.msra.gmra.mrb[8].mxu1 %vm596_vm0, %v8150_v5  ;;  %4370 = vrot.lane.b32.xlu1 %v7871_v16, %s7512_s7  ;;  %v1329_v21 = vmul.f32 %v7476_v59, %v7472_v53  ;;  %v8183_v9 = vmul.f32 %v8141_v35, %v1343_v55 }
 0x192   : > { %v7480_v4 = vpop.eup %7479  ;;  %4372 = vrot.lane.b32.xlu0 %v7879_v22, %s7512_s7  ;;  %v8179_v19 = vmul.f32 %v8141_v35, %v1342_v61  ;;  %v1328_v7 = vmul.f32 %v7478_v63, %v7474_v10  ;;  %7139 = vmatpush3.bf16.msra.mxu1 %v8165_v3 }
 0x193   : > { %v7482_v25 = vpop.eup %7481  ;;  %v1345_v11 = vmul.f32 %v1329_v21, %v7980_v40  ;;  %7141 = vmatprep.subr.bf16.mxu1 %v8174_v1 }
 0x194   : > { %v7484_v16 = vpop.eup %7483  ;;  %6587 = vmatprep.mubr.msk.f32.mxu1 %vm596_vm0, %v8179_v19  ;;  %v1344_v22 = vmul.f32 %v1328_v7, %v7982_v42 }
 0x195   : > { %v7486_v17 = vpop.eup %7485  ;;  %6588 = vmatmul.mubr.msk.f32.gmra.mrb[10].mxu1 %vm596_vm0, %v8183_v9  ;;  %4374 = vrot.lane.b32.xlu1 %v7877_v20, %s7512_s7  ;;  %v1331_v23 = vmul.f32 %v7484_v16, %v7480_v4  ;;  %v8201_v12 = vmul.f32 %v8141_v35, %v1345_v11 }
 0x196   : > { %4376 = vrot.lane.b32.xlu0 %v7887_v26, %s7512_s7  ;;  %v8198_v40 = vmul.f32 %v8141_v35, %v1344_v22  ;;  %v1330_v27 = vmul.f32 %v7486_v17, %v7482_v25  ;;  %7143 = vmatpush3.bf16.msra.mxu1 %v8174_v1 }
 0x197   : > { %v1347_v42 = vmul.f32 %v1331_v23, %v7992_v50 }
 0x198   : > { %6590 = vmatprep.mubr.msk.f32.mxu1 %vm596_vm0, %v8198_v40  ;;  %v1346_v20 = vmul.f32 %v1330_v27, %v7994_v52  ;;  %v8224_v52 = vmul.f32 %v8141_v35, %v8091_v46  ;;  %v8250_v46 = vmul.f32 %v8141_v35, %v8119_v13  ;;  %v5765_v13 = vld [vmem:[%s9245_s2 + $0x48] sm:$0xff] }
 0x199   : > { %6591 = vmatmul.mubr.msk.f32.gmra.mrb[12].mxu1 %vm596_vm0, %v8201_v12  ;;  %4378 = vrot.lane.b32.xlu1 %v7883_v24, %s7512_s7  ;;  %v8218_v50 = vmul.f32 %v8141_v35, %v1347_v42  ;;  %v8234_v24 = vmul.f32 %v8141_v35, %v8085_v43  ;;  %v8258_v43 = vmul.f32 %v8141_v35, %v8113_v6  ;;  %v5764_v6 = vld [vmem:[%s9245_s2 + $0x40] sm:$0xff] }
 0x19a   : > { %4380 = vrot.lane.b32.xlu0 %v7898_v30, %s7512_s7  ;;  %v8215_v26 = vmul.f32 %v8141_v35, %v1346_v20  ;;  %v8238_v30 = vmul.f32 %v8141_v35, %v8105_v56  ;;  %9256 = vst [vmem:[#allocation3_spill] sm:$0xff] %v8250_v46  ;;  %v8262_v56 = vmul.f32 %v8141_v35, %v8131_v0 }
 0x19b   : > { %v7144_v39 = vpack.c.bf16 %v5765_v13, %v5764_v6 }
 0x19c   : > { %6593 = vmatprep.mubr.msk.f32.mxu1 %vm596_vm0, %v8215_v26  ;;  %9257 = vst [vmem:[#allocation4_spill] sm:$0xff] %v8262_v56 }
 0x19d   : > { %4382 = vrot.lane.b32.xlu1 %v7894_v28, %s7512_s7  ;;  %6594 = vmatmul.mubr.msk.f32.gmra.mrb[14].mxu1 %vm596_vm0, %v8218_v50  ;;  %v8246_v28 = vmul.f32 %v8141_v35, %v8099_v60  ;;  %v8270_v60 = vmul.f32 %v8141_v35, %v8127_v14 }
 0x19e   : > { %6596 = vmatprep.mubr.msk.f32.mxu1 %vm596_vm0, %v8224_v52  ;;  %7145 = vmatprep.subr.bf16.mxu1 %v7144_v39 }
 0x19f   : > { %9258 = vst [vmem:[#allocation5_spill] sm:$0xff] %v8270_v60 }
 0x1a1   : > { %6597 = vmatmul.mubr.msk.f32.gmra.mrb[16].mxu1 %vm596_vm0, %v8234_v24 }
 0x1a2   : > { %6599 = vmatprep.mubr.msk.f32.mxu1 %vm596_vm0, %v8238_v30 }
 0x1a5   : > { %6600 = vmatmul.mubr.msk.f32.gmra.mrb[18].mxu1 %vm596_vm0, %v8246_v28 }
 0x1a6   : > { %6602 = vmatprep.mubr.msk.f32.mxu1 %vm596_vm0, %v8250_v46 }
 0x1a9   : > { %6603 = vmatmul.mubr.msk.f32.gmra.mrb[20].mxu1 %vm596_vm0, %v8258_v43 }
 0x1aa   : > { %6605 = vmatprep.mubr.msk.f32.mxu1 %vm596_vm0, %v8262_v56 }
 0x1ad   : > { %6606 = vmatmul.mubr.msk.f32.gmra.mrb[22].mxu1 %vm596_vm0, %v8270_v60 }
 0x264   : > { %v6586_v41 = vpop.f32.mrb[8].mxu1 }
 0x265   : > { %v1505_v62 = vadd.f32 %v6586_v41, %v8283_v36  ;;  %v1499_v14 = vpop.f32.mrb[9].mxu1 }
 0x266   : > { %v1500_v32 = vadd.f32 %v8283_v36, %v1499_v14 }
 0x267   : > { %v1579_v45 = vmax.f32 %v1505_v62, 0.0 }
 0x268   : > { %v1578_v0 = vmax.f32 %v1500_v32, 0.0  ;;  %v6589_v33 = vpop.f32.mrb[10].mxu1 }
 0x269   : > { %v1515_v47 = vadd.f32 %v6589_v33, %v8283_v36  ;;  %v1509_v48 = vpop.f32.mrb[11].mxu1  ;;  %v5786_v33 = vld [vmem:[%s9245_s2 + $0xc8] sm:$0xff] }
 0x26a   : > { %v1510_v49 = vadd.f32 %v8283_v36, %v1509_v48  ;;  %6616 = vmatprep.mubr.msk.f32.mxu1 %vm596_vm0, %v1578_v0  ;;  %v5785_v0 = vld [vmem:[%s9245_s2 + $0xc0] sm:$0xff] }
 0x26b   : > { %6617 = vmatmul.mubr.msk.f32.vlgmr.msra.gmra.mrb[24].mxu1 %vm596_vm0, %v1579_v45  ;;  %v1581_v31 = vmax.f32 %v1515_v47, 0.0  ;;  %v7152_v45 = vpack.c.bf16 %v5786_v33, %v5785_v0  ;;  %v1617_v47 = vpop.permute.xlu0 %1616 }
 0x26c   : > { %v1580_v58 = vmax.f32 %v1510_v49, 0.0  ;;  %v6592_v51 = vpop.f32.mrb[12].mxu1  ;;  %7147 = vmatpush3.bf16.msra.mxu1 %v7144_v39 }
 0x26d   : > { %v1525_v8 = vadd.f32 %v6592_v51, %v8283_v36  ;;  %v1519_v35 = vpop.f32.mrb[13].mxu1  ;;  %7149 = vmatprep.subr.bf16.mxu1 %v7148_v29 }
 0x26e   : > { %v1520_v34 = vadd.f32 %v8283_v36, %v1519_v35  ;;  %6619 = vmatprep.mubr.msk.f32.mxu1 %vm596_vm0, %v1580_v58 }
 0x26f   : > { %6620 = vmatmul.mubr.msk.f32.gmra.mrb[26].mxu1 %vm596_vm0, %v1581_v31  ;;  %v1583_v10 = vmax.f32 %v1525_v8, 0.0  ;;  %v8332_v31 = vld [vmem:[%s9246_s3 + $0x3] ss:$0 sm:$0xff] }
 0x270   : > { %v1582_v53 = vmax.f32 %v1520_v34, 0.0  ;;  %v6595_v2 = vpop.f32.mrb[14].mxu1  ;;  %7151 = vmatpush3.bf16.msra.mxu1 %v7148_v29  ;;  %v1619_v29 = vpop.permute.xlu0 %1618 }
 0x271   : > { %v1535_v55 = vadd.f32 %v6595_v2, %v8283_v36  ;;  %v1529_v37 = vpop.f32.mrb[15].mxu1  ;;  %7153 = vmatprep.subr.bf16.mxu1 %v7152_v45 }
 0x272   : > { %v1530_v18 = vadd.f32 %v8283_v36, %v1529_v37  ;;  %6622 = vmatprep.mubr.msk.f32.mxu1 %vm596_vm0, %v1582_v53  ;;  %v5787_v37 = vld [vmem:[%s9245_s2 + $0xd0] sm:$0xff] }
 0x273   : > { %6623 = vmatmul.mubr.msk.f32.gmra.mrb[28].mxu1 %vm596_vm0, %v1583_v10  ;;  %v1585_v61 = vmax.f32 %v1535_v55, 0.0 }
 0x274   : > { %v1584_v57 = vmax.f32 %v1530_v18, 0.0  ;;  %v6598_v59 = vpop.f32.mrb[16].mxu1  ;;  %v1625_v58 = vpop.permute.xlu0 %1624  ;;  %v5788_v18 = vld [vmem:[%s9245_s2 + $0xd8] sm:$0xff] }
 0x275   : > { %v1545_v15 = vadd.f32 %v6598_v59, %v8283_v36  ;;  %v1539_v63 = vpop.f32.mrb[17].mxu1 }
 0x276   : > { %v1540_v21 = vadd.f32 %v8283_v36, %v1539_v63  ;;  %6625 = vmatprep.mubr.msk.f32.mxu1 %vm596_vm0, %v1584_v57 }
 0x277   : > { %6626 = vmatmul.mubr.msk.f32.gmra.mrb[30].mxu1 %vm596_vm0, %v1585_v61  ;;  %v1587_v25 = vmax.f32 %v1545_v15, 0.0 }
 0x278   : > { %v1586_v4 = vmax.f32 %v1540_v21, 0.0  ;;  %v6601_v7 = vpop.f32.mrb[18].mxu1  ;;  %v1629_v57 = vpop.permute.xlu0 %1628 }
 0x279   : > { %v1555_v11 = vadd.f32 %v6601_v7, %v8283_v36  ;;  %v1549_v16 = vpop.f32.mrb[19].mxu1  ;;  %v7156_v7 = vpack.c.bf16 %v5788_v18, %v5787_v37 }
 0x27a   : > { %v1550_v22 = vadd.f32 %v8283_v36, %v1549_v16  ;;  %6628 = vmatprep.mubr.msk.f32.mxu1 %vm596_vm0, %v1586_v4 }
 0x27b   : > { %6629 = vmatmul.mubr.msk.f32.gmra.mrb[32].mxu1 %vm596_vm0, %v1587_v25  ;;  %v1589_v27 = vmax.f32 %v1555_v11, 0.0 }
 0x27c   : > { %v1588_v17 = vmax.f32 %v1550_v22, 0.0  ;;  %v6604_v23 = vpop.f32.mrb[20].mxu1 }
 0x27d   : > { %v1565_v42 = vadd.f32 %v6604_v23, %v8283_v36  ;;  %v1559_v20 = vpop.f32.mrb[21].mxu1 }
 0x27e   : > { %v1560_v6 = vadd.f32 %v8283_v36, %v1559_v20  ;;  %6631 = vmatprep.mubr.msk.f32.mxu1 %vm596_vm0, %v1588_v17 }
 0x27f   : > { %6632 = vmatmul.mubr.msk.f32.gmra.mrb[34].mxu1 %vm596_vm0, %v1589_v27  ;;  %v1591_v41 = vmax.f32 %v1565_v42, 0.0  ;;  %v1633_v42 = vpop.permute.xlu0 %1632 }
 0x280   : > { %v1590_v13 = vmax.f32 %v1560_v6, 0.0  ;;  %v6607_v39 = vpop.f32.mrb[22].mxu1 }
 0x281   : > { %v1575_v62 = vadd.f32 %v6607_v39, %v8283_v36  ;;  %v1569_v14 = vpop.f32.mrb[23].mxu1 }
 0x282   : > { %v1570_v32 = vadd.f32 %v8283_v36, %v1569_v14  ;;  %6634 = vmatprep.mubr.msk.f32.mxu1 %vm596_vm0, %v1590_v13  ;;  %v1621_v36 = vpop.permute.xlu1 %1620 }
 0x283   : > { %6635 = vmatmul.mubr.msk.f32.gmra.mrb[36].mxu1 %vm596_vm0, %v1591_v41  ;;  %v1593_v44 = vmax.f32 %v1575_v62, 0.0 }
 0x284   : > { %v1592_v38 = vmax.f32 %v1570_v32, 0.0 }
 0x286   : > { %6637 = vmatprep.mubr.msk.f32.mxu1 %vm596_vm0, %v1592_v38  ;;  %v1623_v48 = vpop.permute.xlu1 %1622 }
 0x287   : > { %6638 = vmatmul.mubr.msk.f32.gmra.mrb[38].mxu1 %vm596_vm0, %v1593_v44 }
 0x28a   : > { %v1627_v49 = vpop.permute.xlu1 %1626 }
 0x28e   : > { %v1631_v2 = vpop.permute.xlu1 %1630 }
 0x292   : > { %v1635_v17 = vpop.permute.xlu1 %1634 }
 0x296   : > { %v1639_v0 = vpop.permute.xlu1 %1638 }
 0x33e   : > { %v6618_v51 = vpop.f32.mrb[24].mxu1 }
 0x33f   : > { %v1784_v8 = vadd.f32 %v6618_v51, %v1619_v29  ;;  %v1778_v35 = vpop.f32.mrb[25].mxu1 }
 0x340   : > { %v1779_v34 = vadd.f32 %v1778_v35, %v1617_v47 }
 0x341   : > { %v1863_v53 = vadd.f32 %v8332_v31, %v1784_v8 }
 0x342   : > { %v1862_v10 = vadd.f32 %v8332_v31, %v1779_v34  ;;  %v6621_v55 = vpop.f32.mrb[26].mxu1 }
 0x343   : > { %v1794_v59 = vadd.f32 %v6621_v55, %v1623_v48  ;;  %v1788_v61 = vpop.f32.mrb[27].mxu1  ;;  %v1879_v21 = vmax.f32 %v1863_v53, 0.0 }
 0x344   : > { %v1878_v15 = vmax.f32 %v1862_v10, 0.0  ;;  %v1789_v63 = vadd.f32 %v1788_v61, %v1621_v36  ;;  %v1637_v36 = vpop.permute.xlu0 %1636 }
 0x345   : > { %v1865_v4 = vadd.f32 %v8332_v31, %v1794_v59 }
 0x346   : > { %v1864_v25 = vadd.f32 %v8332_v31, %v1789_v63  ;;  %v6624_v11 = vpop.f32.mrb[28].mxu1  ;;  %6648 = vmatprep.mubr.msk.f32.mxu1 %vm596_vm0, %v1878_v15 }
 0x347   : > { %v1804_v16 = vadd.f32 %v6624_v11, %v1627_v49  ;;  %v1798_v22 = vpop.f32.mrb[29].mxu1  ;;  %6649 = vmatmul.mubr.msk.f32.vlgmr.msra.gmra.mrb[40].mxu1 %vm596_vm0, %v1879_v21  ;;  %v1881_v20 = vmax.f32 %v1865_v4, 0.0 }
 0x348   : > { %v1880_v23 = vmax.f32 %v1864_v25, 0.0  ;;  %v1799_v27 = vadd.f32 %v1798_v22, %v1625_v58  ;;  %7155 = vmatpush3.bf16.msra.mxu1 %v7152_v45  ;;  %v1641_v37 = vpop.permute.xlu0 %1640 }
 0x349   : > { %v1867_v6 = vadd.f32 %v8332_v31, %v1804_v16  ;;  %7157 = vmatprep.subr.bf16.mxu1 %v7156_v7 }
 0x34a   : > { %v1866_v13 = vadd.f32 %v8332_v31, %v1799_v27  ;;  %v6627_v39 = vpop.f32.mrb[30].mxu1  ;;  %6651 = vmatprep.mubr.msk.f32.mxu1 %vm596_vm0, %v1880_v23 }
 0x34b   : > { %v1814_v41 = vadd.f32 %v6627_v39, %v1631_v2  ;;  %v1808_v62 = vpop.f32.mrb[31].mxu1  ;;  %6652 = vmatmul.mubr.msk.f32.gmra.mrb[42].mxu1 %vm596_vm0, %v1881_v20  ;;  %v1883_v38 = vmax.f32 %v1867_v6, 0.0  ;;  %v1643_v2 = vpop.permute.xlu1 %1642 }
 0x34c   : > { %v1882_v14 = vmax.f32 %v1866_v13, 0.0  ;;  %v1809_v32 = vadd.f32 %v1808_v62, %v1629_v57  ;;  %7159 = vmatpush3.bf16.msra.mxu1 %v7156_v7 }
 0x34d   : > { %v1869_v44 = vadd.f32 %v8332_v31, %v1814_v41  ;;  %7169 = vmatprep.subr.bf16.mxu1 %v8165_v3 }
 0x34e   : > { %v1868_v33 = vadd.f32 %v8332_v31, %v1809_v32  ;;  %v6630_v45 = vpop.f32.mrb[32].mxu1  ;;  %6654 = vmatprep.mubr.msk.f32.mxu1 %vm596_vm0, %v1882_v14  ;;  %v5806_v14 = vld [vmem:[%s9245_s2 + $0x140] sm:$0xff]  ;;  %v5807_v32 = vld [vmem:[%s9245_s2 + $0x148] sm:$0xff] }
 0x34f   : > { %v1824_v47 = vadd.f32 %v6630_v45, %v1635_v17  ;;  %v1818_v48 = vpop.f32.mrb[33].mxu1  ;;  %6655 = vmatmul.mubr.msk.f32.gmra.mrb[44].mxu1 %vm596_vm0, %v1883_v38  ;;  %v1885_v58 = vmax.f32 %v1869_v44, 0.0  ;;  %v1647_v11 = vpop.permute.xlu1 %1646  ;;  %v7160_v38 = vpack.c.bf16 %v5807_v32, %v5806_v14  ;;  %v5768_v44 = vld [vmem:[%s9246_s3 + $0x4] ss:$0 sm:$0xff] }
 0x350   : > { %v1884_v29 = vmax.f32 %v1868_v33, 0.0  ;;  %v1819_v49 = vadd.f32 %v1818_v48, %v1633_v42  ;;  %v1645_v17 = vpop.permute.xlu0 %1644 }
 0x351   : > { %v1871_v51 = vadd.f32 %v8332_v31, %v1824_v47  ;;  %7161 = vmatprep.subr.bf16.mxu0 %v7160_v38 }
 0x352   : > { %v1870_v8 = vadd.f32 %v8332_v31, %v1819_v49  ;;  %v6633_v35 = vpop.f32.mrb[34].mxu1  ;;  %6657 = vmatprep.mubr.msk.f32.mxu1 %vm596_vm0, %v1884_v29  ;;  %7163 = vmatpush3.bf16.msra.mxu0 %v7160_v38 }
 0x353   : > { %v1834_v34 = vadd.f32 %v6633_v35, %v1639_v0  ;;  %v1828_v53 = vpop.f32.mrb[35].mxu1  ;;  %6658 = vmatmul.mubr.msk.f32.gmra.mrb[46].mxu1 %vm596_vm0, %v1885_v58  ;;  %v1887_v18 = vmax.f32 %v1871_v51, 0.0 }
 0x354   : > { %v1886_v10 = vmax.f32 %v1870_v8, 0.0  ;;  %v1829_v55 = vadd.f32 %v1828_v53, %v1637_v36 }
 0x355   : > { %v1873_v57 = vadd.f32 %v8332_v31, %v1834_v34 }
 0x356   : > { %v1872_v59 = vadd.f32 %v8332_v31, %v1829_v55  ;;  %v6636_v61 = vpop.f32.mrb[36].mxu1  ;;  %6660 = vmatprep.mubr.msk.f32.mxu1 %vm596_vm0, %v1886_v10 }
 0x357   : > { %v1844_v15 = vadd.f32 %v6636_v61, %v1643_v2  ;;  %v1838_v63 = vpop.f32.mrb[37].mxu1  ;;  %6661 = vmatmul.mubr.msk.f32.gmra.mrb[48].mxu1 %vm596_vm0, %v1887_v18  ;;  %v1889_v7 = vmax.f32 %v1873_v57, 0.0 }
 0x358   : > { %v1888_v21 = vmax.f32 %v1872_v59, 0.0  ;;  %v1839_v4 = vadd.f32 %v1838_v63, %v1641_v37 }
 0x359   : > { %v1875_v25 = vadd.f32 %v8332_v31, %v1844_v15 }
 0x35a   : > { %v1874_v16 = vadd.f32 %v8332_v31, %v1839_v4  ;;  %v6639_v22 = vpop.f32.mrb[38].mxu1  ;;  %6663 = vmatprep.mubr.msk.f32.mxu1 %vm596_vm0, %v1888_v21 }
 0x35b   : > { %v1854_v23 = vadd.f32 %v6639_v22, %v1647_v11  ;;  %v1848_v27 = vpop.f32.mrb[39].mxu1  ;;  %6664 = vmatmul.mubr.msk.f32.gmra.mrb[50].mxu1 %vm596_vm0, %v1889_v7  ;;  %v1891_v6 = vmax.f32 %v1875_v25, 0.0 }
 0x35c   : > { %v1890_v42 = vmax.f32 %v1874_v16, 0.0  ;;  %v1849_v20 = vadd.f32 %v1848_v27, %v1645_v17 }
 0x35d   : > { %v1877_v13 = vadd.f32 %v8332_v31, %v1854_v23 }
 0x35e   : > { %v1876_v39 = vadd.f32 %v8332_v31, %v1849_v20  ;;  %6666 = vmatprep.mubr.msk.f32.mxu1 %vm596_vm0, %v1890_v42 }
 0x35f   : > { %6667 = vmatmul.mubr.msk.f32.gmra.mrb[52].mxu1 %vm596_vm0, %v1891_v6  ;;  %v1893_v62 = vmax.f32 %v1877_v13, 0.0 }
 0x360   : > { %v1892_v41 = vmax.f32 %v1876_v39, 0.0 }
 0x362   : > { %6669 = vmatprep.mubr.msk.f32.mxu1 %vm596_vm0, %v1892_v41 }
 0x363   : > { %6670 = vmatmul.mubr.msk.f32.gmra.mrb[54].mxu1 %vm596_vm0, %v1893_v62 }
 0x41a   : > { %v6650_v0 = vpop.f32.mrb[40].mxu1 }
 0x41b   : > { %v2024_v33 = vadd.f32 %v6650_v0, %v5768_v44  ;;  %v2018_v45 = vpop.f32.mrb[41].mxu1 }
 0x41c   : > { %v2019_v36 = vadd.f32 %v5768_v44, %v2018_v45 }
 0x41d   : > { %v2098_v29 = vmax.f32 %v2024_v33, 0.0 }
 0x41e   : > { %v2097_v47 = vmax.f32 %v2019_v36, 0.0  ;;  %v6653_v48 = vpop.f32.mrb[42].mxu1 }
 0x41f   : > { %v2034_v49 = vadd.f32 %v6653_v48, %v5768_v44  ;;  %v2028_v58 = vpop.f32.mrb[43].mxu1  ;;  %v5809_v48 = vld [vmem:[%s9245_s2 + $0x158] sm:$0xff] }
 0x420   : > { %v2029_v51 = vadd.f32 %v5768_v44, %v2028_v58  ;;  %6680 = vmatprep.mubr.msk.f32.mxu1 %vm596_vm0, %v2097_v47  ;;  %v5808_v47 = vld [vmem:[%s9245_s2 + $0x150] sm:$0xff] }
 0x421   : > { %6681 = vmatmul.mubr.msk.f32.vlgmr.msra.gmra.mrb[56].mxu1 %vm596_vm0, %v2098_v29  ;;  %v2100_v34 = vmax.f32 %v2034_v49, 0.0  ;;  %v7164_v29 = vpack.c.bf16 %v5809_v48, %v5808_v47  ;;  %v5844_v49 = vld [vmem:[%s9245_s2 + $0x68] sm:$0xff] }
 0x422   : > { %v2099_v8 = vmax.f32 %v2029_v51, 0.0  ;;  %v6656_v35 = vpop.f32.mrb[44].mxu1  ;;  %7171 = vmatpush3.bf16.msra.mxu1 %v8165_v3  ;;  %v8416_v51 = vld [vmem:[%s9246_s3 + $0x8] ss:$0 sm:$0xff] }
 0x423   : > { %v2044_v53 = vadd.f32 %v6656_v35, %v5768_v44  ;;  %v2038_v2 = vpop.f32.mrb[45].mxu1  ;;  %7173 = vmatprep.subr.bf16.mxu1 %v8174_v1  ;;  %7165 = vmatprep.subr.bf16.mxu0 %v7164_v29 }
 0x424   : > { %v2039_v10 = vadd.f32 %v5768_v44, %v2038_v2  ;;  %6683 = vmatprep.mubr.msk.f32.mxu1 %vm596_vm0, %v2099_v8  ;;  %7167 = vmatpush3.bf16.msra.mxu0 %v7164_v29  ;;  %v5845_v2 = vld [vmem:[%s9245_s2 + $0x70] sm:$0xff] }
 0x425   : > { %6684 = vmatmul.mubr.msk.f32.gmra.mrb[58].mxu1 %vm596_vm0, %v2100_v34  ;;  %v2102_v18 = vmax.f32 %v2044_v53, 0.0 }
 0x426   : > { %v2101_v55 = vmax.f32 %v2039_v10, 0.0  ;;  %v6659_v37 = vpop.f32.mrb[46].mxu1  ;;  %7175 = vmatpush3.bf16.msra.mxu1 %v8174_v1  ;;  %v5846_v10 = vld [vmem:[%s9245_s2 + $0x78] sm:$0xff] }
 0x427   : > { %v2054_v57 = vadd.f32 %v6659_v37, %v5768_v44  ;;  %v2048_v59 = vpop.f32.mrb[47].mxu1 }
 0x428   : > { %v2049_v61 = vadd.f32 %v5768_v44, %v2048_v59  ;;  %6686 = vmatprep.mubr.msk.f32.mxu1 %vm596_vm0, %v2101_v55 }
 0x429   : > { %6687 = vmatmul.mubr.msk.f32.gmra.mrb[60].mxu1 %vm596_vm0, %v2102_v18  ;;  %v2104_v21 = vmax.f32 %v2054_v57, 0.0 }
 0x42a   : > { %v2103_v15 = vmax.f32 %v2049_v61, 0.0  ;;  %v6662_v63 = vpop.f32.mrb[48].mxu1  ;;  %v7180_v61 = vpack.c.bf16 %v5846_v10, %v5845_v2 }
 0x42b   : > { %v2064_v4 = vadd.f32 %v6662_v63, %v5768_v44  ;;  %v2058_v7 = vpop.f32.mrb[49].mxu1 }
 0x42c   : > { %v2059_v25 = vadd.f32 %v5768_v44, %v2058_v7  ;;  %6689 = vmatprep.mubr.msk.f32.mxu1 %vm596_vm0, %v2103_v15 }
 0x42d   : > { %6690 = vmatmul.mubr.msk.f32.gmra.mrb[62].mxu1 %vm596_vm0, %v2104_v21  ;;  %v2106_v22 = vmax.f32 %v2064_v4, 0.0 }
 0x42e   : > { %v2105_v11 = vmax.f32 %v2059_v25, 0.0  ;;  %v6665_v16 = vpop.f32.mrb[50].mxu1 }
 0x42f   : > { %v2074_v17 = vadd.f32 %v6665_v16, %v5768_v44  ;;  %v2068_v23 = vpop.f32.mrb[51].mxu1 }
 0x430   : > { %v2069_v27 = vadd.f32 %v5768_v44, %v2068_v23  ;;  %6692 = vmatprep.mubr.msk.f32.mxu1 %vm596_vm0, %v2105_v11 }
 0x431   : > { %6693 = vmatmul.mubr.msk.f32.gmra.mrb[64].mxu1 %vm596_vm0, %v2106_v22  ;;  %v2108_v6 = vmax.f32 %v2074_v17, 0.0 }
 0x432   : > { %v2107_v42 = vmax.f32 %v2069_v27, 0.0  ;;  %v6668_v20 = vpop.f32.mrb[52].mxu1 }
 0x433   : > { %v2084_v13 = vadd.f32 %v6668_v20, %v5768_v44  ;;  %v2078_v39 = vpop.f32.mrb[53].mxu1 }
 0x434   : > { %v2079_v41 = vadd.f32 %v5768_v44, %v2078_v39  ;;  %6695 = vmatprep.mubr.msk.f32.mxu1 %vm596_vm0, %v2107_v42 }
 0x435   : > { %6696 = vmatmul.mubr.msk.f32.gmra.mrb[66].mxu1 %vm596_vm0, %v2108_v6  ;;  %v2110_v32 = vmax.f32 %v2084_v13, 0.0 }
 0x436   : > { %v2109_v62 = vmax.f32 %v2079_v41, 0.0  ;;  %v6671_v14 = vpop.f32.mrb[54].mxu1 }
 0x437   : > { %v2094_v38 = vadd.f32 %v6671_v14, %v5768_v44  ;;  %v2088_v0 = vpop.f32.mrb[55].mxu1 }
 0x438   : > { %v2089_v33 = vadd.f32 %v5768_v44, %v2088_v0  ;;  %6698 = vmatprep.mubr.msk.f32.mxu1 %vm596_vm0, %v2109_v62  ;;  %v5843_v44 = vld [vmem:[%s9245_s2 + $0x60] sm:$0xff] }
 0x439   : > { %6699 = vmatmul.mubr.msk.f32.gmra.mrb[68].mxu1 %vm596_vm0, %v2110_v32  ;;  %v2112_v36 = vmax.f32 %v2094_v38, 0.0  ;;  %v7176_v58 = vpack.c.bf16 %v5844_v49, %v5843_v44 }
 0x43a   : > { %v2111_v45 = vmax.f32 %v2089_v33, 0.0 }
 0x43b   : > { %7177 = vmatprep.subr.bf16.mxu0 %v7176_v58 }
 0x43c   : > { %6701 = vmatprep.mubr.msk.f32.mxu1 %vm596_vm0, %v2111_v45 }
 0x43d   : > { %6702 = vmatmul.mubr.msk.f32.gmra.mrb[70].mxu1 %vm596_vm0, %v2112_v36 }
 0x4f4   : > { %v6682_v8 = vpop.f32.mrb[56].mxu1 }
 0x4f5   : > { %v2243_v35 = vadd.f32 %v6682_v8, %v8416_v51  ;;  %v2237_v34 = vpop.f32.mrb[57].mxu1 }
 0x4f6   : > { %v2238_v53 = vadd.f32 %v8416_v51, %v2237_v34 }
 0x4f7   : > { %v8428_v18 = vmax.f32 %v2243_v35, 0.0 }
 0x4f8   : > { %v8426_v55 = vmax.f32 %v2238_v53, 0.0  ;;  %v6685_v37 = vpop.f32.mrb[58].mxu1 }
 0x4f9   : > { %v2253_v57 = vadd.f32 %v6685_v37, %v8416_v51  ;;  %v2247_v59 = vpop.f32.mrb[59].mxu1 }
 0x4fa   : > { %v2248_v15 = vadd.f32 %v8416_v51, %v2247_v59  ;;  %6712 = vmatprep.mubr.msk.f32.mxu0 %vm596_vm0, %v8426_v55  ;;  %6744 = vmatprep.mubr.msk.f32.mxu1 %vm596_vm0, %v8426_v55  ;;  %v5866_v59 = vld [vmem:[%s9245_s2 + $0xf0] sm:$0xff] }
 0x4fb   : > { %6713 = vmatmul.mubr.msk.f32.vlgmr.msra.gmra.mrb[56].mxu0 %vm596_vm0, %v8428_v18  ;;  %6745 = vmatmul.mubr.msk.f32.vlgmr.msra.gmra.mrb[72].mxu1 %vm596_vm0, %v8428_v18  ;;  %v8442_v4 = vmax.f32 %v2253_v57, 0.0  ;;  %v5865_v57 = vld [vmem:[%s9245_s2 + $0xe8] sm:$0xff] }
 0x4fc   : > { %v8440_v63 = vmax.f32 %v2248_v15, 0.0  ;;  %v6688_v21 = vpop.f32.mrb[60].mxu1  ;;  %7179 = vmatpush3.bf16.msra.mxu0 %v7176_v58  ;;  %v5867_v15 = vld [vmem:[%s9245_s2 + $0xf8] sm:$0xff] }
 0x4fd   : > { %v2263_v7 = vadd.f32 %v6688_v21, %v8416_v51  ;;  %v2257_v25 = vpop.f32.mrb[61].mxu1  ;;  %7181 = vmatprep.subr.bf16.mxu0 %v7180_v61  ;;  %v7188_v21 = vpack.c.bf16 %v5867_v15, %v5866_v59 }
 0x4fe   : > { %v2258_v11 = vadd.f32 %v8416_v51, %v2257_v25  ;;  %6715 = vmatprep.mubr.msk.f32.mxu0 %vm596_vm0, %v8440_v63  ;;  %6747 = vmatprep.mubr.msk.f32.mxu1 %vm596_vm0, %v8440_v63  ;;  %v2567_v25 = vpop.permute.xlu0 %2566 }
 0x4ff   : > { %6716 = vmatmul.mubr.msk.f32.gmra.mrb[58].mxu0 %vm596_vm0, %v8442_v4  ;;  %6748 = vmatmul.mubr.msk.f32.gmra.mrb[74].mxu1 %vm596_vm0, %v8442_v4  ;;  %v8456_v17 = vmax.f32 %v2263_v7, 0.0  ;;  %v2569_v7 = vpop.permute.xlu1 %2568 }
 0x500   : > { %v8454_v16 = vmax.f32 %v2258_v11, 0.0  ;;  %v6691_v22 = vpop.f32.mrb[62].mxu1  ;;  %7183 = vmatpush3.bf16.msra.mxu0 %v7180_v61 }
 0x501   : > { %v2273_v23 = vadd.f32 %v6691_v22, %v8416_v51  ;;  %v2267_v27 = vpop.f32.mrb[63].mxu1 }
 0x502   : > { %v2268_v42 = vadd.f32 %v8416_v51, %v2267_v27  ;;  %6718 = vmatprep.mubr.msk.f32.mxu0 %vm596_vm0, %v8454_v16  ;;  %6750 = vmatprep.mubr.msk.f32.mxu1 %vm596_vm0, %v8454_v16  ;;  %v2571_v22 = vpop.permute.xlu0 %2570 }
 0x503   : > { %6719 = vmatmul.mubr.msk.f32.gmra.mrb[60].mxu0 %vm596_vm0, %v8456_v17  ;;  %6751 = vmatmul.mubr.msk.f32.gmra.mrb[76].mxu1 %vm596_vm0, %v8456_v17  ;;  %v8470_v13 = vmax.f32 %v2273_v23, 0.0  ;;  %v2573_v11 = vpop.permute.xlu1 %2572 }
 0x504   : > { %v8468_v20 = vmax.f32 %v2268_v42, 0.0  ;;  %v6694_v6 = vpop.f32.mrb[64].mxu1 }
 0x505   : > { %v2283_v39 = vadd.f32 %v6694_v6, %v8416_v51  ;;  %v2277_v41 = vpop.f32.mrb[65].mxu1 }
 0x506   : > { %v2278_v62 = vadd.f32 %v8416_v51, %v2277_v41  ;;  %6721 = vmatprep.mubr.msk.f32.mxu0 %vm596_vm0, %v8468_v20  ;;  %6753 = vmatprep.mubr.msk.f32.mxu1 %vm596_vm0, %v8468_v20  ;;  %v2575_v27 = vpop.permute.xlu0 %2574 }
 0x507   : > { %6722 = vmatmul.mubr.msk.f32.gmra.mrb[62].mxu0 %vm596_vm0, %v8470_v13  ;;  %6754 = vmatmul.mubr.msk.f32.gmra.mrb[78].mxu1 %vm596_vm0, %v8470_v13  ;;  %v8484_v38 = vmax.f32 %v2283_v39, 0.0  ;;  %v2577_v23 = vpop.permute.xlu1 %2576 }
 0x508   : > { %v8482_v14 = vmax.f32 %v2278_v62, 0.0  ;;  %v6697_v32 = vpop.f32.mrb[66].mxu1 }
 0x509   : > { %v2293_v0 = vadd.f32 %v6697_v32, %v8416_v51  ;;  %v2287_v33 = vpop.f32.mrb[67].mxu1 }
 0x50a   : > { %v2288_v45 = vadd.f32 %v8416_v51, %v2287_v33  ;;  %6724 = vmatprep.mubr.msk.f32.mxu0 %vm596_vm0, %v8482_v14  ;;  %6756 = vmatprep.mubr.msk.f32.mxu1 %vm596_vm0, %v8482_v14 }
 0x50b   : > { %6725 = vmatmul.mubr.msk.f32.gmra.mrb[64].mxu0 %vm596_vm0, %v8484_v38  ;;  %6757 = vmatmul.mubr.msk.f32.gmra.mrb[80].mxu1 %vm596_vm0, %v8484_v38  ;;  %v8498_v48 = vmax.f32 %v2293_v0, 0.0  ;;  %v2581_v32 = vpop.permute.xlu1 %2580 }
 0x50c   : > { %v8496_v36 = vmax.f32 %v2288_v45, 0.0  ;;  %v6700_v47 = vpop.f32.mrb[68].mxu1  ;;  %v2579_v45 = vpop.permute.xlu0 %2578 }
 0x50d   : > { %v2303_v29 = vadd.f32 %v6700_v47, %v8416_v51  ;;  %v2297_v44 = vpop.f32.mrb[69].mxu1 }
 0x50e   : > { %v2298_v49 = vadd.f32 %v8416_v51, %v2297_v44  ;;  %6727 = vmatprep.mubr.msk.f32.mxu0 %vm596_vm0, %v8496_v36  ;;  %6759 = vmatprep.mubr.msk.f32.mxu1 %vm596_vm0, %v8496_v36 }
 0x50f   : > { %6728 = vmatmul.mubr.msk.f32.gmra.mrb[66].mxu0 %vm596_vm0, %v8498_v48  ;;  %6760 = vmatmul.mubr.msk.f32.gmra.mrb[82].mxu1 %vm596_vm0, %v8498_v48  ;;  %v8512_v35 = vmax.f32 %v2303_v29, 0.0  ;;  %v2585_v59 = vpop.permute.xlu1 %2584 }
 0x510   : > { %v8510_v58 = vmax.f32 %v2298_v49, 0.0  ;;  %v6703_v8 = vpop.f32.mrb[70].mxu1 }
 0x511   : > { %v2313_v34 = vadd.f32 %v6703_v8, %v8416_v51  ;;  %v2307_v53 = vpop.f32.mrb[71].mxu1 }
 0x512   : > { %v2308_v2 = vadd.f32 %v8416_v51, %v2307_v53  ;;  %6730 = vmatprep.mubr.msk.f32.mxu0 %vm596_vm0, %v8510_v58  ;;  %6762 = vmatprep.mubr.msk.f32.mxu1 %vm596_vm0, %v8510_v58  ;;  %v5864_v51 = vld [vmem:[%s9245_s2 + $0xe0] sm:$0xff] }
 0x513   : > { %6731 = vmatmul.mubr.msk.f32.gmra.mrb[68].mxu0 %vm596_vm0, %v8512_v35  ;;  %6763 = vmatmul.mubr.msk.f32.gmra.mrb[84].mxu1 %vm596_vm0, %v8512_v35  ;;  %v8526_v37 = vmax.f32 %v2313_v34, 0.0  ;;  %v7184_v61 = vpack.c.bf16 %v5865_v57, %v5864_v51 }
 0x514   : > { %v8524_v10 = vmax.f32 %v2308_v2, 0.0 }
 0x515   : > { %9260 = vst [vmem:[#allocation7_spill] sm:$0xff] %v8526_v37  ;;  %7185 = vmatprep.subr.bf16.mxu1 %v7184_v61 }
 0x516   : > { %9259 = vst [vmem:[#allocation6_spill] sm:$0xff] %v8524_v10  ;;  %6733 = vmatprep.mubr.msk.f32.mxu0 %vm596_vm0, %v8524_v10  ;;  %6765 = vmatprep.mubr.msk.f32.mxu1 %vm596_vm0, %v8524_v10 }
 0x517   : > { %6734 = vmatmul.mubr.msk.f32.gmra.mrb[70].mxu0 %vm596_vm0, %v8526_v37  ;;  %6766 = vmatmul.mubr.msk.f32.gmra.mrb[86].mxu1 %vm596_vm0, %v8526_v37 }
 0x518   : > { %7187 = vmatpush3.bf16.msra.mxu1 %v7184_v61 }
 0x519   : > { %7189 = vmatprep.subr.bf16.mxu1 %v7188_v21 }
 0x51c   : > { %7191 = vmatpush3.bf16.msra.mxu1 %v7188_v21  ;;  %v2583_v21 = vpop.permute.xlu0 %2582 }
 0x51d   : > { %7201 = vmatprep.subr.bf16.mxu1 %v8165_v3 }
 0x5ce   : > { %v6746_v42 = vpop.f32.mrb[72].mxu1 }
 0x5cf   : > { %v2686_v6 = vadd.f32 %v6746_v42, %v2569_v7  ;;  %v2680_v39 = vpop.f32.mrb[73].mxu1 }
 0x5d0   : > { %v2681_v41 = vadd.f32 %v2680_v39, %v2567_v25 }
 0x5d1   : > { %v2760_v62 = vadd.f32 %v8332_v31, %v2686_v6 }
 0x5d2   : > { %v2759_v0 = vadd.f32 %v8332_v31, %v2681_v41  ;;  %v6749_v33 = vpop.f32.mrb[74].mxu1 }
 0x5d3   : > { %v2696_v47 = vadd.f32 %v6749_v33, %v2573_v11  ;;  %v2690_v29 = vpop.f32.mrb[75].mxu1  ;;  %v2776_v8 = vmax.f32 %v2760_v62, 0.0 }
 0x5d4   : > { %v2775_v44 = vmax.f32 %v2759_v0, 0.0  ;;  %v2691_v49 = vadd.f32 %v2690_v29, %v2571_v22  ;;  %v2589_v0 = vpop.permute.xlu1 %2588 }
 0x5d5   : > { %v2762_v34 = vadd.f32 %v8332_v31, %v2696_v47  ;;  %v2587_v47 = vpop.permute.xlu0 %2586 }
 0x5d6   : > { %v2761_v53 = vadd.f32 %v8332_v31, %v2691_v49  ;;  %v6752_v2 = vpop.f32.mrb[76].mxu1  ;;  %6776 = vmatprep.mubr.msk.f32.mxu0 %vm596_vm0, %v2775_v44 }
 0x5d7   : > { %v2706_v51 = vadd.f32 %v6752_v2, %v2577_v23  ;;  %v2700_v57 = vpop.f32.mrb[77].mxu1  ;;  %6777 = vmatmul.mubr.msk.f32.vlgmr.msra.gmra.mrb[72].mxu0 %vm596_vm0, %v2776_v8  ;;  %v2778_v7 = vmax.f32 %v2762_v34, 0.0 }
 0x5d8   : > { %v2777_v61 = vmax.f32 %v2761_v53, 0.0  ;;  %v2701_v15 = vadd.f32 %v2700_v57, %v2575_v27  ;;  %v2593_v57 = vpop.permute.xlu1 %2592 }
 0x5d9   : > { %v2764_v25 = vadd.f32 %v8332_v31, %v2706_v51 }
 0x5da   : > { %v2763_v11 = vadd.f32 %v8332_v31, %v2701_v15  ;;  %v6755_v22 = vpop.f32.mrb[78].mxu1  ;;  %6779 = vmatprep.mubr.msk.f32.mxu0 %vm596_vm0, %v2777_v61  ;;  %v2591_v15 = vpop.permute.xlu0 %2590 }
 0x5db   : > { %v2716_v42 = vadd.f32 %v6755_v22, %v2581_v32  ;;  %v2710_v6 = vpop.f32.mrb[79].mxu1  ;;  %6780 = vmatmul.mubr.msk.f32.gmra.mrb[74].mxu0 %vm596_vm0, %v2778_v7  ;;  %v2780_v41 = vmax.f32 %v2764_v25, 0.0 }
 0x5dc   : > { %v2779_v23 = vmax.f32 %v2763_v11, 0.0  ;;  %v2711_v39 = vadd.f32 %v2710_v6, %v2579_v45 }
 0x5dd   : > { %v2766_v62 = vadd.f32 %v8332_v31, %v2716_v42 }
 0x5de   : > { %v2765_v27 = vadd.f32 %v8332_v31, %v2711_v39  ;;  %v6758_v33 = vpop.f32.mrb[80].mxu1  ;;  %6782 = vmatprep.mubr.msk.f32.mxu0 %vm596_vm0, %v2779_v23 }
 0x5df   : > { %v2726_v29 = vadd.f32 %v6758_v33, %v2585_v59  ;;  %v2720_v44 = vpop.f32.mrb[81].mxu1  ;;  %6783 = vmatmul.mubr.msk.f32.gmra.mrb[76].mxu0 %vm596_vm0, %v2780_v41  ;;  %v2782_v8 = vmax.f32 %v2766_v62, 0.0  ;;  %v2597_v62 = vpop.permute.xlu1 %2596 }
 0x5e0   : > { %v2781_v32 = vmax.f32 %v2765_v27, 0.0  ;;  %v2721_v49 = vadd.f32 %v2720_v44, %v2583_v21  ;;  %v2595_v33 = vpop.permute.xlu0 %2594 }
 0x5e1   : > { %v2768_v34 = vadd.f32 %v8332_v31, %v2726_v29 }
 0x5e2   : > { %v2767_v45 = vadd.f32 %v8332_v31, %v2721_v49  ;;  %v6761_v53 = vpop.f32.mrb[82].mxu1  ;;  %6785 = vmatprep.mubr.msk.f32.mxu0 %vm596_vm0, %v2781_v32 }
 0x5e3   : > { %v2736_v2 = vadd.f32 %v6761_v53, %v2589_v0  ;;  %v2730_v51 = vpop.f32.mrb[83].mxu1  ;;  %6786 = vmatmul.mubr.msk.f32.gmra.mrb[78].mxu0 %vm596_vm0, %v2782_v8  ;;  %v2784_v7 = vmax.f32 %v2768_v34, 0.0 }
 0x5e4   : > { %v2783_v61 = vmax.f32 %v2767_v45, 0.0  ;;  %v2731_v59 = vadd.f32 %v2730_v51, %v2587_v47  ;;  %v5886_v51 = vld [vmem:[%s9245_s2 + $0x168] sm:$0xff] }
 0x5e5   : > { %v2770_v25 = vadd.f32 %v8332_v31, %v2736_v2  ;;  %v5885_v2 = vld [vmem:[%s9245_s2 + $0x160] sm:$0xff] }
 0x5e6   : > { %v2769_v21 = vadd.f32 %v8332_v31, %v2731_v59  ;;  %v6764_v11 = vpop.f32.mrb[84].mxu1  ;;  %6788 = vmatprep.mubr.msk.f32.mxu0 %vm596_vm0, %v2783_v61 }
 0x5e7   : > { %v2746_v22 = vadd.f32 %v6764_v11, %v2593_v57  ;;  %v2740_v42 = vpop.f32.mrb[85].mxu1  ;;  %6789 = vmatmul.mubr.msk.f32.gmra.mrb[80].mxu0 %vm596_vm0, %v2784_v7  ;;  %v2786_v39 = vmax.f32 %v2770_v25, 0.0  ;;  %v7192_v57 = vpack.c.bf16 %v5886_v51, %v5885_v2 }
 0x5e8   : > { %v2785_v6 = vmax.f32 %v2769_v21, 0.0  ;;  %v2741_v23 = vadd.f32 %v2740_v42, %v2591_v15 }
 0x5e9   : > { %v2772_v41 = vadd.f32 %v8332_v31, %v2746_v22  ;;  %7193 = vmatprep.subr.bf16.mxu0 %v7192_v57 }
 0x5ea   : > { %v2771_v0 = vadd.f32 %v8332_v31, %v2741_v23  ;;  %v6767_v27 = vpop.f32.mrb[86].mxu1  ;;  %6791 = vmatprep.mubr.msk.f32.mxu0 %vm596_vm0, %v2785_v6  ;;  %7195 = vmatpush3.bf16.msra.mxu0 %v7192_v57 }
 0x5eb   : > { %v2756_v47 = vadd.f32 %v6767_v27, %v2597_v62  ;;  %v2750_v29 = vpop.f32.mrb[87].mxu1  ;;  %6792 = vmatmul.mubr.msk.f32.gmra.mrb[82].mxu0 %vm596_vm0, %v2786_v39  ;;  %v2788_v49 = vmax.f32 %v2772_v41, 0.0 }
 0x5ec   : > { %v2787_v44 = vmax.f32 %v2771_v0, 0.0  ;;  %v2751_v32 = vadd.f32 %v2750_v29, %v2595_v33 }
 0x5ed   : > { %v2774_v8 = vadd.f32 %v8332_v31, %v2756_v47 }
 0x5ee   : > { %v2773_v34 = vadd.f32 %v8332_v31, %v2751_v32  ;;  %6794 = vmatprep.mubr.msk.f32.mxu0 %vm596_vm0, %v2787_v44  ;;  %v5847_v31 = vld [vmem:[%s9246_s3 + $0x5] ss:$0 sm:$0xff] }
 0x5ef   : > { %6795 = vmatmul.mubr.msk.f32.gmra.mrb[84].mxu0 %vm596_vm0, %v2788_v49  ;;  %v2790_v53 = vmax.f32 %v2774_v8, 0.0 }
 0x5f0   : > { %v2789_v45 = vmax.f32 %v2773_v34, 0.0 }
 0x5f2   : > { %6797 = vmatprep.mubr.msk.f32.mxu0 %vm596_vm0, %v2789_v45 }
 0x5f3   : > { %6798 = vmatmul.mubr.msk.f32.gmra.mrb[86].mxu0 %vm596_vm0, %v2790_v53 }
 0x6aa   : > { %v6778_v61 = vpop.f32.mrb[72].mxu0 }
 0x6ab   : > { %v2921_v59 = vadd.f32 %v6778_v61, %v5847_v31  ;;  %v2915_v15 = vpop.f32.mrb[73].mxu0 }
 0x6ac   : > { %v2916_v7 = vadd.f32 %v5847_v31, %v2915_v15 }
 0x6ad   : > { %v2995_v11 = vmax.f32 %v2921_v59, 0.0 }
 0x6ae   : > { %v2994_v25 = vmax.f32 %v2916_v7, 0.0  ;;  %v6781_v21 = vpop.f32.mrb[74].mxu0 }
 0x6af   : > { %v2931_v22 = vadd.f32 %v6781_v21, %v5847_v31  ;;  %v2925_v42 = vpop.f32.mrb[75].mxu0 }
 0x6b0   : > { %v2926_v6 = vadd.f32 %v5847_v31, %v2925_v42  ;;  %6808 = vmatprep.mubr.msk.f32.mxu1 %vm596_vm0, %v2994_v25 }
 0x6b1   : > { %6809 = vmatmul.mubr.msk.f32.vlgmr.msra.gmra.mrb[88].mxu1 %vm596_vm0, %v2995_v11  ;;  %v2997_v41 = vmax.f32 %v2931_v22, 0.0 }
 0x6b2   : > { %v2996_v23 = vmax.f32 %v2926_v6, 0.0  ;;  %v6784_v39 = vpop.f32.mrb[76].mxu0  ;;  %7203 = vmatpush3.bf16.msra.mxu1 %v8165_v3 }
 0x6b3   : > { %v2941_v62 = vadd.f32 %v6784_v39, %v5847_v31  ;;  %v2935_v0 = vpop.f32.mrb[77].mxu0  ;;  %7205 = vmatprep.subr.bf16.mxu1 %v8174_v1 }
 0x6b4   : > { %v2936_v27 = vadd.f32 %v5847_v31, %v2935_v0  ;;  %6811 = vmatprep.mubr.msk.f32.mxu1 %vm596_vm0, %v2996_v23 }
 0x6b5   : > { %6812 = vmatmul.mubr.msk.f32.gmra.mrb[90].mxu1 %vm596_vm0, %v2997_v41  ;;  %v2999_v29 = vmax.f32 %v2941_v62, 0.0 }
 0x6b6   : > { %v2998_v33 = vmax.f32 %v2936_v27, 0.0  ;;  %v6787_v47 = vpop.f32.mrb[78].mxu0  ;;  %7207 = vmatpush3.bf16.msra.mxu1 %v8174_v1 }
 0x6b7   : > { %v2951_v44 = vadd.f32 %v6787_v47, %v5847_v31  ;;  %v2945_v32 = vpop.f32.mrb[79].mxu0 }
 0x6b8   : > { %v2946_v49 = vadd.f32 %v5847_v31, %v2945_v32  ;;  %6814 = vmatprep.mubr.msk.f32.mxu1 %vm596_vm0, %v2998_v33  ;;  %v5888_v32 = vld [vmem:[%s9245_s2 + $0x178] sm:$0xff] }
 0x6b9   : > { %6815 = vmatmul.mubr.msk.f32.gmra.mrb[92].mxu1 %vm596_vm0, %v2999_v29  ;;  %v3001_v45 = vmax.f32 %v2951_v44, 0.0  ;;  %v5887_v44 = vld [vmem:[%s9245_s2 + $0x170] sm:$0xff] }
 0x6ba   : > { %v3000_v8 = vmax.f32 %v2946_v49, 0.0  ;;  %v6790_v34 = vpop.f32.mrb[80].mxu0  ;;  %v7196_v49 = vpack.c.bf16 %v5888_v32, %v5887_v44 }
 0x6bb   : > { %v2961_v53 = vadd.f32 %v6790_v34, %v5847_v31  ;;  %v2955_v2 = vpop.f32.mrb[81].mxu0 }
 0x6bc   : > { %v2956_v51 = vadd.f32 %v5847_v31, %v2955_v2  ;;  %6817 = vmatprep.mubr.msk.f32.mxu1 %vm596_vm0, %v3000_v8  ;;  %7197 = vmatprep.subr.bf16.mxu0 %v7196_v49 }
 0x6bd   : > { %6818 = vmatmul.mubr.msk.f32.gmra.mrb[94].mxu1 %vm596_vm0, %v3001_v45  ;;  %v3003_v59 = vmax.f32 %v2961_v53, 0.0  ;;  %7199 = vmatpush3.bf16.msra.mxu0 %v7196_v49 }
 0x6be   : > { %v3002_v57 = vmax.f32 %v2956_v51, 0.0  ;;  %v6793_v61 = vpop.f32.mrb[82].mxu0 }
 0x6bf   : > { %v2971_v15 = vadd.f32 %v6793_v61, %v5847_v31  ;;  %v2965_v7 = vpop.f32.mrb[83].mxu0 }
 0x6c0   : > { %v2966_v25 = vadd.f32 %v5847_v31, %v2965_v7  ;;  %6820 = vmatprep.mubr.msk.f32.mxu1 %vm596_vm0, %v3002_v57 }
 0x6c1   : > { %6821 = vmatmul.mubr.msk.f32.gmra.mrb[96].mxu1 %vm596_vm0, %v3003_v59  ;;  %v3005_v22 = vmax.f32 %v2971_v15, 0.0 }
 0x6c2   : > { %v3004_v21 = vmax.f32 %v2966_v25, 0.0  ;;  %v6796_v11 = vpop.f32.mrb[84].mxu0 }
 0x6c3   : > { %v2981_v42 = vadd.f32 %v6796_v11, %v5847_v31  ;;  %v2975_v6 = vpop.f32.mrb[85].mxu0 }
 0x6c4   : > { %v2976_v23 = vadd.f32 %v5847_v31, %v2975_v6  ;;  %6823 = vmatprep.mubr.msk.f32.mxu1 %vm596_vm0, %v3004_v21 }
 0x6c5   : > { %6824 = vmatmul.mubr.msk.f32.gmra.mrb[98].mxu1 %vm596_vm0, %v3005_v22  ;;  %v3007_v62 = vmax.f32 %v2981_v42, 0.0 }
 0x6c6   : > { %v3006_v39 = vmax.f32 %v2976_v23, 0.0  ;;  %v6799_v41 = vpop.f32.mrb[86].mxu0 }
 0x6c7   : > { %v2991_v0 = vadd.f32 %v6799_v41, %v5847_v31  ;;  %v2985_v27 = vpop.f32.mrb[87].mxu0 }
 0x6c8   : > { %v2986_v33 = vadd.f32 %v5847_v31, %v2985_v27  ;;  %6826 = vmatprep.mubr.msk.f32.mxu1 %vm596_vm0, %v3006_v39  ;;  %v8618_v31 = vld [vmem:[%s9246_s3 + $0x9] ss:$0 sm:$0xff] }
 0x6c9   : > { %6827 = vmatmul.mubr.msk.f32.gmra.mrb[100].mxu1 %vm596_vm0, %v3007_v62  ;;  %v3009_v29 = vmax.f32 %v2991_v0, 0.0 }
 0x6ca   : > { %v3008_v47 = vmax.f32 %v2986_v33, 0.0 }
 0x6cc   : > { %6829 = vmatprep.mubr.msk.f32.mxu1 %vm596_vm0, %v3008_v47 }
 0x6cd   : > { %6830 = vmatmul.mubr.msk.f32.gmra.mrb[102].mxu1 %vm596_vm0, %v3009_v29 }
 0x784   : > { %v6810_v8 = vpop.f32.mrb[88].mxu1 }
 0x785   : > { %v3140_v34 = vadd.f32 %v6810_v8, %v8618_v31  ;;  %v3134_v45 = vpop.f32.mrb[89].mxu1 }
 0x786   : > { %v3135_v53 = vadd.f32 %v8618_v31, %v3134_v45 }
 0x787   : > { %v3214_v2 = vmax.f32 %v3140_v34, 0.0 }
 0x788   : > { %v3213_v51 = vmax.f32 %v3135_v53, 0.0  ;;  %v6813_v57 = vpop.f32.mrb[90].mxu1 }
 0x789   : > { %v3150_v61 = vadd.f32 %v6813_v57, %v8618_v31  ;;  %5231 = vrot.lane.b32.xlu1 %v3214_v2, %s7513_s28  ;;  %v3144_v59 = vpop.f32.mrb[91].mxu1  ;;  %v5923_v57 = vld [vmem:[%s9245_s2 + $0x90] sm:$0xff] }
 0x78a   : > { %v3145_v15 = vadd.f32 %v8618_v31, %v3144_v59  ;;  %5229 = vrot.lane.b32.xlu0 %v3213_v51, %s7513_s28  ;;  %6840 = vmatprep.mubr.msk.f32.mxu0 %vm596_vm0, %v3213_v51 }
 0x78b   : > { %v3216_v7 = vmax.f32 %v3150_v61, 0.0  ;;  %6872 = vmatprep.mubr.msk.f32.mxu1 %vm596_vm0, %v3213_v51  ;;  %6841 = vmatmul.mubr.msk.f32.vlgmr.msra.gmra.mrb[56].mxu0 %vm596_vm0, %v3214_v2  ;;  %v5922_v51 = vld [vmem:[%s9245_s2 + $0x88] sm:$0xff] }
 0x78c   : > { %v3215_v25 = vmax.f32 %v3145_v15, 0.0  ;;  %6873 = vmatmul.mubr.msk.f32.vlgmr.msra.gmra.mrb[104].mxu1 %vm596_vm0, %v3214_v2  ;;  %v6816_v21 = vpop.f32.mrb[92].mxu1  ;;  %v5921_v2 = vld [vmem:[%s9245_s2 + $0x80] sm:$0xff]  ;;  %v5924_v15 = vld [vmem:[%s9245_s2 + $0x98] sm:$0xff] }
 0x78d   : > { %v3160_v11 = vadd.f32 %v6816_v21, %v8618_v31  ;;  %5235 = vrot.lane.b32.xlu1 %v3216_v7, %s7513_s28  ;;  %v3154_v22 = vpop.f32.mrb[93].mxu1  ;;  %v7208_v59 = vpack.c.bf16 %v5922_v51, %v5921_v2 }
 0x78e   : > { %v3155_v42 = vadd.f32 %v8618_v31, %v3154_v22  ;;  %5233 = vrot.lane.b32.xlu0 %v3215_v25, %s7513_s28  ;;  %6843 = vmatprep.mubr.msk.f32.mxu0 %vm596_vm0, %v3215_v25 }
 0x78f   : > { %v3218_v6 = vmax.f32 %v3160_v11, 0.0  ;;  %6875 = vmatprep.mubr.msk.f32.mxu1 %vm596_vm0, %v3215_v25  ;;  %6844 = vmatmul.mubr.msk.f32.gmra.mrb[58].mxu0 %vm596_vm0, %v3216_v7  ;;  %v7212_v11 = vpack.c.bf16 %v5924_v15, %v5923_v57 }
 0x790   : > { %v3217_v23 = vmax.f32 %v3155_v42, 0.0  ;;  %6876 = vmatmul.mubr.msk.f32.gmra.mrb[106].mxu1 %vm596_vm0, %v3216_v7  ;;  %v6819_v39 = vpop.f32.mrb[94].mxu1  ;;  %7209 = vmatprep.subr.bf16.mxu0 %v7208_v59 }
 0x791   : > { %v3170_v41 = vadd.f32 %v6819_v39, %v8618_v31  ;;  %5239 = vrot.lane.b32.xlu1 %v3218_v6, %s7513_s28  ;;  %v3164_v62 = vpop.f32.mrb[95].mxu1  ;;  %7211 = vmatpush3.bf16.msra.mxu0 %v7208_v59 }
 0x792   : > { %v3165_v0 = vadd.f32 %v8618_v31, %v3164_v62  ;;  %5237 = vrot.lane.b32.xlu0 %v3217_v23, %s7513_s28  ;;  %6846 = vmatprep.mubr.msk.f32.mxu0 %vm596_vm0, %v3217_v23 }
 0x793   : > { %v3220_v27 = vmax.f32 %v3170_v41, 0.0  ;;  %6878 = vmatprep.mubr.msk.f32.mxu1 %vm596_vm0, %v3217_v23  ;;  %6847 = vmatmul.mubr.msk.f32.gmra.mrb[60].mxu0 %vm596_vm0, %v3218_v6 }
 0x794   : > { %v3219_v33 = vmax.f32 %v3165_v0, 0.0  ;;  %6879 = vmatmul.mubr.msk.f32.gmra.mrb[108].mxu1 %vm596_vm0, %v3218_v6  ;;  %v6822_v47 = vpop.f32.mrb[96].mxu1  ;;  %7213 = vmatprep.subr.bf16.mxu0 %v7212_v11 }
 0x795   : > { %v3180_v29 = vadd.f32 %v6822_v47, %v8618_v31  ;;  %5243 = vrot.lane.b32.xlu1 %v3220_v27, %s7513_s28  ;;  %v3174_v44 = vpop.f32.mrb[97].mxu1  ;;  %7215 = vmatpush3.bf16.msra.mxu0 %v7212_v11 }
 0x796   : > { %v3175_v32 = vadd.f32 %v8618_v31, %v3174_v44  ;;  %5241 = vrot.lane.b32.xlu0 %v3219_v33, %s7513_s28  ;;  %6849 = vmatprep.mubr.msk.f32.mxu0 %vm596_vm0, %v3219_v33  ;;  %v5944_v44 = vld [vmem:[%s9245_s2 + $0x110] sm:$0xff] }
 0x797   : > { %v3222_v49 = vmax.f32 %v3180_v29, 0.0  ;;  %6881 = vmatprep.mubr.msk.f32.mxu1 %vm596_vm0, %v3219_v33  ;;  %6850 = vmatmul.mubr.msk.f32.gmra.mrb[62].mxu0 %vm596_vm0, %v3220_v27  ;;  %v5943_v29 = vld [vmem:[%s9245_s2 + $0x108] sm:$0xff] }
 0x798   : > { %v3221_v8 = vmax.f32 %v3175_v32, 0.0  ;;  %6882 = vmatmul.mubr.msk.f32.gmra.mrb[110].mxu1 %vm596_vm0, %v3220_v27  ;;  %v6825_v34 = vpop.f32.mrb[98].mxu1 }
 0x799   : > { %v3190_v45 = vadd.f32 %v6825_v34, %v8618_v31  ;;  %5247 = vrot.lane.b32.xlu1 %v3222_v49, %s7513_s28  ;;  %v3184_v53 = vpop.f32.mrb[99].mxu1  ;;  %v3462_v34 = vpop.permute.xlu1 %3461 }
 0x79a   : > { %v3185_v61 = vadd.f32 %v8618_v31, %v3184_v53  ;;  %5245 = vrot.lane.b32.xlu0 %v3221_v8, %s7513_s28  ;;  %6852 = vmatprep.mubr.msk.f32.mxu0 %vm596_vm0, %v3221_v8 }
 0x79b   : > { %v3224_v7 = vmax.f32 %v3190_v45, 0.0  ;;  %6884 = vmatprep.mubr.msk.f32.mxu1 %vm596_vm0, %v3221_v8  ;;  %6853 = vmatmul.mubr.msk.f32.gmra.mrb[64].mxu0 %vm596_vm0, %v3222_v49  ;;  %v3460_v45 = vpop.permute.xlu0 %3459 }
 0x79c   : > { %v3223_v25 = vmax.f32 %v3185_v61, 0.0  ;;  %6885 = vmatmul.mubr.msk.f32.gmra.mrb[112].mxu1 %vm596_vm0, %v3222_v49  ;;  %v6828_v21 = vpop.f32.mrb[100].mxu1  ;;  %v5945_v49 = vld [vmem:[%s9245_s2 + $0x118] sm:$0xff] }
 0x79d   : > { %v3200_v22 = vadd.f32 %v6828_v21, %v8618_v31  ;;  %5251 = vrot.lane.b32.xlu1 %v3224_v7, %s7513_s28  ;;  %v3194_v42 = vpop.f32.mrb[101].mxu1  ;;  %v7220_v8 = vpack.c.bf16 %v5945_v49, %v5944_v44  ;;  %v3466_v53 = vpop.permute.xlu1 %3465 }
 0x79e   : > { %v3195_v6 = vadd.f32 %v8618_v31, %v3194_v42  ;;  %5249 = vrot.lane.b32.xlu0 %v3223_v25, %s7513_s28  ;;  %6855 = vmatprep.mubr.msk.f32.mxu0 %vm596_vm0, %v3223_v25 }
 0x79f   : > { %v3226_v23 = vmax.f32 %v3200_v22, 0.0  ;;  %6887 = vmatprep.mubr.msk.f32.mxu1 %vm596_vm0, %v3223_v25  ;;  %6856 = vmatmul.mubr.msk.f32.gmra.mrb[66].mxu0 %vm596_vm0, %v3224_v7  ;;  %v3464_v2 = vpop.permute.xlu0 %3463  ;;  %v8712_v25 = vld [vmem:[%s9246_s3 + $0x3] ss:$0 sm:$0xff] }
 0x7a0   : > { %v3225_v39 = vmax.f32 %v3195_v6, 0.0  ;;  %6888 = vmatmul.mubr.msk.f32.gmra.mrb[114].mxu1 %vm596_vm0, %v3224_v7  ;;  %v6831_v41 = vpop.f32.mrb[102].mxu1 }
 0x7a1   : > { %v3210_v62 = vadd.f32 %v6831_v41, %v8618_v31  ;;  %5255 = vrot.lane.b32.xlu1 %v3226_v23, %s7513_s28  ;;  %v3204_v0 = vpop.f32.mrb[103].mxu1  ;;  %v3470_v51 = vpop.permute.xlu1 %3469 }
 0x7a2   : > { %v3205_v27 = vadd.f32 %v8618_v31, %v3204_v0  ;;  %5253 = vrot.lane.b32.xlu0 %v3225_v39, %s7513_s28  ;;  %6858 = vmatprep.mubr.msk.f32.mxu0 %vm596_vm0, %v3225_v39  ;;  %v5942_v31 = vld [vmem:[%s9245_s2 + $0x100] sm:$0xff] }
 0x7a3   : > { %v3228_v33 = vmax.f32 %v3210_v62, 0.0  ;;  %6890 = vmatprep.mubr.msk.f32.mxu1 %vm596_vm0, %v3225_v39  ;;  %6859 = vmatmul.mubr.msk.f32.gmra.mrb[68].mxu0 %vm596_vm0, %v3226_v23  ;;  %v7216_v32 = vpack.c.bf16 %v5943_v29, %v5942_v31  ;;  %v3468_v57 = vpop.permute.xlu0 %3467 }
 0x7a4   : > { %v3227_v47 = vmax.f32 %v3205_v27, 0.0  ;;  %6891 = vmatmul.mubr.msk.f32.gmra.mrb[116].mxu1 %vm596_vm0, %v3226_v23 }
 0x7a5   : > { %5259 = vrot.lane.b32.xlu1 %v3228_v33, %s7513_s28  ;;  %7217 = vmatprep.subr.bf16.mxu1 %v7216_v32  ;;  %v3474_v11 = vpop.permute.xlu1 %3473 }
 0x7a6   : > { %5257 = vrot.lane.b32.xlu0 %v3227_v47, %s7513_s28  ;;  %6861 = vmatprep.mubr.msk.f32.mxu0 %vm596_vm0, %v3227_v47 }
 0x7a7   : > { %6893 = vmatprep.mubr.msk.f32.mxu1 %vm596_vm0, %v3227_v47  ;;  %6862 = vmatmul.mubr.msk.f32.gmra.mrb[70].mxu0 %vm596_vm0, %v3228_v33  ;;  %v3472_v6 = vpop.permute.xlu0 %3471 }
 0x7a8   : > { %6894 = vmatmul.mubr.msk.f32.gmra.mrb[118].mxu1 %vm596_vm0, %v3228_v33 }
 0x7a9   : > { %7219 = vmatpush3.bf16.msra.mxu1 %v7216_v32  ;;  %v3478_v44 = vpop.permute.xlu1 %3477 }
 0x7aa   : > { %7221 = vmatprep.subr.bf16.mxu1 %v7220_v8 }
 0x7ad   : > { %7223 = vmatpush3.bf16.msra.mxu1 %v7220_v8  ;;  %v3476_v8 = vpop.permute.xlu0 %3475 }
 0x7ae   : > { %7233 = vmatprep.subr.bf16.mxu1 %v8165_v3 }
 0x85f   : > { %v6874_v61 = vpop.f32.mrb[104].mxu1 }
 0x860   : > { %v3579_v59 = vadd.f32 %v6874_v61, %v3462_v34  ;;  %v3573_v15 = vpop.f32.mrb[105].mxu1 }
 0x861   : > { %v3574_v7 = vadd.f32 %v3573_v15, %v3460_v45 }
 0x862   : > { %v3653_v21 = vadd.f32 %v8712_v25, %v3579_v59 }
 0x863   : > { %v3652_v22 = vadd.f32 %v8712_v25, %v3574_v7  ;;  %v6877_v42 = vpop.f32.mrb[106].mxu1 }
 0x864   : > { %v3589_v23 = vadd.f32 %v6877_v42, %v3466_v53  ;;  %v3583_v39 = vpop.f32.mrb[107].mxu1  ;;  %v3669_v0 = vmax.f32 %v3653_v21, 0.0 }
 0x865   : > { %v3668_v41 = vmax.f32 %v3652_v22, 0.0  ;;  %v3584_v62 = vadd.f32 %v3583_v39, %v3464_v2  ;;  %v3482_v22 = vpop.permute.xlu1 %3481 }
 0x866   : > { %v3655_v27 = vadd.f32 %v8712_v25, %v3589_v23  ;;  %v3480_v23 = vpop.permute.xlu0 %3479 }
 0x867   : > { %v3654_v33 = vadd.f32 %v8712_v25, %v3584_v62  ;;  %v6880_v47 = vpop.f32.mrb[108].mxu1  ;;  %6904 = vmatprep.mubr.msk.f32.mxu0 %vm596_vm0, %v3668_v41 }
 0x868   : > { %v3599_v31 = vadd.f32 %v6880_v47, %v3470_v51  ;;  %v3593_v29 = vpop.f32.mrb[109].mxu1  ;;  %6905 = vmatmul.mubr.msk.f32.vlgmr.msra.gmra.mrb[88].mxu0 %vm596_vm0, %v3669_v0  ;;  %v3671_v34 = vmax.f32 %v3655_v27, 0.0 }
 0x869   : > { %v3670_v32 = vmax.f32 %v3654_v33, 0.0  ;;  %v3594_v49 = vadd.f32 %v3593_v29, %v3468_v57  ;;  %v3486_v29 = vpop.permute.xlu1 %3485 }
 0x86a   : > { %v3657_v45 = vadd.f32 %v8712_v25, %v3599_v31 }
 0x86b   : > { %v3656_v53 = vadd.f32 %v8712_v25, %v3594_v49  ;;  %v6883_v2 = vpop.f32.mrb[110].mxu1  ;;  %6907 = vmatprep.mubr.msk.f32.mxu0 %vm596_vm0, %v3670_v32  ;;  %v3484_v49 = vpop.permute.xlu0 %3483 }
 0x86c   : > { %v3609_v61 = vadd.f32 %v6883_v2, %v3474_v11  ;;  %v3603_v59 = vpop.f32.mrb[111].mxu1  ;;  %6908 = vmatmul.mubr.msk.f32.gmra.mrb[90].mxu0 %vm596_vm0, %v3671_v34  ;;  %v3673_v7 = vmax.f32 %v3657_v45, 0.0 }
 0x86d   : > { %v3672_v51 = vmax.f32 %v3656_v53, 0.0  ;;  %v3604_v15 = vadd.f32 %v3603_v59, %v3472_v6 }
 0x86e   : > { %v3659_v21 = vadd.f32 %v8712_v25, %v3609_v61 }
 0x86f   : > { %v3658_v57 = vadd.f32 %v8712_v25, %v3604_v15  ;;  %v6886_v42 = vpop.f32.mrb[112].mxu1  ;;  %6910 = vmatprep.mubr.msk.f32.mxu0 %vm596_vm0, %v3672_v51 }
 0x870   : > { %v3619_v39 = vadd.f32 %v6886_v42, %v3478_v44  ;;  %v3613_v41 = vpop.f32.mrb[113].mxu1  ;;  %6911 = vmatmul.mubr.msk.f32.gmra.mrb[92].mxu0 %vm596_vm0, %v3673_v7  ;;  %v3675_v0 = vmax.f32 %v3659_v21, 0.0  ;;  %v3490_v21 = vpop.permute.xlu1 %3489 }
 0x871   : > { %v3674_v11 = vmax.f32 %v3658_v57, 0.0  ;;  %v3614_v62 = vadd.f32 %v3613_v41, %v3476_v8  ;;  %v3488_v42 = vpop.permute.xlu0 %3487 }
 0x872   : > { %v3661_v27 = vadd.f32 %v8712_v25, %v3619_v39 }
 0x873   : > { %v3660_v6 = vadd.f32 %v8712_v25, %v3614_v62  ;;  %v6889_v33 = vpop.f32.mrb[114].mxu1  ;;  %6913 = vmatprep.mubr.msk.f32.mxu0 %vm596_vm0, %v3674_v11 }
 0x874   : > { %v3629_v47 = vadd.f32 %v6889_v33, %v3482_v22  ;;  %v3623_v31 = vpop.f32.mrb[115].mxu1  ;;  %6914 = vmatmul.mubr.msk.f32.gmra.mrb[94].mxu0 %vm596_vm0, %v3675_v0  ;;  %v3677_v34 = vmax.f32 %v3661_v27, 0.0 }
 0x875   : > { %v3676_v32 = vmax.f32 %v3660_v6, 0.0  ;;  %v3624_v44 = vadd.f32 %v3623_v31, %v3480_v23  ;;  %v5964_v31 = vld [vmem:[%s9245_s2 + $0x188] sm:$0xff] }
 0x876   : > { %v3663_v45 = vadd.f32 %v8712_v25, %v3629_v47  ;;  %v5963_v47 = vld [vmem:[%s9245_s2 + $0x180] sm:$0xff] }
 0x877   : > { %v3662_v8 = vadd.f32 %v8712_v25, %v3624_v44  ;;  %v6892_v53 = vpop.f32.mrb[116].mxu1  ;;  %6916 = vmatprep.mubr.msk.f32.mxu0 %vm596_vm0, %v3676_v32  ;;  %v5925_v32 = vld [vmem:[%s9246_s3 + $0x6] ss:$0 sm:$0xff] }
 0x878   : > { %v3639_v2 = vadd.f32 %v6892_v53, %v3486_v29  ;;  %v3633_v61 = vpop.f32.mrb[117].mxu1  ;;  %6917 = vmatmul.mubr.msk.f32.gmra.mrb[96].mxu0 %vm596_vm0, %v3677_v34  ;;  %v3679_v15 = vmax.f32 %v3663_v45, 0.0  ;;  %v7224_v29 = vpack.c.bf16 %v5964_v31, %v5963_v47 }
 0x879   : > { %v3678_v59 = vmax.f32 %v3662_v8, 0.0  ;;  %v3634_v51 = vadd.f32 %v3633_v61, %v3484_v49 }
 0x87a   : > { %v3665_v7 = vadd.f32 %v8712_v25, %v3639_v2  ;;  %7225 = vmatprep.subr.bf16.mxu0 %v7224_v29 }
 0x87b   : > { %v3664_v22 = vadd.f32 %v8712_v25, %v3634_v51  ;;  %v6895_v57 = vpop.f32.mrb[118].mxu1  ;;  %6919 = vmatprep.mubr.msk.f32.mxu0 %vm596_vm0, %v3678_v59  ;;  %7227 = vmatpush3.bf16.msra.mxu0 %v7224_v29 }
 0x87c   : > { %v3649_v23 = vadd.f32 %v6895_v57, %v3490_v21  ;;  %v3643_v39 = vpop.f32.mrb[119].mxu1  ;;  %6920 = vmatmul.mubr.msk.f32.gmra.mrb[98].mxu0 %vm596_vm0, %v3679_v15  ;;  %v3681_v62 = vmax.f32 %v3665_v7, 0.0 }
 0x87d   : > { %v3680_v41 = vmax.f32 %v3664_v22, 0.0  ;;  %v3644_v11 = vadd.f32 %v3643_v39, %v3488_v42 }
 0x87e   : > { %v3667_v0 = vadd.f32 %v8712_v25, %v3649_v23 }
 0x87f   : > { %v3666_v27 = vadd.f32 %v8712_v25, %v3644_v11  ;;  %6922 = vmatprep.mubr.msk.f32.mxu0 %vm596_vm0, %v3680_v41 }
 0x880   : > { %6923 = vmatmul.mubr.msk.f32.gmra.mrb[100].mxu0 %vm596_vm0, %v3681_v62  ;;  %v3683_v33 = vmax.f32 %v3667_v0, 0.0 }
 0x881   : > { %v3682_v6 = vmax.f32 %v3666_v27, 0.0 }
 0x883   : > { %6925 = vmatprep.mubr.msk.f32.mxu0 %vm596_vm0, %v3682_v6 }
 0x884   : > { %6926 = vmatmul.mubr.msk.f32.gmra.mrb[102].mxu0 %vm596_vm0, %v3683_v33 }
 0x93b   : > { %v6906_v44 = vpop.f32.mrb[88].mxu0 }
 0x93c   : > { %v3814_v49 = vadd.f32 %v6906_v44, %v5925_v32  ;;  %v3808_v34 = vpop.f32.mrb[89].mxu0 }
 0x93d   : > { %v3809_v45 = vadd.f32 %v5925_v32, %v3808_v34 }
 0x93e   : > { %v3888_v2 = vmax.f32 %v3814_v49, 0.0 }
 0x93f   : > { %v3887_v8 = vmax.f32 %v3809_v45, 0.0  ;;  %v6909_v53 = vpop.f32.mrb[90].mxu0 }
 0x940   : > { %v3824_v61 = vadd.f32 %v6909_v53, %v5925_v32  ;;  %v3818_v59 = vpop.f32.mrb[91].mxu0 }
 0x941   : > { %v3819_v51 = vadd.f32 %v5925_v32, %v3818_v59  ;;  %6936 = vmatprep.mubr.msk.f32.mxu1 %vm596_vm0, %v3887_v8 }
 0x942   : > { %6937 = vmatmul.mubr.msk.f32.vlgmr.msra.gmra.mrb[120].mxu1 %vm596_vm0, %v3888_v2  ;;  %v3890_v21 = vmax.f32 %v3824_v61, 0.0 }
 0x943   : > { %v3889_v15 = vmax.f32 %v3819_v51, 0.0  ;;  %v6912_v7 = vpop.f32.mrb[92].mxu0  ;;  %7235 = vmatpush3.bf16.msra.mxu1 %v8165_v3 }
 0x944   : > { %v3834_v22 = vadd.f32 %v6912_v7, %v5925_v32  ;;  %v3828_v57 = vpop.f32.mrb[93].mxu0  ;;  %7237 = vmatprep.subr.bf16.mxu1 %v8174_v1 }
 0x945   : > { %v3829_v42 = vadd.f32 %v5925_v32, %v3828_v57  ;;  %6939 = vmatprep.mubr.msk.f32.mxu1 %vm596_vm0, %v3889_v15 }
 0x946   : > { %6940 = vmatmul.mubr.msk.f32.gmra.mrb[122].mxu1 %vm596_vm0, %v3890_v21  ;;  %v3892_v41 = vmax.f32 %v3834_v22, 0.0 }
 0x947   : > { %v3891_v23 = vmax.f32 %v3829_v42, 0.0  ;;  %v6915_v39 = vpop.f32.mrb[94].mxu0  ;;  %7239 = vmatpush3.bf16.msra.mxu1 %v8174_v1 }
 0x948   : > { %v3844_v11 = vadd.f32 %v6915_v39, %v5925_v32  ;;  %v3838_v62 = vpop.f32.mrb[95].mxu0 }
 0x949   : > { %v3839_v0 = vadd.f32 %v5925_v32, %v3838_v62  ;;  %6942 = vmatprep.mubr.msk.f32.mxu1 %vm596_vm0, %v3891_v23 }
 0x94a   : > { %6943 = vmatmul.mubr.msk.f32.gmra.mrb[124].mxu1 %vm596_vm0, %v3892_v41  ;;  %v3894_v6 = vmax.f32 %v3844_v11, 0.0  ;;  %v5965_v41 = vld [vmem:[%s9245_s2 + $0x190] sm:$0xff]  ;;  %v5966_v11 = vld [vmem:[%s9245_s2 + $0x198] sm:$0xff] }
 0x94b   : > { %v3893_v3 = vmax.f32 %v3839_v0, 0.0  ;;  %v6918_v27 = vpop.f32.mrb[96].mxu0  ;;  %v7228_v62 = vpack.c.bf16 %v5966_v11, %v5965_v41 }
 0x94c   : > { %v3854_v33 = vadd.f32 %v6918_v27, %v5925_v32  ;;  %v3848_v47 = vpop.f32.mrb[97].mxu0 }
 0x94d   : > { %v3849_v31 = vadd.f32 %v5925_v32, %v3848_v47  ;;  %6945 = vmatprep.mubr.msk.f32.mxu1 %vm596_vm0, %v3893_v3  ;;  %7229 = vmatprep.subr.bf16.mxu0 %v7228_v62 }
 0x94e   : > { %6946 = vmatmul.mubr.msk.f32.gmra.mrb[126].mxu1 %vm596_vm0, %v3894_v6  ;;  %v3896_v44 = vmax.f32 %v3854_v33, 0.0  ;;  %7231 = vmatpush3.bf16.msra.mxu0 %v7228_v62 }
 0x94f   : > { %v3895_v29 = vmax.f32 %v3849_v31, 0.0  ;;  %v6921_v1 = vpop.f32.mrb[98].mxu0 }
 0x950   : > { %v3864_v49 = vadd.f32 %v6921_v1, %v5925_v32  ;;  %v3858_v34 = vpop.f32.mrb[99].mxu0 }
 0x951   : > { %v3859_v45 = vadd.f32 %v5925_v32, %v3858_v34  ;;  %6948 = vmatprep.mubr.msk.f32.mxu1 %vm596_vm0, %v3895_v29 }
 0x952   : > { %6949 = vmatmul.mubr.msk.f32.gmra.mrb[128].mxu1 %vm596_vm0, %v3896_v44  ;;  %v3898_v2 = vmax.f32 %v3864_v49, 0.0 }
 0x953   : > { %v3897_v8 = vmax.f32 %v3859_v45, 0.0  ;;  %v6924_v53 = vpop.f32.mrb[100].mxu0 }
 0x954   : > { %v3874_v61 = vadd.f32 %v6924_v53, %v5925_v32  ;;  %v3868_v59 = vpop.f32.mrb[101].mxu0 }
 0x955   : > { %v3869_v51 = vadd.f32 %v5925_v32, %v3868_v59  ;;  %6951 = vmatprep.mubr.msk.f32.mxu1 %vm596_vm0, %v3897_v8 }
 0x956   : > { %6952 = vmatmul.mubr.msk.f32.gmra.mrb[130].mxu1 %vm596_vm0, %v3898_v2  ;;  %v3900_v21 = vmax.f32 %v3874_v61, 0.0 }
 0x957   : > { %v3899_v15 = vmax.f32 %v3869_v51, 0.0  ;;  %v6927_v7 = vpop.f32.mrb[102].mxu0 }
 0x958   : > { %v3884_v22 = vadd.f32 %v6927_v7, %v5925_v32  ;;  %v3878_v57 = vpop.f32.mrb[103].mxu0 }
 0x959   : > { %v3879_v42 = vadd.f32 %v5925_v32, %v3878_v57  ;;  %6954 = vmatprep.mubr.msk.f32.mxu1 %vm596_vm0, %v3899_v15  ;;  %v8783_v32 = vld [vmem:[%s9246_s3 + $0xa] ss:$0 sm:$0xff] }
 0x95a   : > { %6955 = vmatmul.mubr.msk.f32.gmra.mrb[132].mxu1 %vm596_vm0, %v3900_v21  ;;  %v3902_v39 = vmax.f32 %v3884_v22, 0.0 }
 0x95b   : > { %v3901_v23 = vmax.f32 %v3879_v42, 0.0 }
 0x95d   : > { %6957 = vmatprep.mubr.msk.f32.mxu1 %vm596_vm0, %v3901_v23 }
 0x95e   : > { %6958 = vmatmul.mubr.msk.f32.gmra.mrb[134].mxu1 %vm596_vm0, %v3902_v39 }
 0xa15   : > { %v6938_v0 = vpop.f32.mrb[120].mxu1 }
 0xa16   : > { %v4033_v3 = vadd.f32 %v6938_v0, %v8783_v32  ;;  %v4027_v27 = vpop.f32.mrb[121].mxu1 }
 0xa17   : > { %v4028_v6 = vadd.f32 %v8783_v32, %v4027_v27 }
 0xa18   : > { %v4107_v33 = vmax.f32 %v4033_v3, 0.0 }
 0xa19   : > { %v4106_v47 = vmax.f32 %v4028_v6, 0.0  ;;  %v6941_v31 = vpop.f32.mrb[122].mxu1  ;;  %v5999_v6 = vld [vmem:[%s9245_s2 + $0xa0] sm:$0xff] }
 0xa1a   : > { %v4043_v29 = vadd.f32 %v6941_v31, %v8783_v32  ;;  %5279 = vrot.lane.b32.xlu1 %v4107_v33, %s7514_s17  ;;  %v4037_v1 = vpop.f32.mrb[123].mxu1 }
 0xa1b   : > { %v4038_v44 = vadd.f32 %v8783_v32, %v4037_v1  ;;  %5277 = vrot.lane.b32.xlu0 %v4106_v47, %s7514_s17  ;;  %6968 = vmatprep.mubr.msk.f32.mxu0 %vm596_vm0, %v4106_v47  ;;  %v6002_v1 = vld [vmem:[%s9245_s2 + $0xb8] sm:$0xff] }
 0xa1c   : > { %v4109_v49 = vmax.f32 %v4043_v29, 0.0  ;;  %7000 = vmatprep.mubr.msk.f32.mxu1 %vm596_vm0, %v4106_v47  ;;  %6969 = vmatmul.mubr.msk.f32.vlgmr.msra.gmra.mrb[56].mxu0 %vm596_vm0, %v4107_v33  ;;  %v6001_v47 = vld [vmem:[%s9245_s2 + $0xb0] sm:$0xff] }
 0xa1d   : > { %v4108_v34 = vmax.f32 %v4038_v44, 0.0  ;;  %7001 = vmatmul.mubr.msk.f32.vlgmr.msra.gmra.mrb[136].mxu1 %vm596_vm0, %v4107_v33  ;;  %v6944_v45 = vpop.f32.mrb[124].mxu1  ;;  %v6000_v33 = vld [vmem:[%s9245_s2 + $0xa8] sm:$0xff] }
 0xa1e   : > { %v4053_v8 = vadd.f32 %v6944_v45, %v8783_v32  ;;  %5283 = vrot.lane.b32.xlu1 %v4109_v49, %s7514_s17  ;;  %v4047_v53 = vpop.f32.mrb[125].mxu1  ;;  %v7240_v29 = vpack.c.bf16 %v6000_v33, %v5999_v6  ;;  %v7244_v45 = vpack.c.bf16 %v6002_v1, %v6001_v47 }
 0xa1f   : > { %v4048_v2 = vadd.f32 %v8783_v32, %v4047_v53  ;;  %5281 = vrot.lane.b32.xlu0 %v4108_v34, %s7514_s17  ;;  %6971 = vmatprep.mubr.msk.f32.mxu0 %vm596_vm0, %v4108_v34 }
 0xa20   : > { %v4111_v61 = vmax.f32 %v4053_v8, 0.0  ;;  %7003 = vmatprep.mubr.msk.f32.mxu1 %vm596_vm0, %v4108_v34  ;;  %6972 = vmatmul.mubr.msk.f32.gmra.mrb[58].mxu0 %vm596_vm0, %v4109_v49 }
 0xa21   : > { %v4110_v59 = vmax.f32 %v4048_v2, 0.0  ;;  %7004 = vmatmul.mubr.msk.f32.gmra.mrb[138].mxu1 %vm596_vm0, %v4109_v49  ;;  %v6947_v51 = vpop.f32.mrb[126].mxu1  ;;  %7241 = vmatprep.subr.bf16.mxu0 %v7240_v29 }
 0xa22   : > { %v4063_v15 = vadd.f32 %v6947_v51, %v8783_v32  ;;  %5287 = vrot.lane.b32.xlu1 %v4111_v61, %s7514_s17  ;;  %v4057_v7 = vpop.f32.mrb[127].mxu1  ;;  %7243 = vmatpush3.bf16.msra.mxu0 %v7240_v29 }
 0xa23   : > { %v4058_v21 = vadd.f32 %v8783_v32, %v4057_v7  ;;  %5285 = vrot.lane.b32.xlu0 %v4110_v59, %s7514_s17  ;;  %6974 = vmatprep.mubr.msk.f32.mxu0 %vm596_vm0, %v4110_v59 }
 0xa24   : > { %v4113_v22 = vmax.f32 %v4063_v15, 0.0  ;;  %7006 = vmatprep.mubr.msk.f32.mxu1 %vm596_vm0, %v4110_v59  ;;  %6975 = vmatmul.mubr.msk.f32.gmra.mrb[60].mxu0 %vm596_vm0, %v4111_v61 }
 0xa25   : > { %v4112_v57 = vmax.f32 %v4058_v21, 0.0  ;;  %7007 = vmatmul.mubr.msk.f32.gmra.mrb[140].mxu1 %vm596_vm0, %v4111_v61  ;;  %v6950_v42 = vpop.f32.mrb[128].mxu1  ;;  %7245 = vmatprep.subr.bf16.mxu0 %v7244_v45 }
 0xa26   : > { %v4073_v23 = vadd.f32 %v6950_v42, %v8783_v32  ;;  %5291 = vrot.lane.b32.xlu1 %v4113_v22, %s7514_s17  ;;  %v4067_v39 = vpop.f32.mrb[129].mxu1  ;;  %7247 = vmatpush3.bf16.msra.mxu0 %v7244_v45  ;;  %v6021_v42 = vld [vmem:[%s9245_s2 + $0x128] sm:$0xff] }
 0xa27   : > { %v4068_v41 = vadd.f32 %v8783_v32, %v4067_v39  ;;  %5289 = vrot.lane.b32.xlu0 %v4112_v57, %s7514_s17  ;;  %6977 = vmatprep.mubr.msk.f32.mxu0 %vm596_vm0, %v4112_v57 }
 0xa28   : > { %v4115_v11 = vmax.f32 %v4073_v23, 0.0  ;;  %7009 = vmatprep.mubr.msk.f32.mxu1 %vm596_vm0, %v4112_v57  ;;  %6978 = vmatmul.mubr.msk.f32.gmra.mrb[62].mxu0 %vm596_vm0, %v4113_v22  ;;  %v6022_v23 = vld [vmem:[%s9245_s2 + $0x130] sm:$0xff] }
 0xa29   : > { %v4114_v62 = vmax.f32 %v4068_v41, 0.0  ;;  %7010 = vmatmul.mubr.msk.f32.gmra.mrb[142].mxu1 %vm596_vm0, %v4113_v22  ;;  %v6953_v0 = vpop.f32.mrb[130].mxu1  ;;  %v6023_v41 = vld [vmem:[%s9245_s2 + $0x138] sm:$0xff] }
 0xa2a   : > { %v4083_v3 = vadd.f32 %v6953_v0, %v8783_v32  ;;  %5295 = vrot.lane.b32.xlu1 %v4115_v11, %s7514_s17  ;;  %v4077_v27 = vpop.f32.mrb[131].mxu1  ;;  %v4353_v0 = vpop.permute.xlu0 %4352 }
 0xa2b   : > { %v4078_v31 = vadd.f32 %v8783_v32, %v4077_v27  ;;  %5293 = vrot.lane.b32.xlu0 %v4114_v62, %s7514_s17  ;;  %6980 = vmatprep.mubr.msk.f32.mxu0 %vm596_vm0, %v4114_v62 }
 0xa2c   : > { %v4117_v44 = vmax.f32 %v4083_v3, 0.0  ;;  %7012 = vmatprep.mubr.msk.f32.mxu1 %vm596_vm0, %v4114_v62  ;;  %6981 = vmatmul.mubr.msk.f32.gmra.mrb[64].mxu0 %vm596_vm0, %v4115_v11  ;;  %v4355_v62 = vpop.permute.xlu1 %4354 }
 0xa2d   : > { %v4116_v49 = vmax.f32 %v4078_v31, 0.0  ;;  %7013 = vmatmul.mubr.msk.f32.gmra.mrb[144].mxu1 %vm596_vm0, %v4115_v11  ;;  %v6956_v34 = vpop.f32.mrb[132].mxu1  ;;  %v7252_v11 = vpack.c.bf16 %v6023_v41, %v6022_v23 }
 0xa2e   : > { %v4093_v8 = vadd.f32 %v6956_v34, %v8783_v32  ;;  %5299 = vrot.lane.b32.xlu1 %v4117_v44, %s7514_s17  ;;  %v4087_v53 = vpop.f32.mrb[133].mxu1  ;;  %v4357_v27 = vpop.permute.xlu0 %4356 }
 0xa2f   : > { %v4088_v2 = vadd.f32 %v8783_v32, %v4087_v53  ;;  %5297 = vrot.lane.b32.xlu0 %v4116_v49, %s7514_s17  ;;  %6983 = vmatprep.mubr.msk.f32.mxu0 %vm596_vm0, %v4116_v49 }
 0xa30   : > { %v4119_v61 = vmax.f32 %v4093_v8, 0.0  ;;  %7015 = vmatprep.mubr.msk.f32.mxu1 %vm596_vm0, %v4116_v49  ;;  %6984 = vmatmul.mubr.msk.f32.gmra.mrb[66].mxu0 %vm596_vm0, %v4117_v44  ;;  %v4359_v3 = vpop.permute.xlu1 %4358 }
 0xa31   : > { %v4118_v59 = vmax.f32 %v4088_v2, 0.0  ;;  %7016 = vmatmul.mubr.msk.f32.gmra.mrb[146].mxu1 %vm596_vm0, %v4117_v44  ;;  %v6959_v51 = vpop.f32.mrb[134].mxu1 }
 0xa32   : > { %v4103_v15 = vadd.f32 %v6959_v51, %v8783_v32  ;;  %5303 = vrot.lane.b32.xlu1 %v4119_v61, %s7514_s17  ;;  %v4097_v7 = vpop.f32.mrb[135].mxu1  ;;  %v4361_v33 = vpop.permute.xlu0 %4360 }
 0xa33   : > { %v4098_v21 = vadd.f32 %v8783_v32, %v4097_v7  ;;  %5301 = vrot.lane.b32.xlu0 %v4118_v59, %s7514_s17  ;;  %6986 = vmatprep.mubr.msk.f32.mxu0 %vm596_vm0, %v4118_v59  ;;  %v6020_v32 = vld [vmem:[%s9245_s2 + $0x120] sm:$0xff] }
 0xa34   : > { %v4121_v22 = vmax.f32 %v4103_v15, 0.0  ;;  %7018 = vmatprep.mubr.msk.f32.mxu1 %vm596_vm0, %v4118_v59  ;;  %6987 = vmatmul.mubr.msk.f32.gmra.mrb[68].mxu0 %vm596_vm0, %v4119_v61  ;;  %v7248_v39 = vpack.c.bf16 %v6021_v42, %v6020_v32  ;;  %v4363_v6 = vpop.permute.xlu1 %4362 }
 0xa35   : > { %v4120_v57 = vmax.f32 %v4098_v21, 0.0  ;;  %7019 = vmatmul.mubr.msk.f32.gmra.mrb[148].mxu1 %vm596_vm0, %v4119_v61 }
 0xa36   : > { %5307 = vrot.lane.b32.xlu1 %v4121_v22, %s7514_s17  ;;  %7249 = vmatprep.subr.bf16.mxu1 %v7248_v39  ;;  %v4365_v8 = vpop.permute.xlu0 %4364 }
 0xa37   : > { %5305 = vrot.lane.b32.xlu0 %v4120_v57, %s7514_s17  ;;  %6989 = vmatprep.mubr.msk.f32.mxu0 %vm596_vm0, %v4120_v57  ;;  %s9153_s17 = scalar_lea.vmem %s9248_s5, %s5657_s11 }
 0xa38   : > { %7021 = vmatprep.mubr.msk.f32.mxu1 %vm596_vm0, %v4120_v57  ;;  %6990 = vmatmul.mubr.msk.f32.gmra.mrb[70].mxu0 %vm596_vm0, %v4121_v22  ;;  %v4367_v49 = vpop.permute.xlu1 %4366 }
 0xa39   : > { %7022 = vmatmul.mubr.msk.f32.gmra.mrb[150].mxu1 %vm596_vm0, %v4121_v22 }
 0xa3a   : > { %7251 = vmatpush3.bf16.msra.mxu1 %v7248_v39  ;;  %v4369_v39 = vpop.permute.xlu0 %4368 }
 0xa3b   : > { %7253 = vmatprep.subr.bf16.mxu1 %v7252_v11 }
 0xa3c   : > { %v4371_v32 = vpop.permute.xlu1 %4370 }
 0xa3e   : > { %7255 = vmatpush3.bf16.msra.mxu1 %v7252_v11 }
 0xaf0   : > { %v7002_v47 = vpop.f32.mrb[136].mxu1 }
 0xaf1   : > { %v4472_v31 = vadd.f32 %v7002_v47, %v4355_v62  ;;  %v4466_v29 = vpop.f32.mrb[137].mxu1 }
 0xaf2   : > { %v4467_v1 = vadd.f32 %v4466_v29, %v4353_v0 }
 0xaf3   : > { %v4546_v44 = vadd.f32 %v8712_v25, %v4472_v31 }
 0xaf4   : > { %v4545_v34 = vadd.f32 %v8712_v25, %v4467_v1  ;;  %v7005_v45 = vpop.f32.mrb[138].mxu1  ;;  %v4375_v1 = vpop.permute.xlu1 %4374 }
 0xaf5   : > { %v4482_v53 = vadd.f32 %v7005_v45, %v4359_v3  ;;  %v4476_v2 = vpop.f32.mrb[139].mxu1  ;;  %v4562_v51 = vmax.f32 %v4546_v44, 0.0 }
 0xaf6   : > { %v4561_v61 = vmax.f32 %v4545_v34, 0.0  ;;  %v4477_v59 = vadd.f32 %v4476_v2, %v4357_v27  ;;  %v4373_v34 = vpop.permute.xlu0 %4372 }
 0xaf7   : > { %v4548_v15 = vadd.f32 %v8712_v25, %v4482_v53 }
 0xaf8   : > { %v4547_v7 = vadd.f32 %v8712_v25, %v4477_v59  ;;  %v7008_v21 = vpop.f32.mrb[140].mxu1  ;;  %7032 = vmatprep.mubr.msk.f32.mxu0 %vm596_vm0, %v4561_v61 }
 0xaf9   : > { %v4492_v22 = vadd.f32 %v7008_v21, %v4363_v6  ;;  %v4486_v57 = vpop.f32.mrb[141].mxu1  ;;  %7033 = vmatmul.mubr.msk.f32.vlgmr.msra.gmra.mrb[104].mxu0 %vm596_vm0, %v4562_v51  ;;  %v4564_v41 = vmax.f32 %v4548_v15, 0.0  ;;  %v4379_v21 = vpop.permute.xlu1 %4378 }
 0xafa   : > { %v4563_v42 = vmax.f32 %v4547_v7, 0.0  ;;  %v4487_v23 = vadd.f32 %v4486_v57, %v4361_v33 }
 0xafb   : > { %v4550_v11 = vadd.f32 %v8712_v25, %v4492_v22 }
 0xafc   : > { %v4549_v62 = vadd.f32 %v8712_v25, %v4487_v23  ;;  %v7011_v0 = vpop.f32.mrb[142].mxu1  ;;  %7035 = vmatprep.mubr.msk.f32.mxu0 %vm596_vm0, %v4563_v42 }
 0xafd   : > { %v4502_v3 = vadd.f32 %v7011_v0, %v4367_v49  ;;  %v4496_v27 = vpop.f32.mrb[143].mxu1  ;;  %7036 = vmatmul.mubr.msk.f32.gmra.mrb[106].mxu0 %vm596_vm0, %v4564_v41  ;;  %v4566_v31 = vmax.f32 %v4550_v11, 0.0 }
 0xafe   : > { %v4565_v6 = vmax.f32 %v4549_v62, 0.0  ;;  %v4497_v47 = vadd.f32 %v4496_v27, %v4365_v8 }
 0xaff   : > { %v4552_v29 = vadd.f32 %v8712_v25, %v4502_v3 }
 0xb00   : > { %v4551_v33 = vadd.f32 %v8712_v25, %v4497_v47  ;;  %v7014_v44 = vpop.f32.mrb[144].mxu1  ;;  %7038 = vmatprep.mubr.msk.f32.mxu0 %vm596_vm0, %v4565_v6  ;;  %v4383_v47 = vpop.permute.xlu1 %4382 }
 0xb01   : > { %v4512_v45 = vadd.f32 %v7014_v44, %v4371_v32  ;;  %v4506_v53 = vpop.f32.mrb[145].mxu1  ;;  %7039 = vmatmul.mubr.msk.f32.gmra.mrb[108].mxu0 %vm596_vm0, %v4566_v31  ;;  %v4568_v61 = vmax.f32 %v4552_v29, 0.0  ;;  %v4377_v32 = vpop.permute.xlu0 %4376 }
 0xb02   : > { %v4567_v49 = vmax.f32 %v4551_v33, 0.0  ;;  %v4507_v2 = vadd.f32 %v4506_v53, %v4369_v39 }
 0xb03   : > { %v4554_v59 = vadd.f32 %v8712_v25, %v4512_v45 }
 0xb04   : > { %v4553_v8 = vadd.f32 %v8712_v25, %v4507_v2  ;;  %v7017_v51 = vpop.f32.mrb[146].mxu1  ;;  %7041 = vmatprep.mubr.msk.f32.mxu0 %vm596_vm0, %v4567_v49 }
 0xb05   : > { %v4522_v15 = vadd.f32 %v7017_v51, %v4375_v1  ;;  %v4516_v7 = vpop.f32.mrb[147].mxu1  ;;  %7042 = vmatmul.mubr.msk.f32.gmra.mrb[110].mxu0 %vm596_vm0, %v4568_v61  ;;  %v4570_v42 = vmax.f32 %v4554_v59, 0.0  ;;  %v4381_v1 = vpop.permute.xlu0 %4380  ;;  %v6042_v51 = vld [vmem:[%s9245_s2 + $0x1a8] sm:$0xff] }
 0xb06   : > { %v4569_v22 = vmax.f32 %v4553_v8, 0.0  ;;  %v4517_v57 = vadd.f32 %v4516_v7, %v4373_v34  ;;  %v6041_v8 = vld [vmem:[%s9245_s2 + $0x1a0] sm:$0xff]  ;;  %v6044_v7 = vld [vmem:[%s9245_s2 + $0x1b8] sm:$0xff] }
 0xb07   : > { %v4556_v23 = vadd.f32 %v8712_v25, %v4522_v15  ;;  %v7256_v15 = vpack.c.bf16 %v6042_v51, %v6041_v8 }
 0xb08   : > { %v4555_v39 = vadd.f32 %v8712_v25, %v4517_v57  ;;  %v7020_v41 = vpop.f32.mrb[148].mxu1  ;;  %7044 = vmatprep.mubr.msk.f32.mxu0 %vm596_vm0, %v4569_v22  ;;  %v6003_v22 = vld [vmem:[%s9246_s3 + $0x7] ss:$0 sm:$0xff] }
 0xb09   : > { %v4532_v11 = vadd.f32 %v7020_v41, %v4379_v21  ;;  %v4526_v62 = vpop.f32.mrb[149].mxu1  ;;  %7045 = vmatmul.mubr.msk.f32.gmra.mrb[112].mxu0 %vm596_vm0, %v4570_v42  ;;  %v4572_v27 = vmax.f32 %v4556_v23, 0.0  ;;  %7257 = vmatprep.subr.bf16.mxu0 %v7256_v15 }
 0xb0a   : > { %v4571_v0 = vmax.f32 %v4555_v39, 0.0  ;;  %v4527_v3 = vadd.f32 %v4526_v62, %v4377_v32  ;;  %7259 = vmatpush3.bf16.msra.mxu0 %v7256_v15 }
 0xb0b   : > { %v4558_v6 = vadd.f32 %v8712_v25, %v4532_v11 }
 0xb0c   : > { %v4557_v31 = vadd.f32 %v8712_v25, %v4527_v3  ;;  %v7023_v29 = vpop.f32.mrb[150].mxu1  ;;  %7047 = vmatprep.mubr.msk.f32.mxu0 %vm596_vm0, %v4571_v0 }
 0xb0d   : > { %v4542_v33 = vadd.f32 %v7023_v29, %v4383_v47  ;;  %v4536_v44 = vpop.f32.mrb[151].mxu1  ;;  %7048 = vmatmul.mubr.msk.f32.gmra.mrb[114].mxu0 %vm596_vm0, %v4572_v27  ;;  %v4574_v53 = vmax.f32 %v4558_v6, 0.0 }
 0xb0e   : > { %v4573_v34 = vmax.f32 %v4557_v31, 0.0  ;;  %v4537_v45 = vadd.f32 %v4536_v44, %v4381_v1 }
 0xb0f   : > { %v4560_v49 = vadd.f32 %v8712_v25, %v4542_v33 }
 0xb10   : > { %v4559_v2 = vadd.f32 %v8712_v25, %v4537_v45  ;;  %7050 = vmatprep.mubr.msk.f32.mxu0 %vm596_vm0, %v4573_v34  ;;  %v6043_v25 = vld [vmem:[%s9245_s2 + $0x1b0] sm:$0xff] }
 0xb11   : > { %7051 = vmatmul.mubr.msk.f32.gmra.mrb[116].mxu0 %vm596_vm0, %v4574_v53  ;;  %v4576_v59 = vmax.f32 %v4560_v49, 0.0  ;;  %v7260_v21 = vpack.c.bf16 %v6044_v7, %v6043_v25 }
 0xb12   : > { %v4575_v61 = vmax.f32 %v4559_v2, 0.0 }
 0xb13   : > { %7261 = vmatprep.subr.bf16.mxu0 %v7260_v21 }
 0xb14   : > { %7053 = vmatprep.mubr.msk.f32.mxu0 %vm596_vm0, %v4575_v61  ;;  %7263 = vmatpush3.bf16.msra.mxu0 %v7260_v21 }
 0xb15   : > { %7054 = vmatmul.mubr.msk.f32.gmra.mrb[118].mxu0 %vm596_vm0, %v4576_v59 }
 0xbcc   : > { %v7034_v57 = vpop.f32.mrb[104].mxu0 }
 0xbcd   : > { %v4707_v32 = vadd.f32 %v7034_v57, %v6003_v22  ;;  %v4701_v42 = vpop.f32.mrb[105].mxu0 }
 0xbce   : > { %v4702_v23 = vadd.f32 %v6003_v22, %v4701_v42 }
 0xbcf   : > { %v4781_v11 = vmax.f32 %v4707_v32, 0.0 }
 0xbd0   : > { %v4780_v39 = vmax.f32 %v4702_v23, 0.0  ;;  %v7037_v41 = vpop.f32.mrb[106].mxu0 }
 0xbd1   : > { %v4717_v62 = vadd.f32 %v7037_v41, %v6003_v22  ;;  %v4711_v0 = vpop.f32.mrb[107].mxu0 }
 0xbd2   : > { %v4712_v3 = vadd.f32 %v6003_v22, %v4711_v0  ;;  %7064 = vmatprep.mubr.msk.f32.mxu1 %vm596_vm0, %v4780_v39 }
 0xbd3   : > { %7065 = vmatmul.mubr.msk.f32.vlgmr.msra.gmra.mrb[152].mxu1 %vm596_vm0, %v4781_v11  ;;  %v4783_v47 = vmax.f32 %v4717_v62, 0.0 }
 0xbd4   : > { %v4782_v27 = vmax.f32 %v4712_v3, 0.0  ;;  %v7040_v6 = vpop.f32.mrb[108].mxu0 }
 0xbd5   : > { %v4727_v31 = vadd.f32 %v7040_v6, %v6003_v22  ;;  %v4721_v29 = vpop.f32.mrb[109].mxu0 }
 0xbd6   : > { %v4722_v1 = vadd.f32 %v6003_v22, %v4721_v29  ;;  %7067 = vmatprep.mubr.msk.f32.mxu1 %vm596_vm0, %v4782_v27 }
 0xbd7   : > { %7068 = vmatmul.mubr.msk.f32.gmra.mrb[154].mxu1 %vm596_vm0, %v4783_v47  ;;  %v4785_v34 = vmax.f32 %v4727_v31, 0.0 }
 0xbd8   : > { %v4784_v33 = vmax.f32 %v4722_v1, 0.0  ;;  %v7043_v44 = vpop.f32.mrb[110].mxu0 }
 0xbd9   : > { %v4737_v45 = vadd.f32 %v7043_v44, %v6003_v22  ;;  %v4731_v53 = vpop.f32.mrb[111].mxu0  ;;  %v8939_v44 = vld [vmem:[%s9246_s3 + $0xb] ss:$0 sm:$0xff] }
 0xbda   : > { %v4732_v49 = vadd.f32 %v6003_v22, %v4731_v53  ;;  %7070 = vmatprep.mubr.msk.f32.mxu1 %vm596_vm0, %v4784_v33 }
 0xbdb   : > { %7071 = vmatmul.mubr.msk.f32.gmra.mrb[156].mxu1 %vm596_vm0, %v4785_v34  ;;  %v4787_v59 = vmax.f32 %v4737_v45, 0.0 }
 0xbdc   : > { %v4786_v2 = vmax.f32 %v4732_v49, 0.0  ;;  %v7046_v61 = vpop.f32.mrb[112].mxu0 }
 0xbdd   : > { %v4747_v8 = vadd.f32 %v7046_v61, %v6003_v22  ;;  %v4741_v51 = vpop.f32.mrb[113].mxu0 }
 0xbde   : > { %v4742_v25 = vadd.f32 %v6003_v22, %v4741_v51  ;;  %7073 = vmatprep.mubr.msk.f32.mxu1 %vm596_vm0, %v4786_v2 }
 0xbdf   : > { %7074 = vmatmul.mubr.msk.f32.gmra.mrb[158].mxu1 %vm596_vm0, %v4787_v59  ;;  %v4789_v21 = vmax.f32 %v4747_v8, 0.0 }
 0xbe0   : > { %v4788_v15 = vmax.f32 %v4742_v25, 0.0  ;;  %v7049_v7 = vpop.f32.mrb[114].mxu0 }
 0xbe1   : > { %v4757_v57 = vadd.f32 %v7049_v7, %v6003_v22  ;;  %v4751_v32 = vpop.f32.mrb[115].mxu0 }
 0xbe2   : > { %v4752_v42 = vadd.f32 %v6003_v22, %v4751_v32  ;;  %7076 = vmatprep.mubr.msk.f32.mxu1 %vm596_vm0, %v4788_v15 }
 0xbe3   : > { %7077 = vmatmul.mubr.msk.f32.gmra.mrb[160].mxu1 %vm596_vm0, %v4789_v21  ;;  %v4791_v41 = vmax.f32 %v4757_v57, 0.0 }
 0xbe4   : > { %v4790_v23 = vmax.f32 %v4752_v42, 0.0  ;;  %v7052_v39 = vpop.f32.mrb[116].mxu0 }
 0xbe5   : > { %v4767_v11 = vadd.f32 %v7052_v39, %v6003_v22  ;;  %v4761_v62 = vpop.f32.mrb[117].mxu0 }
 0xbe6   : > { %v4762_v0 = vadd.f32 %v6003_v22, %v4761_v62  ;;  %7079 = vmatprep.mubr.msk.f32.mxu1 %vm596_vm0, %v4790_v23 }
 0xbe7   : > { %7080 = vmatmul.mubr.msk.f32.gmra.mrb[162].mxu1 %vm596_vm0, %v4791_v41  ;;  %v4793_v6 = vmax.f32 %v4767_v11, 0.0 }
 0xbe8   : > { %v4792_v3 = vmax.f32 %v4762_v0, 0.0  ;;  %v7055_v27 = vpop.f32.mrb[118].mxu0 }
 0xbe9   : > { %v4777_v47 = vadd.f32 %v7055_v27, %v6003_v22  ;;  %v4771_v31 = vpop.f32.mrb[119].mxu0 }
 0xbea   : > { %v4772_v29 = vadd.f32 %v6003_v22, %v4771_v31  ;;  %7082 = vmatprep.mubr.msk.f32.mxu1 %vm596_vm0, %v4792_v3 }
 0xbeb   : > { %7083 = vmatmul.mubr.msk.f32.gmra.mrb[164].mxu1 %vm596_vm0, %v4793_v6  ;;  %v4795_v33 = vmax.f32 %v4777_v47, 0.0 }
 0xbec   : > { %v4794_v1 = vmax.f32 %v4772_v29, 0.0 }
 0xbee   : > { %7085 = vmatprep.mubr.msk.f32.mxu1 %vm596_vm0, %v4794_v1 }
 0xbef   : > { %7086 = vmatmul.mubr.msk.f32.gmra.mrb[166].mxu1 %vm596_vm0, %v4795_v33 }
 0xca6   : > { %v7066_v34 = vpop.f32.mrb[152].mxu1 }
 0xca7   : > { %v4926_v45 = vadd.f32 %v7066_v34, %v8939_v44  ;;  %v4920_v53 = vpop.f32.mrb[153].mxu1 }
 0xca8   : > { %v4921_v22 = vadd.f32 %v8939_v44, %v4920_v53 }
 0xca9   : > { %v5000_v49 = vmax.f32 %v4926_v45, 0.0 }
 0xcaa   : > { %v4999_v2 = vmax.f32 %v4921_v22, 0.0  ;;  %v7069_v61 = vpop.f32.mrb[154].mxu1 }
 0xcab   : > { %v4936_v59 = vadd.f32 %v7069_v61, %v8939_v44  ;;  %5327 = vrot.lane.b32.xlu1 %v5000_v49, %s7512_s7  ;;  %v4930_v8 = vpop.f32.mrb[155].mxu1 }
 0xcac   : > { %v4931_v51 = vadd.f32 %v8939_v44, %v4930_v8  ;;  %5325 = vrot.lane.b32.xlu0 %v4999_v2, %s7512_s7  ;;  %7096 = vmatprep.mubr.msk.f32.mxu0 %vm596_vm0, %v4999_v2 }
 0xcad   : > { %v5002_v25 = vmax.f32 %v4936_v59, 0.0  ;;  %7097 = vmatmul.mubr.msk.f32.vlgmr.msra.gmra.mrb[56].mxu0 %vm596_vm0, %v5000_v49 }
 0xcae   : > { %v5001_v15 = vmax.f32 %v4931_v51, 0.0  ;;  %v7072_v7 = vpop.f32.mrb[156].mxu1  ;;  %v5232_v51 = vpop.permute.xlu1 %5231 }
 0xcaf   : > { %v4946_v21 = vadd.f32 %v7072_v7, %v8939_v44  ;;  %5331 = vrot.lane.b32.xlu1 %v5002_v25, %s7512_s7  ;;  %v4940_v57 = vpop.f32.mrb[157].mxu1  ;;  %v5374_v37 = vsel %vm596_vm0, %v8428_v18, %v5232_v51 }
 0xcb0   : > { %v4941_v32 = vadd.f32 %v8939_v44, %v4940_v57  ;;  %5329 = vrot.lane.b32.xlu0 %v5001_v15, %s7512_s7  ;;  %7099 = vmatprep.mubr.msk.f32.mxu0 %vm596_vm0, %v5001_v15  ;;  %v5230_v15 = vpop.permute.xlu0 %5229 }
 0xcb1   : > { %v5004_v42 = vmax.f32 %v4946_v21, 0.0  ;;  %7100 = vmatmul.mubr.msk.f32.gmra.mrb[58].mxu0 %vm596_vm0, %v5002_v25 }
 0xcb2   : > { %v5003_v23 = vmax.f32 %v4941_v32, 0.0  ;;  %v7075_v39 = vpop.f32.mrb[158].mxu1 }
 0xcb3   : > { %v4956_v41 = vadd.f32 %v7075_v39, %v8939_v44  ;;  %5335 = vrot.lane.b32.xlu1 %v5004_v42, %s7512_s7  ;;  %v4950_v11 = vpop.f32.mrb[159].mxu1  ;;  %v5236_v39 = vpop.permute.xlu1 %5235 }
 0xcb4   : > { %v4951_v62 = vadd.f32 %v8939_v44, %v4950_v11  ;;  %5333 = vrot.lane.b32.xlu0 %v5003_v23, %s7512_s7  ;;  %7102 = vmatprep.mubr.msk.f32.mxu0 %vm596_vm0, %v5003_v23  ;;  %v5234_v11 = vpop.permute.xlu0 %5233  ;;  %v5376_v46 = vsel %vm596_vm0, %v8442_v4, %v5236_v39 }
 0xcb5   : > { %v5006_v0 = vmax.f32 %v4956_v41, 0.0  ;;  %7103 = vmatmul.mubr.msk.f32.gmra.mrb[60].mxu0 %vm596_vm0, %v5004_v42 }
 0xcb6   : > { %v5005_v3 = vmax.f32 %v4951_v62, 0.0  ;;  %v7078_v27 = vpop.f32.mrb[160].mxu1 }
 0xcb7   : > { %v4966_v6 = vadd.f32 %v7078_v27, %v8939_v44  ;;  %5339 = vrot.lane.b32.xlu1 %v5006_v0, %s7512_s7  ;;  %v4960_v47 = vpop.f32.mrb[161].mxu1 }
 0xcb8   : > { %v4961_v31 = vadd.f32 %v8939_v44, %v4960_v47  ;;  %5337 = vrot.lane.b32.xlu0 %v5005_v3, %s7512_s7  ;;  %7105 = vmatprep.mubr.msk.f32.mxu0 %vm596_vm0, %v5005_v3  ;;  %v5238_v62 = vpop.permute.xlu0 %5237 }
 0xcb9   : > { %v5008_v29 = vmax.f32 %v4966_v6, 0.0  ;;  %7106 = vmatmul.mubr.msk.f32.gmra.mrb[62].mxu0 %vm596_vm0, %v5006_v0 }
 0xcba   : > { %v5007_v1 = vmax.f32 %v4961_v31, 0.0  ;;  %v7081_v33 = vpop.f32.mrb[162].mxu1 }
 0xcbb   : > { %v4976_v34 = vadd.f32 %v7081_v33, %v8939_v44  ;;  %5343 = vrot.lane.b32.xlu1 %v5008_v29, %s7512_s7  ;;  %v4970_v45 = vpop.f32.mrb[163].mxu1 }
 0xcbc   : > { %v4971_v53 = vadd.f32 %v8939_v44, %v4970_v45  ;;  %5341 = vrot.lane.b32.xlu0 %v5007_v1, %s7512_s7  ;;  %7108 = vmatprep.mubr.msk.f32.mxu0 %vm596_vm0, %v5007_v1  ;;  %v8999_v3 = vpop.permute.xlu0 %5241 }
 0xcbd   : > { %v5010_v22 = vmax.f32 %v4976_v34, 0.0  ;;  %7109 = vmatmul.mubr.msk.f32.gmra.mrb[64].mxu0 %vm596_vm0, %v5008_v29 }
 0xcbe   : > { %v5009_v49 = vmax.f32 %v4971_v53, 0.0  ;;  %v7084_v2 = vpop.f32.mrb[164].mxu1 }
 0xcbf   : > { %v4986_v61 = vadd.f32 %v7084_v2, %v8939_v44  ;;  %5347 = vrot.lane.b32.xlu1 %v5010_v22, %s7512_s7  ;;  %v4980_v59 = vpop.f32.mrb[165].mxu1 }
 0xcc0   : > { %v4981_v8 = vadd.f32 %v8939_v44, %v4980_v59  ;;  %5345 = vrot.lane.b32.xlu0 %v5009_v49, %s7512_s7  ;;  %7111 = vmatprep.mubr.msk.f32.mxu0 %vm596_vm0, %v5009_v49  ;;  %v9003_v6 = vpop.permute.xlu0 %5245 }
 0xcc1   : > { %v5012_v25 = vmax.f32 %v4986_v61, 0.0  ;;  %7112 = vmatmul.mubr.msk.f32.gmra.mrb[66].mxu0 %vm596_vm0, %v5010_v22 }
 0xcc2   : > { %v5011_v7 = vmax.f32 %v4981_v8, 0.0  ;;  %v7087_v21 = vpop.f32.mrb[166].mxu1 }
 0xcc3   : > { %v8980_v57 = vadd.f32 %v7087_v21, %v8939_v44  ;;  %5351 = vrot.lane.b32.xlu1 %v5012_v25, %s7512_s7  ;;  %v4990_v32 = vpop.f32.mrb[167].mxu1 }
 0xcc4   : > { %v8984_v42 = vadd.f32 %v8939_v44, %v4990_v32  ;;  %5349 = vrot.lane.b32.xlu0 %v5011_v7, %s7512_s7  ;;  %7114 = vmatprep.mubr.msk.f32.mxu0 %vm596_vm0, %v5011_v7  ;;  %v5240_v44 = vpop.permute.xlu1 %5239  ;;  %v9007_v31 = vpop.permute.xlu0 %5249 }
 0xcc5   : > { %7115 = vmatmul.mubr.msk.f32.gmra.mrb[68].mxu0 %vm596_vm0, %v5012_v25  ;;  %v9250_v41 = vmax.f32 %v8980_v57, 0.0  ;;  %v5378_v4 = vsel %vm596_vm0, %v8456_v17, %v5240_v44 }
 0xcc6   : > { %v9249_v23 = vmax.f32 %v8984_v42, 0.0 }
 0xcc8   : > { %7117 = vmatprep.mubr.msk.f32.mxu0 %vm596_vm0, %v9249_v23  ;;  %v8997_v0 = vpop.permute.xlu1 %5243  ;;  %v9011_v1 = vpop.permute.xlu0 %5253 }
 0xcc9   : > { %7118 = vmatmul.mubr.msk.f32.gmra.mrb[70].mxu0 %vm596_vm0, %v9250_v41  ;;  %v5380_v17 = vsel %vm596_vm0, %v8470_v13, %v8997_v0 }
 0xccc   : > { %v9001_v27 = vpop.permute.xlu1 %5247  ;;  %v9015_v34 = vpop.permute.xlu0 %5257 }
 0xccd   : > { %9262 = vst [vmem:[#allocation9_spill] sm:$0xff] %v9015_v34  ;;  %v5382_v13 = vsel %vm596_vm0, %v8484_v38, %v9001_v27 }
 0xcd0   : > { %v9005_v47 = vpop.permute.xlu1 %5251  ;;  %v5278_v53 = vpop.permute.xlu0 %5277 }
 0xcd1   : > { %v5384_v38 = vsel %vm596_vm0, %v8498_v48, %v9005_v47 }
 0xcd4   : > { %v9009_v29 = vpop.permute.xlu1 %5255  ;;  %v5282_v49 = vpop.permute.xlu0 %5281 }
 0xcd5   : > { %v5386_v47 = vsel %vm596_vm0, %v8512_v35, %v9009_v29  ;;  %v5826_v35 = vld [vmem:[%s9246_s3 + $0xc] ss:$0 sm:$0xff] }
 0xcd8   : > { %v9013_v33 = vpop.permute.xlu1 %5259  ;;  %v5286_v61 = vpop.permute.xlu0 %5285 }
 0xcd9   : > { %9261 = vst [vmem:[#allocation8_spill] sm:$0xff] %v9013_v33  ;;  %v5373_v33 = vsel %vm596_vm0, %v8426_v55, %v5230_v15  ;;  %v5375_v55 = vsel %vm596_vm0, %v8440_v63, %v5234_v11 }
 0xcdc   : > { %v5280_v45 = vpop.permute.xlu1 %5279  ;;  %v5290_v8 = vpop.permute.xlu0 %5289 }
 0xce0   : > { %v5284_v22 = vpop.permute.xlu1 %5283  ;;  %v5294_v7 = vpop.permute.xlu0 %5293 }
 0xce4   : > { %v5288_v2 = vpop.permute.xlu1 %5287  ;;  %v9019_v32 = vpop.permute.xlu0 %5297 }
 0xce8   : > { %v5292_v59 = vpop.permute.xlu1 %5291  ;;  %v9025_v41 = vpop.permute.xlu0 %5301 }
 0xce9   : > { %v5397_v44 = vsel %vm5389_vm1, %v5380_v17, %v5292_v59 }
 0xcec   : > { %v5296_v25 = vpop.permute.xlu1 %5295  ;;  %v9032_v34 = vpop.permute.xlu0 %5305 }
 0xced   : > { %9264 = vst [vmem:[#allocation11_spill] sm:$0xff] %v9032_v34  ;;  %v5390_v34 = vsel %vm5389_vm1, %v5373_v33, %v5278_v53  ;;  %v5392_v33 = vsel %vm5389_vm1, %v5375_v55, %v5282_v49  ;;  %v5399_v0 = vsel %vm5389_vm1, %v5382_v13, %v5296_v25 }
 0xcf0   : > { %v9017_v21 = vpop.permute.xlu1 %5299 }
 0xcf1   : > { %v5401_v27 = vsel %vm5389_vm1, %v5384_v38, %v9017_v21  ;;  %v9265_v38 = vmax.f32 %v8980_v57, 0.0 }
 0xcf4   : > { %v9023_v23 = vpop.permute.xlu1 %5303 }
 0xcf8   : > { %v9029_v10 = vpop.permute.xlu1 %5307 }
 0xcf9   : > { %9263 = vst [vmem:[#allocation10_spill] sm:$0xff] %v9029_v10  ;;  %v5391_v10 = vsel %vm5389_vm1, %v5374_v37, %v5280_v45  ;;  %v5393_v37 = vsel %vm5389_vm1, %v5376_v46, %v5284_v22  ;;  %v5395_v46 = vsel %vm5389_vm1, %v5378_v4, %v5288_v2 }
 0xd1d   : > { %v5328_v56 = vpop.permute.xlu1 %5327 }
 0xd1e   : > { %v5408_v18 = vsel %vm5406_vm2, %v5391_v10, %v5328_v56  ;;  %v5326_v51 = vpop.permute.xlu0 %5325 }
 0xd1f   : > { %5424 = vst [vmem:[%s9041_s12 + $0x8] sm:$0xff] %v5408_v18  ;;  %v5407_v60 = vsel %vm5406_vm2, %v5390_v34, %v5326_v51 }
 0xd20   : > { %5423 = vst [vmem:[%s9041_s12] sm:$0xff] %v5407_v60  ;;  %v5377_v60 = vsel %vm596_vm0, %v8454_v16, %v5238_v62  ;;  %v5379_v16 = vsel %vm596_vm0, %v8468_v20, %v8999_v3  ;;  %v5381_v20 = vsel %vm596_vm0, %v8482_v14, %v9003_v6  ;;  %v5383_v14 = vsel %vm596_vm0, %v8496_v36, %v9007_v31 }
 0xd21   : > { %v5332_v15 = vpop.permute.xlu1 %5331  ;;  %v5394_v39 = vsel %vm5389_vm1, %v5377_v60, %v5286_v61  ;;  %v5396_v22 = vsel %vm5389_vm1, %v5379_v16, %v5290_v8  ;;  %v5398_v59 = vsel %vm5389_vm1, %v5381_v20, %v5294_v7  ;;  %v5400_v25 = vsel %vm5389_vm1, %v5383_v14, %v9019_v32 }
 0xd22   : > { %v5410_v56 = vsel %vm5406_vm2, %v5393_v37, %v5332_v15  ;;  %v5330_v10 = vpop.permute.xlu0 %5329  ;;  %v5385_v36 = vsel %vm596_vm0, %v8510_v58, %v9011_v1  ;;  %v5403_v31 = vsel %vm5389_vm1, %v5386_v47, %v9023_v23  ;;  %v9266_v14 = vmax.f32 %v8984_v42, 0.0 }
 0xd23   : > { %5426 = vst [vmem:[%s9041_s12 + $0x18] sm:$0xff] %v5410_v56  ;;  %v5409_v34 = vsel %vm5406_vm2, %v5392_v33, %v5330_v10  ;;  %v5402_v32 = vsel %vm5389_vm1, %v5385_v36, %v9025_v41 }
 0xd24   : > { %5425 = vst [vmem:[%s9041_s12 + $0x10] sm:$0xff] %v5409_v34 }
 0xd25   : > { %v5336_v63 = vpop.permute.xlu1 %5335 }
 0xd26   : > { %v5412_v11 = vsel %vm5406_vm2, %v5395_v46, %v5336_v63  ;;  %v5334_v45 = vpop.permute.xlu0 %5333 }
 0xd27   : > { %5428 = vst [vmem:[%s9041_s12 + $0x28] sm:$0xff] %v5412_v11  ;;  %v5411_v53 = vsel %vm5406_vm2, %v5394_v39, %v5334_v45 }
 0xd28   : > { %5427 = vst [vmem:[%s9041_s12 + $0x20] sm:$0xff] %v5411_v53 }
 0xd29   : > { %v5340_v62 = vpop.permute.xlu1 %5339 }
 0xd2a   : > { %v5414_v49 = vsel %vm5406_vm2, %v5397_v44, %v5340_v62  ;;  %v5338_v2 = vpop.permute.xlu0 %5337 }
 0xd2b   : > { %5430 = vst [vmem:[%s9041_s12 + $0x38] sm:$0xff] %v5414_v49  ;;  %v5413_v61 = vsel %vm5406_vm2, %v5396_v22, %v5338_v2 }
 0xd2c   : > { %5429 = vst [vmem:[%s9041_s12 + $0x30] sm:$0xff] %v5413_v61 }
 0xd2d   : > { %v5344_v3 = vpop.permute.xlu1 %5343 }
 0xd2e   : > { %v5416_v8 = vsel %vm5406_vm2, %v5399_v0, %v5344_v3  ;;  %v5342_v18 = vpop.permute.xlu0 %5341 }
 0xd2f   : > { %5432 = vst [vmem:[%s9041_s12 + $0x48] sm:$0xff] %v5416_v8  ;;  %v5415_v51 = vsel %vm5406_vm2, %v5398_v59, %v5342_v18 }
 0xd30   : > { %5431 = vst [vmem:[%s9041_s12 + $0x40] sm:$0xff] %v5415_v51 }
 0xd31   : > { %v5348_v6 = vpop.permute.xlu1 %5347 }
 0xd32   : > { %v5418_v7 = vsel %vm5406_vm2, %v5401_v27, %v5348_v6  ;;  %v5346_v55 = vpop.permute.xlu0 %5345 }
 0xd33   : > { %5434 = vst [vmem:[%s9041_s12 + $0x58] sm:$0xff] %v5418_v7  ;;  %v5417_v48 = vsel %vm5406_vm2, %v5400_v25, %v5346_v55 }
 0xd34   : > { %5433 = vst [vmem:[%s9041_s12 + $0x50] sm:$0xff] %v5417_v48 }
 0xd35   : > { %v5352_v21 = vpop.permute.xlu1 %5351 }
 0xd36   : > { %v5420_v37 = vsel %vm5406_vm2, %v5403_v31, %v5352_v21  ;;  %v5350_v15 = vpop.permute.xlu0 %5349 }
 0xd37   : > { %5436 = vst [vmem:[%s9041_s12 + $0x68] sm:$0xff] %v5420_v37  ;;  %v5419_v33 = vsel %vm5406_vm2, %v5402_v32, %v5350_v15 }
 0xd38   : > { %5435 = vst [vmem:[%s9041_s12 + $0x60] sm:$0xff] %v5419_v33 }
 0xd80   : > { %v7098_v29 = vpop.f32.mrb[56].mxu0 }
 0xd81   : > { %v7268_v58 = vadd.f32 %v7098_v29, %v5826_v35  ;;  %v5134_v1 = vpop.f32.mrb[57].mxu0 }
 0xd82   : > { %v7269_v56 = vadd.f32 %v5826_v35, %v5134_v1 }
 0xd83   : > { %5457 = vrot.lane.b32.xlu1 %v7268_v58, %s7513_s28 }
 0xd84   : > { %5455 = vrot.lane.b32.xlu0 %v7269_v56, %s7513_s28  ;;  %v7101_v23 = vpop.f32.mrb[58].mxu0 }
 0xd85   : > { %v7270_v41 = vadd.f32 %v7101_v23, %v5826_v35  ;;  %v5144_v10 = vpop.f32.mrb[59].mxu0 }
 0xd86   : > { %v7271_v34 = vadd.f32 %v5826_v35, %v5144_v10 }
 0xd87   : > { %5461 = vrot.lane.b32.xlu1 %v7270_v41, %s7513_s28 }
 0xd88   : > { %5459 = vrot.lane.b32.xlu0 %v7271_v34, %s7513_s28  ;;  %v7104_v4 = vpop.f32.mrb[60].mxu0 }
 0xd89   : > { %v7272_v60 = vadd.f32 %v7104_v4, %v5826_v35  ;;  %v5154_v46 = vpop.f32.mrb[61].mxu0 }
 0xd8a   : > { %v7273_v63 = vadd.f32 %v5826_v35, %v5154_v46 }
 0xd8b   : > { %5465 = vrot.lane.b32.xlu1 %v7272_v60, %s7513_s28 }
 0xd8c   : > { %5463 = vrot.lane.b32.xlu0 %v7273_v63, %s7513_s28  ;;  %v7107_v39 = vpop.f32.mrb[62].mxu0 }
 0xd8d   : > { %v7274_v11 = vadd.f32 %v7107_v39, %v5826_v35  ;;  %v5164_v45 = vpop.f32.mrb[63].mxu0 }
 0xd8e   : > { %v7275_v53 = vadd.f32 %v5826_v35, %v5164_v45 }
 0xd8f   : > { %5469 = vrot.lane.b32.xlu1 %v7274_v11, %s7513_s28 }
 0xd90   : > { %5467 = vrot.lane.b32.xlu0 %v7275_v53, %s7513_s28  ;;  %v7110_v17 = vpop.f32.mrb[64].mxu0  ;;  %v9268_v53 = vld [vmem:[#allocation5_spill] sm:$0xff] }
 0xd91   : > { %v7276_v16 = vadd.f32 %v7110_v17, %v5826_v35  ;;  %v5174_v44 = vpop.f32.mrb[65].mxu0 }
 0xd92   : > { %v7277_v62 = vadd.f32 %v5826_v35, %v5174_v44  ;;  %v9269_v44 = vld [vmem:[#allocation4_spill] sm:$0xff] }
 0xd93   : > { %5473 = vrot.lane.b32.xlu1 %v7276_v16, %s7513_s28 }
 0xd94   : > { %5471 = vrot.lane.b32.xlu0 %v7277_v62, %s7513_s28  ;;  %v7113_v22 = vpop.f32.mrb[66].mxu0 }
 0xd95   : > { %v7278_v49 = vadd.f32 %v7113_v22, %v5826_v35  ;;  %v5184_v2 = vpop.f32.mrb[67].mxu0  ;;  %v9270_v22 = vld [vmem:[#allocation8_spill] sm:$0xff] }
 0xd96   : > { %v7279_v61 = vadd.f32 %v5826_v35, %v5184_v2 }
 0xd97   : > { %5477 = vrot.lane.b32.xlu1 %v7278_v49, %s7513_s28  ;;  %v9271_v49 = vld [vmem:[#allocation7_spill] sm:$0xff] }
 0xd98   : > { %5475 = vrot.lane.b32.xlu0 %v7279_v61, %s7513_s28  ;;  %v7116_v13 = vpop.f32.mrb[68].mxu0  ;;  %v5388_v2 = vsel %vm596_vm0, %v9271_v49, %v9270_v22 }
 0xd99   : > { %v7280_v20 = vadd.f32 %v7116_v13, %v5826_v35  ;;  %v5194_v0 = vpop.f32.mrb[69].mxu0  ;;  %v9272_v13 = vld [vmem:[#allocation9_spill] sm:$0xff] }
 0xd9a   : > { %v7281_v3 = vadd.f32 %v5826_v35, %v5194_v0 }
 0xd9b   : > { %5481 = vrot.lane.b32.xlu1 %v7280_v20, %s7513_s28  ;;  %v9273_v20 = vld [vmem:[#allocation6_spill] sm:$0xff] }
 0xd9c   : > { %5479 = vrot.lane.b32.xlu0 %v7281_v3, %s7513_s28  ;;  %v7119_v59 = vpop.f32.mrb[70].mxu0  ;;  %v5387_v0 = vsel %vm596_vm0, %v9273_v20, %v9272_v13  ;;  %v9274_v3 = vld [vmem:[#allocation10_spill] sm:$0xff] }
 0xd9d   : > { %v7282_v8 = vadd.f32 %v7119_v59, %v5826_v35  ;;  %v5204_v18 = vpop.f32.mrb[71].mxu0  ;;  %v5405_v59 = vsel %vm5389_vm1, %v5388_v2, %v9274_v3 }
 0xd9e   : > { %v7283_v51 = vadd.f32 %v5826_v35, %v5204_v18  ;;  %v9275_v18 = vld [vmem:[#allocation11_spill] sm:$0xff] }
 0xd9f   : > { %5485 = vrot.lane.b32.xlu1 %v7282_v8, %s7513_s28 }
 0xda0   : > { %5483 = vrot.lane.b32.xlu0 %v7283_v51, %s7513_s28  ;;  %v5404_v51 = vsel %vm5389_vm1, %v5387_v0, %v9275_v18 }
 0xda3   : > { %5355 = vrot.lane.b32.xlu1 %v9265_v38, %s7512_s7 }
 0xda4   : > { %5353 = vrot.lane.b32.xlu0 %v9266_v14, %s7512_s7 }
 0xdf5   : > { %v5458_v27 = vpop.permute.xlu1 %5457 }
 0xdf6   : > { %v5504_v6 = vsel %vm596_vm0, %v8150_v5, %v5458_v27  ;;  %v5456_v57 = vpop.permute.xlu0 %5455 }
 0xdf7   : > { %v5520_v25 = vsel %vm5389_vm1, %v5504_v6, 0.0  ;;  %v5503_v42 = vsel %vm596_vm0, %v8147_v54, %v5456_v57 }
 0xdf8   : > { %5536 = vst [vmem:[%s9153_s17 + $0x8] sm:$0xff] %v5520_v25  ;;  %v5519_v7 = vsel %vm5389_vm1, %v5503_v42, 0.0 }
 0xdf9   : > { %5535 = vst [vmem:[%s9153_s17] sm:$0xff] %v5519_v7  ;;  %v5462_v55 = vpop.permute.xlu1 %5461 }
 0xdfa   : > { %v5506_v48 = vsel %vm596_vm0, %v8183_v9, %v5462_v55  ;;  %v5460_v47 = vpop.permute.xlu0 %5459 }
 0xdfb   : > { %v5522_v36 = vsel %vm5389_vm1, %v5506_v48, 0.0  ;;  %v5505_v5 = vsel %vm596_vm0, %v8179_v19, %v5460_v47 }
 0xdfc   : > { %5538 = vst [vmem:[%s9153_s17 + $0x18] sm:$0xff] %v5522_v36  ;;  %v5521_v54 = vsel %vm5389_vm1, %v5505_v5, 0.0 }
 0xdfd   : > { %5537 = vst [vmem:[%s9153_s17 + $0x10] sm:$0xff] %v5521_v54  ;;  %v5466_v31 = vpop.permute.xlu1 %5465 }
 0xdfe   : > { %v5508_v21 = vsel %vm596_vm0, %v8201_v12, %v5466_v31  ;;  %v5464_v32 = vpop.permute.xlu0 %5463 }
 0xdff   : > { %v5524_v37 = vsel %vm5389_vm1, %v5508_v21, 0.0  ;;  %v5507_v9 = vsel %vm596_vm0, %v8198_v40, %v5464_v32 }
 0xe00   : > { %5540 = vst [vmem:[%s9153_s17 + $0x28] sm:$0xff] %v5524_v37  ;;  %v5523_v19 = vsel %vm5389_vm1, %v5507_v9, 0.0 }
 0xe01   : > { %5539 = vst [vmem:[%s9153_s17 + $0x20] sm:$0xff] %v5523_v19  ;;  %v5470_v15 = vpop.permute.xlu1 %5469 }
 0xe02   : > { %v5510_v33 = vsel %vm596_vm0, %v8218_v50, %v5470_v15  ;;  %v5468_v35 = vpop.permute.xlu0 %5467 }
 0xe03   : > { %v5526_v29 = vsel %vm5389_vm1, %v5510_v33, 0.0  ;;  %v5509_v12 = vsel %vm596_vm0, %v8215_v26, %v5468_v35 }
 0xe04   : > { %5542 = vst [vmem:[%s9153_s17 + $0x38] sm:$0xff] %v5526_v29  ;;  %v5525_v40 = vsel %vm5389_vm1, %v5509_v12, 0.0 }
 0xe05   : > { %5541 = vst [vmem:[%s9153_s17 + $0x30] sm:$0xff] %v5525_v40  ;;  %v5474_v58 = vpop.permute.xlu1 %5473 }
 0xe06   : > { %v5512_v1 = vsel %vm596_vm0, %v8234_v24, %v5474_v58  ;;  %v5472_v56 = vpop.permute.xlu0 %5471 }
 0xe07   : > { %v5528_v23 = vsel %vm5389_vm1, %v5512_v1, 0.0  ;;  %v5511_v50 = vsel %vm596_vm0, %v8224_v52, %v5472_v56 }
 0xe08   : > { %5544 = vst [vmem:[%s9153_s17 + $0x48] sm:$0xff] %v5528_v23  ;;  %v5527_v26 = vsel %vm5389_vm1, %v5511_v50, 0.0 }
 0xe09   : > { %5543 = vst [vmem:[%s9153_s17 + $0x40] sm:$0xff] %v5527_v26  ;;  %v5478_v41 = vpop.permute.xlu1 %5477 }
 0xe0a   : > { %v5514_v10 = vsel %vm596_vm0, %v8246_v28, %v5478_v41  ;;  %v5476_v34 = vpop.permute.xlu0 %5475  ;;  %v9267_v28 = vld [vmem:[#allocation3_spill] sm:$0xff] }
 0xe0b   : > { %v5530_v4 = vsel %vm5389_vm1, %v5514_v10, 0.0  ;;  %v5513_v24 = vsel %vm596_vm0, %v8238_v30, %v5476_v34 }
 0xe0c   : > { %5546 = vst [vmem:[%s9153_s17 + $0x58] sm:$0xff] %v5530_v4  ;;  %v5529_v60 = vsel %vm5389_vm1, %v5513_v24, 0.0 }
 0xe0d   : > { %5545 = vst [vmem:[%s9153_s17 + $0x50] sm:$0xff] %v5529_v60  ;;  %v5482_v52 = vpop.permute.xlu1 %5481 }
 0xe0e   : > { %v5516_v46 = vsel %vm596_vm0, %v8258_v43, %v5482_v52  ;;  %v5480_v63 = vpop.permute.xlu0 %5479 }
 0xe0f   : > { %v5532_v39 = vsel %vm5389_vm1, %v5516_v46, 0.0  ;;  %v5515_v11 = vsel %vm596_vm0, %v9267_v28, %v5480_v63 }
 0xe10   : > { %5548 = vst [vmem:[%s9153_s17 + $0x68] sm:$0xff] %v5532_v39  ;;  %v5531_v45 = vsel %vm5389_vm1, %v5515_v11, 0.0 }
 0xe11   : > { %5547 = vst [vmem:[%s9153_s17 + $0x60] sm:$0xff] %v5531_v45  ;;  %v5486_v30 = vpop.permute.xlu1 %5485 }
 0xe12   : > { %v5518_v17 = vsel %vm596_vm0, %v9268_v53, %v5486_v30  ;;  %v5484_v16 = vpop.permute.xlu0 %5483 }
 0xe13   : > { %v5534_v43 = vsel %vm5389_vm1, %v5518_v17, 0.0  ;;  %v5517_v62 = vsel %vm596_vm0, %v9269_v44, %v5484_v16 }
 0xe14   : > { %5550 = vst [vmem:[%s9153_s17 + $0x78] sm:$0xff] %v5534_v43  ;;  %v5533_v61 = vsel %vm5389_vm1, %v5517_v62, 0.0 }
 0xe15   : > { %5549 = vst [vmem:[%s9153_s17 + $0x70] sm:$0xff] %v5533_v61  ;;  %v5356_v8 = vpop.permute.xlu1 %5355 }
 0xe16   : > { %v5422_v38 = vsel %vm5406_vm2, %v5405_v59, %v5356_v8  ;;  %v5354_v14 = vpop.permute.xlu0 %5353 }
 0xe17   : > { %5438 = vst [vmem:[%s9041_s12 + $0x78] sm:$0xff] %v5422_v38  ;;  %v5421_v27 = vsel %vm5406_vm2, %v5404_v51, %v5354_v14 }
 0xe18   : > { %5437 = vst [vmem:[%s9041_s12 + $0x70] sm:$0xff] %v5421_v27 }
 0xe19 PF: > { %p13_p9 = scmp.ge.s32.totalorder %s7562_s22, 4   ;;  %s9276_s18 = smov %s7506_s19 }
 0xe1a   : > { %s9277_s19 = smov %s7571_s25  ;;  %s9278_s20 = smov %s7562_s22 }
 0xe1b   :  { %15 = sbr.rel (!%p13_p9) target bundleno = 2 (0x2), region = 134 }

</bundles_post_ra>
